<compile_context>
chip_gen: v5e
topology: v5e:2x2
jax: 0.10.0
libtpu: 0.0.40
codegen_flags: <defaults>
</compile_context>

<pallas_src>
import jax
import jax.numpy as jnp
from jax.experimental import pallas as pl
from jax.experimental.pallas import tpu as pltpu

NUM_CLASSES = 7
IN_FEATURES = 48 * 48   # 2304
H1, H2, H3 = 512, 256, 128
OUT_PAD = 128           # fc4 output padded to a full 128-lane slab
THRESHOLD = 1.0


def _snn_kernel(x_ref, w1_ref, b1_ref, w2_ref, b2_ref, w3_ref, b3_ref,
                w4_ref, b4_ref, out_ref, spk3_ref, mem3_ref):
    # f32 -> bf16 cast fused into the kernel (VPU has slack; avoids a second
    # pass over x in HBM).
    x = x_ref[...].astype(jnp.bfloat16)                              # (TB, 2304)

    # fc1 + lif1 (single step, zero-init membrane => spk = (cur > thr), mem = cur)
    cur1 = jnp.dot(x, w1_ref[...], preferred_element_type=jnp.float32) + b1_ref[...]
    spk1 = (cur1 > THRESHOLD).astype(jnp.bfloat16)                   # 0/1 -> lossless bf16

    # fc2 + lif2
    cur2 = jnp.dot(spk1, w2_ref[...], preferred_element_type=jnp.float32) + b2_ref[...]
    spk2 = (cur2 > THRESHOLD).astype(jnp.bfloat16)

    # fc3 + lif3
    cur3 = jnp.dot(spk2, w3_ref[...], preferred_element_type=jnp.float32) + b3_ref[...]
    spk3 = (cur3 > THRESHOLD).astype(jnp.bfloat16)

    # fc4 (no spiking applied to the output in the reference forward)
    out = jnp.dot(spk3, w4_ref[...], preferred_element_type=jnp.float32) + b4_ref[...]

    out_ref[...] = out.astype(jnp.bfloat16)     # (TB, 128) bf16, lane-dense, zero-padded lanes
    spk3_ref[...] = spk3                        # bf16 (exact 0/1)
    mem3_ref[...] = cur3                        # f32; mem3 == cur3 (single step, zero init)


def prepare_params(params):
    """One-time preprocessing: cast weights to bf16, pad fc4 to 128 lanes.

    Hoisted out of the per-call path so the pallas_call only DMAs the
    already-converted weights.
    (A v5e-specific int8 fc1 path would go here; not implemented since it
    must not be used on v7x whose MXU is fp8-only.)"""
    (w1, b1), (w2, b2), (w3, b3), (w4, b4) = params
    w4p = jnp.zeros((H3, OUT_PAD), jnp.float32).at[:, :NUM_CLASSES].set(w4)
    b4p = jnp.zeros((1, OUT_PAD), jnp.float32).at[:, :NUM_CLASSES].set(b4)
    return (w1.astype(jnp.bfloat16), b1.astype(jnp.float32),
            w2.astype(jnp.bfloat16), b2.astype(jnp.float32),
            w3.astype(jnp.bfloat16), b3.astype(jnp.float32),
            w4p.astype(jnp.bfloat16), b4p)


def _choose_tile(B):
    """Batch tile: multiple of 16 (bf16 sublane packing of the bf16 outputs).

    * Large batches: 512 rows (~85% of HBM roofline in the tile-size sweep;
      ~16 MiB VMEM incl. double-buffered f32 x tiles -> fits the 32 MiB
      scoped limit on v5e/v6e/v7x).
    * Mid-size batches: split into >=2 tiles so the "parallel" batch axis can
      be sharded across both v7x TensorCores.
    """
    if B >= 1024:
        return 512
    if B > 16:
        half = -(-B // 2)                     # ceil(B / 2)
        return min(512, -(-half // 16) * 16)  # round up to multiple of 16
    return 16


def feedforward_snn(x, prepared_params):
    """x: (B, 1, 48, 48) float32 NCHW. Returns (out, spk3, mem3) as in PyTorch."""
    B = x.shape[0]
    # Contiguous NCHW -> (B, 2304): a free relayout, no extra HBM pass.
    x_flat = x.reshape(B, IN_FEATURES)

    TB = _choose_tile(B)
    grid = (pl.cdiv(B, TB),)   # ragged tail tile masked by Pallas; no jnp.pad copy

    w1, b1, w2, b2, w3, b3, w4, b4 = prepared_params

    def _resident(shape):
        # Weights/biases: same block every grid step -> stay VMEM-resident.
        return pl.BlockSpec(shape, lambda i: (0, 0))

    grid_spec = pltpu.PrefetchScalarGridSpec(
        num_scalar_prefetch=0,
        grid=grid,
        in_specs=[
            pl.BlockSpec((TB, IN_FEATURES), lambda i: (i, 0)),   # x tile (f32), pipelined
            _resident((IN_FEATURES, H1)), _resident((1, H1)),
            _resident((H1, H2)),          _resident((1, H2)),
            _resident((H2, H3)),          _resident((1, H3)),
            _resident((H3, OUT_PAD)),     _resident((1, OUT_PAD)),
        ],
        out_specs=(
            pl.BlockSpec((TB, OUT_PAD), lambda i: (i, 0)),
            pl.BlockSpec((TB, H3), lambda i: (i, 0)),
            pl.BlockSpec((TB, H3), lambda i: (i, 0)),
        ),
    )

    out_shapes = (
        jax.ShapeDtypeStruct((B, OUT_PAD), jnp.bfloat16),   # out (lane-padded, bf16 writeback)
        jax.ShapeDtypeStruct((B, H3), jnp.bfloat16),        # spk3 (exact 0/1)
        jax.ShapeDtypeStruct((B, H3), jnp.float32),         # mem3
    )

    out_p, spk3_p, mem3_p = pl.pallas_call(
        _snn_kernel,
        out_shape=out_shapes,
        grid_spec=grid_spec,
        compiler_params=pltpu.CompilerParams(
            dimension_semantics=("parallel",),   # shard batch tiles across TCs (v7x)
            vmem_limit_bytes=32 << 20,           # ~16 MiB used at TB=512; safe on all gens
        ),
    )(x_flat, w1, b1, w2, b2, w3, b3, w4, b4)

    return (out_p[:, :NUM_CLASSES].astype(jnp.float32),
            spk3_p.astype(jnp.float32),
            mem3_p)


def _init_linear(key, fan_in, fan_out):
    """PyTorch nn.Linear default init: U(-1/sqrt(fan_in), 1/sqrt(fan_in)).
    Weight stored as (in, out); bias as (1, out) for 2-D TPU layout."""
    kw, kb = jax.random.split(key)
    bound = 1.0 / jnp.sqrt(jnp.float32(fan_in))
    w = jax.random.uniform(kw, (fan_in, fan_out), jnp.float32, -bound, bound)
    b = jax.random.uniform(kb, (1, fan_out), jnp.float32, -bound, bound)
    return w, b


def init_params(key):
    k1, k2, k3, k4 = jax.random.split(key, 4)
    return (
        _init_linear(k1, IN_FEATURES, H1),
        _init_linear(k2, H1, H2),
        _init_linear(k3, H2, H3),
        _init_linear(k4, H3, NUM_CLASSES),
    )


def _reference(x, prepared_params):
    """Pure-JAX reference using the same bf16 weights / f32 accumulation."""
    B = x.shape[0]
    h = x.reshape(B, -1).astype(jnp.bfloat16)
    w1, b1, w2, b2, w3, b3, w4p, b4p = prepared_params
    cur1 = jnp.dot(h, w1, preferred_element_type=jnp.float32) + b1
    spk1 = (cur1 > THRESHOLD).astype(jnp.bfloat16)
    cur2 = jnp.dot(spk1, w2, preferred_element_type=jnp.float32) + b2
    spk2 = (cur2 > THRESHOLD).astype(jnp.bfloat16)
    cur3 = jnp.dot(spk2, w3, preferred_element_type=jnp.float32) + b3
    spk3 = (cur3 > THRESHOLD).astype(jnp.bfloat16)
    out = jnp.dot(spk3, w4p, preferred_element_type=jnp.float32) + b4p
    return out[:, :NUM_CLASSES], spk3.astype(jnp.float32), cur3


if __name__ == "__main__":
    key = jax.random.PRNGKey(0)
    k_params, k_x = jax.random.split(key)

    params = init_params(k_params)
    prepared = prepare_params(params)   # one-time bf16 cast + fc4 lane padding

    # Batch of 2 grayscale 48x48 images (NCHW), scaled so some neurons spike.
    x = jax.random.uniform(k_x, (2, 1, 48, 48), jnp.float32) * 2.0

    out, spk3, mem3 = jax.block_until_ready(feedforward_snn(x, prepared))

    # Sanity check against the pure-JAX reference (same bf16 weights; kernel
    # additionally rounds the logits through bf16 on writeback).
    ref_out, ref_spk3, ref_mem3 = _reference(x, prepared)
    assert out.shape == (2, NUM_CLASSES) and spk3.shape == (2, H3) and mem3.shape == (2, H3)
    assert jnp.allclose(out, ref_out, atol=2e-2, rtol=2e-2)
    assert jnp.allclose(mem3, ref_mem3, atol=1e-2, rtol=1e-2)
    # Spike decisions must match except (measure-zero) values at the threshold.
    near_thr = jnp.abs(ref_mem3 - THRESHOLD) < 1e-2
    assert bool(jnp.all((spk3 == ref_spk3) | near_thr))

    print("KERNEL_OK")
</pallas_src>

<mosaic_0001>
module attributes {stable_mosaic.version = 11 : i64} {
  func.func @_snn_kernel(%arg0: i32, %arg1: memref<16x2304xf32, #tpu.memory_space<vmem>>, %arg2: memref<2304x512xbf16, #tpu.memory_space<vmem>>, %arg3: memref<1x512xf32, #tpu.memory_space<vmem>>, %arg4: memref<512x256xbf16, #tpu.memory_space<vmem>>, %arg5: memref<1x256xf32, #tpu.memory_space<vmem>>, %arg6: memref<256x128xbf16, #tpu.memory_space<vmem>>, %arg7: memref<1x128xf32, #tpu.memory_space<vmem>>, %arg8: memref<128x128xbf16, #tpu.memory_space<vmem>>, %arg9: memref<1x128xf32, #tpu.memory_space<vmem>>, %arg10: memref<16x128xbf16, #tpu.memory_space<vmem>>, %arg11: memref<16x128xbf16, #tpu.memory_space<vmem>>, %arg12: memref<16x128xf32, #tpu.memory_space<vmem>>) attributes {dimension_semantics = [#tpu.dimension_semantics<parallel>], iteration_bounds = array<i64: 1>, scalar_prefetch = 0 : i64, scratch_operands = 0 : i64, tpu.core_type = #tpu.core_type<tc>, window_params = [{transform_indices = @transform_0, window_bounds = array<i64: 16, 2304>}, {pipeline_mode = #tpu.pipeline_mode<synchronous>, transform_indices = @transform_1, window_bounds = array<i64: 2304, 512>}, {pipeline_mode = #tpu.pipeline_mode<synchronous>, transform_indices = @transform_2, window_bounds = array<i64: 1, 512>}, {pipeline_mode = #tpu.pipeline_mode<synchronous>, transform_indices = @transform_3, window_bounds = array<i64: 512, 256>}, {pipeline_mode = #tpu.pipeline_mode<synchronous>, transform_indices = @transform_4, window_bounds = array<i64: 1, 256>}, {pipeline_mode = #tpu.pipeline_mode<synchronous>, transform_indices = @transform_5, window_bounds = array<i64: 256, 128>}, {pipeline_mode = #tpu.pipeline_mode<synchronous>, transform_indices = @transform_6, window_bounds = array<i64: 1, 128>}, {pipeline_mode = #tpu.pipeline_mode<synchronous>, transform_indices = @transform_7, window_bounds = array<i64: 128, 128>}, {pipeline_mode = #tpu.pipeline_mode<synchronous>, transform_indices = @transform_8, window_bounds = array<i64: 1, 128>}, {transform_indices = @transform_9, window_bounds = array<i64: 16, 128>}, {transform_indices = @transform_10, window_bounds = array<i64: 16, 128>}, {transform_indices = @transform_11, window_bounds = array<i64: 16, 128>}]} {
    %c0 = arith.constant 0 : index
    %c0_0 = arith.constant 0 : index
    %0 = vector.load %arg1[%c0, %c0_0] : memref<16x2304xf32, #tpu.memory_space<vmem>>, vector<16x2304xf32>
    %1 = arith.truncf %0 : vector<16x2304xf32> to vector<16x2304xbf16>
    %c0_1 = arith.constant 0 : index
    %c0_2 = arith.constant 0 : index
    %2 = vector.load %arg2[%c0_1, %c0_2] : memref<2304x512xbf16, #tpu.memory_space<vmem>>, vector<2304x512xbf16>
    %cst = arith.constant dense<0.000000e+00> : vector<16x512xf32>
    %3 = tpu.matmul %1, %2, %cst {dimension_numbers = #tpu.dot_dimension_numbers<[1], [0], [0], [1], [0, 0, 1, 1], [], []>} : vector<16x2304xbf16>, vector<2304x512xbf16>, vector<16x512xf32> -> vector<16x512xf32>
    %c0_3 = arith.constant 0 : index
    %c0_4 = arith.constant 0 : index
    %4 = vector.load %arg3[%c0_3, %c0_4] : memref<1x512xf32, #tpu.memory_space<vmem>>, vector<1x512xf32>
    %5 = vector.broadcast %4 : vector<1x512xf32> to vector<16x512xf32>
    %6 = arith.addf %3, %5 : vector<16x512xf32>
    %cst_5 = arith.constant 1.000000e+00 : f32
    %7 = vector.broadcast %cst_5 : f32 to vector<16x512xf32>
    %8 = arith.cmpf ogt, %6, %7 : vector<16x512xf32>
    %9 = arith.extui %8 : vector<16x512xi1> to vector<16x512xi32>
    %10 = arith.sitofp %9 : vector<16x512xi32> to vector<16x512xf32>
    %11 = arith.truncf %10 : vector<16x512xf32> to vector<16x512xbf16>
    %c0_6 = arith.constant 0 : index
    %c0_7 = arith.constant 0 : index
    %12 = vector.load %arg4[%c0_6, %c0_7] : memref<512x256xbf16, #tpu.memory_space<vmem>>, vector<512x256xbf16>
    %cst_8 = arith.constant dense<0.000000e+00> : vector<16x256xf32>
    %13 = tpu.matmul %11, %12, %cst_8 {dimension_numbers = #tpu.dot_dimension_numbers<[1], [0], [0], [1], [0, 0, 1, 1], [], []>} : vector<16x512xbf16>, vector<512x256xbf16>, vector<16x256xf32> -> vector<16x256xf32>
    %c0_9 = arith.constant 0 : index
    %c0_10 = arith.constant 0 : index
    %14 = vector.load %arg5[%c0_9, %c0_10] : memref<1x256xf32, #tpu.memory_space<vmem>>, vector<1x256xf32>
    %15 = vector.broadcast %14 : vector<1x256xf32> to vector<16x256xf32>
    %16 = arith.addf %13, %15 : vector<16x256xf32>
    %cst_11 = arith.constant 1.000000e+00 : f32
    %17 = vector.broadcast %cst_11 : f32 to vector<16x256xf32>
    %18 = arith.cmpf ogt, %16, %17 : vector<16x256xf32>
    %19 = arith.extui %18 : vector<16x256xi1> to vector<16x256xi32>
    %20 = arith.sitofp %19 : vector<16x256xi32> to vector<16x256xf32>
    %21 = arith.truncf %20 : vector<16x256xf32> to vector<16x256xbf16>
    %c0_12 = arith.constant 0 : index
    %c0_13 = arith.constant 0 : index
    %22 = vector.load %arg6[%c0_12, %c0_13] : memref<256x128xbf16, #tpu.memory_space<vmem>>, vector<256x128xbf16>
    %cst_14 = arith.constant dense<0.000000e+00> : vector<16x128xf32>
    %23 = tpu.matmul %21, %22, %cst_14 {dimension_numbers = #tpu.dot_dimension_numbers<[1], [0], [0], [1], [0, 0, 1, 1], [], []>} : vector<16x256xbf16>, vector<256x128xbf16>, vector<16x128xf32> -> vector<16x128xf32>
    %c0_15 = arith.constant 0 : index
    %c0_16 = arith.constant 0 : index
    %24 = vector.load %arg7[%c0_15, %c0_16] : memref<1x128xf32, #tpu.memory_space<vmem>>, vector<1x128xf32>
    %25 = vector.broadcast %24 : vector<1x128xf32> to vector<16x128xf32>
    %26 = arith.addf %23, %25 : vector<16x128xf32>
    %cst_17 = arith.constant 1.000000e+00 : f32
    %27 = vector.broadcast %cst_17 : f32 to vector<16x128xf32>
    %28 = arith.cmpf ogt, %26, %27 : vector<16x128xf32>
    %29 = arith.extui %28 : vector<16x128xi1> to vector<16x128xi32>
    %30 = arith.sitofp %29 : vector<16x128xi32> to vector<16x128xf32>
    %31 = arith.truncf %30 : vector<16x128xf32> to vector<16x128xbf16>
    %c0_18 = arith.constant 0 : index
    %c0_19 = arith.constant 0 : index
    %32 = vector.load %arg8[%c0_18, %c0_19] : memref<128x128xbf16, #tpu.memory_space<vmem>>, vector<128x128xbf16>
    %cst_20 = arith.constant dense<0.000000e+00> : vector<16x128xf32>
    %33 = tpu.matmul %31, %32, %cst_20 {dimension_numbers = #tpu.dot_dimension_numbers<[1], [0], [0], [1], [0, 0, 1, 1], [], []>} : vector<16x128xbf16>, vector<128x128xbf16>, vector<16x128xf32> -> vector<16x128xf32>
    %c0_21 = arith.constant 0 : index
    %c0_22 = arith.constant 0 : index
    %34 = vector.load %arg9[%c0_21, %c0_22] : memref<1x128xf32, #tpu.memory_space<vmem>>, vector<1x128xf32>
    %35 = vector.broadcast %34 : vector<1x128xf32> to vector<16x128xf32>
    %36 = arith.addf %33, %35 : vector<16x128xf32>
    %37 = arith.truncf %36 : vector<16x128xf32> to vector<16x128xbf16>
    %c0_23 = arith.constant 0 : index
    %c0_24 = arith.constant 0 : index
    %38 = vector.load %arg10[%c0_23, %c0_24] : memref<16x128xbf16, #tpu.memory_space<vmem>>, vector<16x128xbf16>
    tpu.vector_store %arg10[%c0_23, %c0_24], %37 {strides = array<i32>} : memref<16x128xbf16, #tpu.memory_space<vmem>>, vector<16x128xbf16>,
    %c0_25 = arith.constant 0 : index
    %c0_26 = arith.constant 0 : index
    %39 = vector.load %arg11[%c0_25, %c0_26] : memref<16x128xbf16, #tpu.memory_space<vmem>>, vector<16x128xbf16>
    tpu.vector_store %arg11[%c0_25, %c0_26], %31 {strides = array<i32>} : memref<16x128xbf16, #tpu.memory_space<vmem>>, vector<16x128xbf16>,
    %c0_27 = arith.constant 0 : index
    %c0_28 = arith.constant 0 : index
    %40 = vector.load %arg12[%c0_27, %c0_28] : memref<16x128xf32, #tpu.memory_space<vmem>>, vector<16x128xf32>
    tpu.vector_store %arg12[%c0_27, %c0_28], %26 {strides = array<i32>} : memref<16x128xf32, #tpu.memory_space<vmem>>, vector<16x128xf32>,
    return
  }
  func.func @transform_0(%arg0: i32) -> (i32, i32) {
    %c0_i32 = arith.constant 0 : i32
    %c0_i32_0 = arith.constant 0 : i32
    return %arg0, %c0_i32 : i32, i32
  }
  func.func @transform_1(%arg0: i32) -> (i32, i32) {
    %c0_i32 = arith.constant 0 : i32
    %c0_i32_0 = arith.constant 0 : i32
    %c0_i32_1 = arith.constant 0 : i32
    return %c0_i32, %c0_i32_0 : i32, i32
  }
  func.func @transform_2(%arg0: i32) -> (i32, i32) {
    %c0_i32 = arith.constant 0 : i32
    %c0_i32_0 = arith.constant 0 : i32
    %c0_i32_1 = arith.constant 0 : i32
    return %c0_i32, %c0_i32_0 : i32, i32
  }
  func.func @transform_3(%arg0: i32) -> (i32, i32) {
    %c0_i32 = arith.constant 0 : i32
    %c0_i32_0 = arith.constant 0 : i32
    %c0_i32_1 = arith.constant 0 : i32
    return %c0_i32, %c0_i32_0 : i32, i32
  }
  func.func @transform_4(%arg0: i32) -> (i32, i32) {
    %c0_i32 = arith.constant 0 : i32
    %c0_i32_0 = arith.constant 0 : i32
    %c0_i32_1 = arith.constant 0 : i32
    return %c0_i32, %c0_i32_0 : i32, i32
  }
  func.func @transform_5(%arg0: i32) -> (i32, i32) {
    %c0_i32 = arith.constant 0 : i32
    %c0_i32_0 = arith.constant 0 : i32
    %c0_i32_1 = arith.constant 0 : i32
    return %c0_i32, %c0_i32_0 : i32, i32
  }
  func.func @transform_6(%arg0: i32) -> (i32, i32) {
    %c0_i32 = arith.constant 0 : i32
    %c0_i32_0 = arith.constant 0 : i32
    %c0_i32_1 = arith.constant 0 : i32
    return %c0_i32, %c0_i32_0 : i32, i32
  }
  func.func @transform_7(%arg0: i32) -> (i32, i32) {
    %c0_i32 = arith.constant 0 : i32
    %c0_i32_0 = arith.constant 0 : i32
    %c0_i32_1 = arith.constant 0 : i32
    return %c0_i32, %c0_i32_0 : i32, i32
  }
  func.func @transform_8(%arg0: i32) -> (i32, i32) {
    %c0_i32 = arith.constant 0 : i32
    %c0_i32_0 = arith.constant 0 : i32
    %c0_i32_1 = arith.constant 0 : i32
    return %c0_i32, %c0_i32_0 : i32, i32
  }
  func.func @transform_9(%arg0: i32) -> (i32, i32) {
    %c0_i32 = arith.constant 0 : i32
    %c0_i32_0 = arith.constant 0 : i32
    return %arg0, %c0_i32 : i32, i32
  }
  func.func @transform_10(%arg0: i32) -> (i32, i32) {
    %c0_i32 = arith.constant 0 : i32
    %c0_i32_0 = arith.constant 0 : i32
    return %arg0, %c0_i32 : i32, i32
  }
  func.func @transform_11(%arg0: i32) -> (i32, i32) {
    %c0_i32 = arith.constant 0 : i32
    %c0_i32_0 = arith.constant 0 : i32
    return %arg0, %c0_i32 : i32, i32
  }
}

</mosaic_0001>

<bundles_post_ra>
// kernel: tpu_custom_call.1
= control target key start
LH: loop header
LB: loop body
LE: loop exit
PB: predicated region body
PF: predicated region fallthrough
CT: control target
= control target key end

     0   :  { %17 = vsyncpa [#allocation3], 0  ;;  %s10032_s0 = inlined_call_operand.hbm [shape: f32[2,2304], index: 0, kind: input, shape index: {}]   ;;  %s10033_s1 = inlined_call_operand.hbm [shape: bf16[2304,512], index: 1, kind: input, shape index: {}]   ;;  %s10034_s2 = inlined_call_operand.hbm [shape: f32[1,512], index: 2, kind: input, shape index: {}]   ;;  %s10035_s3 = inlined_call_operand.hbm [shape: bf16[512,256], index: 3, kind: input, shape index: {}]   ;;  %s10036_s4 = inlined_call_operand.hbm [shape: f32[1,256], index: 4, kind: input, shape index: {}]   ;;  %s10037_s5 = inlined_call_operand.hbm [shape: bf16[256,128], index: 5, kind: input, shape index: {}]   ;;  %s10038_s6 = inlined_call_operand.hbm [shape: f32[1,128], index: 6, kind: input, shape index: {}]   ;;  %s10039_s7 = inlined_call_operand.hbm [shape: bf16[128,128], index: 7, kind: input, shape index: {}]   ;;  %s10040_s8 = inlined_call_operand.hbm [shape: f32[1,128], index: 8, kind: input, shape index: {}]   ;;  %s10041_s9 = inlined_call_operand.hbm [shape: bf16[2,128], index: 9, kind: output, shape index: {0}]   ;;  %s10042_s10 = inlined_call_operand.hbm [shape: bf16[2,128], index: 10, kind: output, shape index: {1}]   ;;  %s10043_s11 = inlined_call_operand.hbm [shape: f32[2,128], index: 11, kind: output, shape index: {2}]  }
   0x1   :  { %18 = vsyncpa [#allocation6], 0 }
   0x2   :  { %19 = vsyncpa [#allocation9], 0 }
   0x3   :  { %20 = vsyncpa [#allocation12], 0 }
   0x4   :  { %21 = vsyncpa [#allocation15], 0 }
   0x5   :  { %22 = vsyncpa [#allocation4], 0 }
   0x6   :  { %23 = vsyncpa [#allocation19], 0  ;;  %s41_s19 = sshll.u32 %s10033_s1, 4  ;;  %s42_s19 = int_to_ptr.hbm [resolvable:$true] %s41_s19 }
   0x7   :  { %27 = vsyncadd [#allocation3], 4032  ;;  %s9497_s20 = smov [#allocation5]   ;;  %s65_s24 = sshll.u32 %s10035_s3, 4  ;;  %s66_s24 = int_to_ptr.hbm [resolvable:$true] %s65_s24 }
   0x8   :  { %s43_s21 = sshll.u32 %s9497_s20, 4  ;;  %s9498_s25 = smov 256   ;;  %s44_s21 = int_to_ptr.vmem [resolvable:$true] %s43_s21 }
   0x9   :  { %s9499_s26 = smov 16   ;;  %s9500_s27 = smov [#allocation8]  }
   0xa   :  { %49 = dma.hbm_to_vmem [thread:$0]  %s42_s19, 73728, %s44_s21, [#allocation6], %s9498_s25, %s9498_s25, %s9499_s26  }
   0xb   :  { %s67_s28 = sshll.u32 %s9500_s27, 4  ;;  %s9501_s29 = smov 128   ;;  %s68_s28 = int_to_ptr.vmem [resolvable:$true] %s67_s28 }
   0xc   :  { %s9502_s30 = smov 8   ;;  %s89_s13 = sshll.u32 %s10037_s5, 4  ;;  %s90_s13 = int_to_ptr.hbm [resolvable:$true] %s89_s13 }
   0xd   :  { %73 = dma.hbm_to_vmem [thread:$0]  %s66_s24, 8192, %s68_s28, [#allocation9], %s9501_s29, %s9501_s29, %s9502_s30  }
   0xe   :  { %s9503_s14 = smov [#allocation11]   ;;  %s113_s17 = sshll.u32 %s10039_s7, 4  ;;  %s114_s17 = int_to_ptr.hbm [resolvable:$true] %s113_s17 }
   0xf   :  { %s91_s15 = sshll.u32 %s9503_s14, 4  ;;  %s9504_s18 = smov 64   ;;  %s92_s15 = int_to_ptr.vmem [resolvable:$true] %s91_s15 }
  0x10   :  { %s9505_s19 = smov 4   ;;  %s9506_s20 = smov [#allocation14]  }
  0x11   :  { %97 = dma.hbm_to_vmem [thread:$0]  %s90_s13, 2048, %s92_s15, [#allocation12], %s9504_s18, %s9504_s18, %s9505_s19  }
  0x12   :  { %s115_s21 = sshll.u32 %s9506_s20, 4  ;;  %s28_s24 = sshll.u32 %s10032_s0, 4  ;;  %s116_s21 = int_to_ptr.vmem [resolvable:$true] %s115_s21  ;;  %s29_s24 = int_to_ptr.hbm [resolvable:$true] %s28_s24 }
  0x13   :  { %121 = dma.hbm_to_vmem [thread:$0]  %s114_s17, 1024, %s116_s21, [#allocation15], %s9504_s18, %s9504_s18, %s9505_s19  }
  0x14   :  { %s9507_s5 = smov [#allocation2]   ;;  %s55_s7 = sshll.u32 %s10034_s2, 4  ;;  %s56_s7 = int_to_ptr.hbm [resolvable:$true] %s55_s7 }
  0x15   :  { %s30_s25 = sshll.u32 %s9507_s5, 4  ;;  %s9508_s29 = smov 576   ;;  %s31_s25 = int_to_ptr.vmem [resolvable:$true] %s30_s25 }
  0x16   :  { %s9509_s30 = smov 36   ;;  %s9510_s1 = smov [#allocation7]  }
  0x17   :  { %36 = dma.hbm_to_vmem [thread:$0]  %s29_s24, 576, %s31_s25, [#allocation3], %s9508_s29, %s9508_s29, %s9509_s30  }
  0x18   :  { %s57_s12 = sshll.u32 %s9510_s1, 4  ;;  %s79_s0 = sshll.u32 %s10036_s4, 4  ;;  %s58_s12 = int_to_ptr.vmem [resolvable:$true] %s57_s12  ;;  %s80_s0 = int_to_ptr.hbm [resolvable:$true] %s79_s0 }
  0x19   :  { %60 = dma.hbm_to_vmem [thread:$0]  %s56_s7, 64, %s58_s12, [#allocation6]  }
  0x1a   :  { %s103_s16 = sshll.u32 %s10038_s6, 4  ;;  %s9511_s17 = smov [#allocation10]   ;;  %s104_s16 = int_to_ptr.hbm [resolvable:$true] %s103_s16 }
  0x1b   :  { %s81_s18 = sshll.u32 %s9511_s17, 4  ;;  %s9512_s2 = smov [#allocation13]   ;;  %s82_s18 = int_to_ptr.vmem [resolvable:$true] %s81_s18 }
  0x1c   :  { %84 = dma.hbm_to_vmem [thread:$0]  %s80_s0, 32, %s82_s18, [#allocation9]  }
  0x1d   :  { %s105_s19 = sshll.u32 %s9512_s2, 4  ;;  %s127_s22 = sshll.u32 %s10040_s8, 4  ;;  %s106_s19 = int_to_ptr.vmem [resolvable:$true] %s105_s19  ;;  %s128_s22 = int_to_ptr.hbm [resolvable:$true] %s127_s22 }
  0x1e   :  { %108 = dma.hbm_to_vmem [thread:$0]  %s104_s16, 16, %s106_s19, [#allocation12]  }
  0x1f   :  { %s9513_s4 = smov [#allocation16]  }
  0x20   :  { %s129_s23 = sshll.u32 %s9513_s4, 4  ;;  %s130_s23 = int_to_ptr.vmem [resolvable:$true] %s129_s23 }
  0x21   :  { %132 = dma.hbm_to_vmem [thread:$0]  %s128_s22, 16, %s130_s23, [#allocation15]  }
  0x22   :  { %9483 = dma.done.wait [#allocation3], 4608  }
  0x23   :  { %9484 = vsyncadd [#allocation3], 4294962688 }
  0x24   :  { %9485 = dma.done.wait [#allocation6], 73792  }
  0x25   :  { %9486 = vsyncadd [#allocation6], 4294893504 }
  0x26   :  { %9487 = dma.done.wait [#allocation9], 8224  }
  0x27   :  { %9488 = vsyncadd [#allocation9], 4294959072 }
  0x28   :  { %9489 = dma.done.wait [#allocation12], 2064  }
  0x29   :  { %9490 = vsyncadd [#allocation12], 4294965232 }
  0x2a   :  { %9491 = dma.done.wait [#allocation15], 1040  }
  0x2b   :  { %9492 = vsyncadd [#allocation15], 4294966256  ;;  %v5926_v0 = vld [vmem:[#allocation5 + $0xe0] sm:$0xf]  ;;  %v8532_v1 = vld [vmem:[#allocation5 + $0xec] sm:$0xf0] }
  0x2c   :  { %v6054_v2 = vld [vmem:[#allocation5 + $0x1e0] sm:$0xf]  ;;  %v5927_v3 = vor.u32 %v8532_v1, %v5926_v0  ;;  %v8564_v4 = vld [vmem:[#allocation5 + $0x1ec] sm:$0xf0] }
  0x2d   :  { %v6182_v5 = vld [vmem:[#allocation5 + $0x2e0] sm:$0xf]  ;;  %v8596_v6 = vld [vmem:[#allocation5 + $0x2ec] sm:$0xf0]  ;;  %v6055_v7 = vor.u32 %v8564_v4, %v6054_v2 }
  0x2e   :  { %v6183_v8 = vor.u32 %v8596_v6, %v6182_v5  ;;  %v6310_v9 = vld [vmem:[#allocation5 + $0x3e0] sm:$0xf]  ;;  %v8628_v10 = vld [vmem:[#allocation5 + $0x3ec] sm:$0xf0]  ;;  %3852 = vmatpush.bf16.msra.mxu0 %v5927_v3 }
  0x2f   :  { %v5910_v11 = vld [vmem:[#allocation5 + $0xc0] sm:$0xf]  ;;  %v6311_v12 = vor.u32 %v8628_v10, %v6310_v9  ;;  %v8528_v13 = vld [vmem:[#allocation5 + $0xcc] sm:$0xf0]  ;;  %3866 = vmatpush.bf16.msra.mxu1 %v6055_v7 }
  0x30   :  { %v6038_v14 = vld [vmem:[#allocation5 + $0x1c0] sm:$0xf]  ;;  %v8560_v15 = vld [vmem:[#allocation5 + $0x1cc] sm:$0xf0]  ;;  %3880 = vmatpush.bf16.msra.mxu2 %v6183_v8  ;;  %v5911_v16 = vor.u32 %v8528_v13, %v5910_v11 }
  0x31   :  { %v6039_v17 = vor.u32 %v8560_v15, %v6038_v14  ;;  %v6166_v18 = vld [vmem:[#allocation5 + $0x2c0] sm:$0xf]  ;;  %v8592_v19 = vld [vmem:[#allocation5 + $0x2cc] sm:$0xf0]  ;;  %3894 = vmatpush.bf16.msra.mxu3 %v6311_v12 }
  0x32   :  { %v6294_v20 = vld [vmem:[#allocation5 + $0x3c0] sm:$0xf]  ;;  %v6167_v21 = vor.u32 %v8592_v19, %v6166_v18  ;;  %v8624_v22 = vld [vmem:[#allocation5 + $0x3cc] sm:$0xf0]  ;;  %3853 = vmatpush.bf16.msra.mxu0 %v5911_v16 }
  0x33   :  { %v5894_v23 = vld [vmem:[#allocation5 + $0xa0] sm:$0xf]  ;;  %v8524_v24 = vld [vmem:[#allocation5 + $0xac] sm:$0xf0]  ;;  %v6295_v25 = vor.u32 %v8624_v22, %v6294_v20  ;;  %3867 = vmatpush.bf16.msra.mxu1 %v6039_v17 }
  0x34   :  { %v6022_v26 = vld [vmem:[#allocation5 + $0x1a0] sm:$0xf]  ;;  %v8556_v27 = vld [vmem:[#allocation5 + $0x1ac] sm:$0xf0]  ;;  %v5895_v29 = vor.u32 %v8524_v24, %v5894_v23  ;;  %3881 = vmatpush.bf16.msra.mxu2 %v6167_v21 }
  0x35   :  { %v6150_v28 = vld [vmem:[#allocation5 + $0x2a0] sm:$0xf]  ;;  %v8588_v30 = vld [vmem:[#allocation5 + $0x2ac] sm:$0xf0]  ;;  %v6023_v33 = vor.u32 %v8556_v27, %v6022_v26  ;;  %3895 = vmatpush.bf16.msra.mxu3 %v6295_v25 }
  0x36   :  { %v6278_v31 = vld [vmem:[#allocation5 + $0x3a0] sm:$0xf]  ;;  %v8620_v32 = vld [vmem:[#allocation5 + $0x3ac] sm:$0xf0]  ;;  %v6151_v34 = vor.u32 %v8588_v30, %v6150_v28  ;;  %3854 = vmatpush.bf16.msra.mxu0 %v5895_v29 }
  0x37   :  { %v5878_v35 = vld [vmem:[#allocation5 + $0x80] sm:$0xf]  ;;  %v8520_v36 = vld [vmem:[#allocation5 + $0x8c] sm:$0xf0]  ;;  %v6279_v38 = vor.u32 %v8620_v32, %v6278_v31  ;;  %3868 = vmatpush.bf16.msra.mxu1 %v6023_v33 }
  0x38   :  { %v6006_v37 = vld [vmem:[#allocation5 + $0x180] sm:$0xf]  ;;  %v8552_v39 = vld [vmem:[#allocation5 + $0x18c] sm:$0xf0]  ;;  %v5879_v44 = vor.u32 %v8520_v36, %v5878_v35  ;;  %3882 = vmatpush.bf16.msra.mxu2 %v6151_v34 }
  0x39   :  { %v6134_v40 = vld [vmem:[#allocation5 + $0x280] sm:$0xf]  ;;  %v8584_v41 = vld [vmem:[#allocation5 + $0x28c] sm:$0xf0]  ;;  %v6007_v45 = vor.u32 %v8552_v39, %v6006_v37  ;;  %3896 = vmatpush.bf16.msra.mxu3 %v6279_v38 }
  0x3a   :  { %v6262_v42 = vld [vmem:[#allocation5 + $0x380] sm:$0xf]  ;;  %v8616_v43 = vld [vmem:[#allocation5 + $0x38c] sm:$0xf0]  ;;  %v6135_v46 = vor.u32 %v8584_v41, %v6134_v40  ;;  %3855 = vmatpush.bf16.msra.mxu0 %v5879_v44 }
  0x3b   :  { %v5862_v47 = vld [vmem:[#allocation5 + $0x60] sm:$0xf]  ;;  %v8516_v48 = vld [vmem:[#allocation5 + $0x6c] sm:$0xf0]  ;;  %v6263_v50 = vor.u32 %v8616_v43, %v6262_v42  ;;  %3869 = vmatpush.bf16.msra.mxu1 %v6007_v45 }
  0x3c   :  { %v5990_v49 = vld [vmem:[#allocation5 + $0x160] sm:$0xf]  ;;  %v8548_v51 = vld [vmem:[#allocation5 + $0x16c] sm:$0xf0]  ;;  %v5863_v56 = vor.u32 %v8516_v48, %v5862_v47  ;;  %3883 = vmatpush.bf16.msra.mxu2 %v6135_v46 }
  0x3d   :  { %v6118_v52 = vld [vmem:[#allocation5 + $0x260] sm:$0xf]  ;;  %v8580_v53 = vld [vmem:[#allocation5 + $0x26c] sm:$0xf0]  ;;  %v5991_v57 = vor.u32 %v8548_v51, %v5990_v49  ;;  %3897 = vmatpush.bf16.msra.mxu3 %v6263_v50 }
  0x3e   :  { %v6246_v54 = vld [vmem:[#allocation5 + $0x360] sm:$0xf]  ;;  %v8612_v55 = vld [vmem:[#allocation5 + $0x36c] sm:$0xf0]  ;;  %v6119_v58 = vor.u32 %v8580_v53, %v6118_v52  ;;  %3856 = vmatpush.bf16.msra.mxu0 %v5863_v56 }
  0x3f   :  { %v5846_v59 = vld [vmem:[#allocation5 + $0x40] sm:$0xf]  ;;  %v8512_v60 = vld [vmem:[#allocation5 + $0x4c] sm:$0xf0]  ;;  %v6247_v62 = vor.u32 %v8612_v55, %v6246_v54  ;;  %3870 = vmatpush.bf16.msra.mxu1 %v5991_v57 }
  0x40   :  { %v5974_v61 = vld [vmem:[#allocation5 + $0x140] sm:$0xf]  ;;  %v8544_v63 = vld [vmem:[#allocation5 + $0x14c] sm:$0xf0]  ;;  %v5847_v4 = vor.u32 %v8512_v60, %v5846_v59  ;;  %3884 = vmatpush.bf16.msra.mxu2 %v6119_v58  ;;  %v174_v60 = vld [vmem:[#allocation2 + $0x24] sm:$0xff] }
  0x41   :  { %v6102_v0 = vld [vmem:[#allocation5 + $0x240] sm:$0xf]  ;;  %v8576_v1 = vld [vmem:[#allocation5 + $0x24c] sm:$0xf0]  ;;  %v5975_v5 = vor.u32 %v8544_v63, %v5974_v61  ;;  %3898 = vmatpush.bf16.msra.mxu3 %v6247_v62  ;;  %251 = vst [vmem:[#allocation1 + $0x1] ss:$4 sm:$0xff] %v174_v60 }
  0x42   :  { %v6230_v2 = vld [vmem:[#allocation5 + $0x340] sm:$0xf]  ;;  %v8608_v3 = vld [vmem:[#allocation5 + $0x34c] sm:$0xf0]  ;;  %v6103_v6 = vor.u32 %v8576_v1, %v6102_v0  ;;  %3857 = vmatpush.bf16.msra.mxu0 %v5847_v4  ;;  %v170_v0 = vld [vmem:[#allocation2 + $0x8] sm:$0xff] }
  0x43   :  { %v5830_v7 = vld [vmem:[#allocation5 + $0x20] sm:$0xf]  ;;  %v8508_v8 = vld [vmem:[#allocation5 + $0x2c] sm:$0xf0]  ;;  %v6231_v10 = vor.u32 %v8608_v3, %v6230_v2  ;;  %3871 = vmatpush.bf16.msra.mxu1 %v5975_v5  ;;  %v179_v1 = vld [vmem:[#allocation2 + $0x48] sm:$0xff] }
  0x44   :  { %v5958_v9 = vld [vmem:[#allocation5 + $0x120] sm:$0xf]  ;;  %v8540_v11 = vld [vmem:[#allocation5 + $0x12c] sm:$0xf0]  ;;  %v5831_v16 = vor.u32 %v8508_v8, %v5830_v7  ;;  %3885 = vmatpush.bf16.msra.mxu2 %v6103_v6  ;;  %253 = vst [vmem:[#allocation1 + $0x2] ss:$4 sm:$0xff] %v179_v1 }
  0x45   :  { %v6086_v12 = vld [vmem:[#allocation5 + $0x220] sm:$0xf]  ;;  %v8572_v13 = vld [vmem:[#allocation5 + $0x22c] sm:$0xf0]  ;;  %v5959_v19 = vor.u32 %v8540_v11, %v5958_v9  ;;  %3899 = vmatpush.bf16.msra.mxu3 %v6231_v10  ;;  %v185_v11 = vld [vmem:[#allocation2 + $0x74] sm:$0xff] }
  0x46   :  { %v6214_v14 = vld [vmem:[#allocation5 + $0x320] sm:$0xf]  ;;  %v8604_v15 = vld [vmem:[#allocation5 + $0x32c] sm:$0xf0]  ;;  %v6087_v20 = vor.u32 %v8572_v13, %v6086_v12  ;;  %3858 = vmatpush.bf16.msra.mxu0 %v5831_v16  ;;  %257 = vst [vmem:[#allocation1 + $0x20] ss:$4 sm:$0xff] %v170_v0 }
  0x47   :  { %v5814_v17 = vld [vmem:[#allocation5] sm:$0xf]  ;;  %v8504_v18 = vld [vmem:[#allocation5 + $0xc] sm:$0xf0]  ;;  %v6215_v24 = vor.u32 %v8604_v15, %v6214_v14  ;;  %3872 = vmatpush.bf16.msra.mxu1 %v5959_v19  ;;  %263 = vst [vmem:[#allocation1 + $0x23] ss:$4 sm:$0xff] %v185_v11 }
  0x48   :  { %v5942_v21 = vld [vmem:[#allocation5 + $0x100] sm:$0xf]  ;;  %v8536_v22 = vld [vmem:[#allocation5 + $0x10c] sm:$0xf0]  ;;  %v5815_v31 = vor.u32 %v8504_v18, %v5814_v17  ;;  %3886 = vmatpush.bf16.msra.mxu2 %v6087_v20 }
  0x49   :  { %v6070_v23 = vld [vmem:[#allocation5 + $0x200] sm:$0xf]  ;;  %v8568_v25 = vld [vmem:[#allocation5 + $0x20c] sm:$0xf0]  ;;  %v5943_v35 = vor.u32 %v8536_v22, %v5942_v21  ;;  %3900 = vmatpush.bf16.msra.mxu3 %v6215_v24 }
  0x4a   :  { %v6198_v26 = vld [vmem:[#allocation5 + $0x300] sm:$0xf]  ;;  %v8600_v27 = vld [vmem:[#allocation5 + $0x30c] sm:$0xf0]  ;;  %v6071_v36 = vor.u32 %v8568_v25, %v6070_v23  ;;  %3859 = vmatpush.bf16.msra.mxu0 %v5815_v31 }
  0x4b   :  { %v6438_v28 = vld [vmem:[#allocation5 + $0x4e0] sm:$0xf]  ;;  %v8660_v29 = vld [vmem:[#allocation5 + $0x4ec] sm:$0xf0]  ;;  %v6199_v39 = vor.u32 %v8600_v27, %v6198_v26  ;;  %3873 = vmatpush.bf16.msra.mxu1 %v5943_v35 }
  0x4c   :  { %v6566_v30 = vld [vmem:[#allocation5 + $0x5e0] sm:$0xf]  ;;  %v8692_v32 = vld [vmem:[#allocation5 + $0x5ec] sm:$0xf0]  ;;  %v6439_v40 = vor.u32 %v8660_v29, %v6438_v28  ;;  %3887 = vmatpush.bf16.msra.mxu2 %v6071_v36 }
  0x4d   :  { %v6694_v33 = vld [vmem:[#allocation5 + $0x6e0] sm:$0xf]  ;;  %v8724_v34 = vld [vmem:[#allocation5 + $0x6ec] sm:$0xf0]  ;;  %v6567_v43 = vor.u32 %v8692_v32, %v6566_v30  ;;  %3901 = vmatpush.bf16.msra.mxu3 %v6199_v39  ;;  %v172_v30 = vld [vmem:[#allocation2 + $0x18] sm:$0xff] }
  0x4e   :  { %v6822_v37 = vld [vmem:[#allocation5 + $0x7e0] sm:$0xf]  ;;  %v8756_v38 = vld [vmem:[#allocation5 + $0x7ec] sm:$0xf0]  ;;  %v6695_v44 = vor.u32 %v8724_v34, %v6694_v33  ;;  %3908 = vmatpush.bf16.msrb.mxu0 %v6439_v40 }
  0x4f   :  { %v6422_v41 = vld [vmem:[#allocation5 + $0x4c0] sm:$0xf]  ;;  %v8656_v42 = vld [vmem:[#allocation5 + $0x4cc] sm:$0xf0]  ;;  %v6823_v48 = vor.u32 %v8756_v38, %v6822_v37  ;;  %3922 = vmatpush.bf16.msrb.mxu1 %v6567_v43 }
  0x50   :  { %v6550_v45 = vld [vmem:[#allocation5 + $0x5c0] sm:$0xf]  ;;  %v8688_v46 = vld [vmem:[#allocation5 + $0x5cc] sm:$0xf0]  ;;  %v6423_v55 = vor.u32 %v8656_v42, %v6422_v41  ;;  %3936 = vmatpush.bf16.msrb.mxu2 %v6695_v44  ;;  %v187_v44 = vld [vmem:[#allocation2 + $0x84] sm:$0xff] }
  0x51   :  { %v6678_v47 = vld [vmem:[#allocation5 + $0x6c0] sm:$0xf]  ;;  %v8720_v49 = vld [vmem:[#allocation5 + $0x6cc] sm:$0xf0]  ;;  %v6551_v61 = vor.u32 %v8688_v46, %v6550_v45  ;;  %3950 = vmatpush.bf16.msrb.mxu3 %v6823_v48 }
  0x52   :  { %v6806_v50 = vld [vmem:[#allocation5 + $0x7c0] sm:$0xf]  ;;  %v8752_v51 = vld [vmem:[#allocation5 + $0x7cc] sm:$0xf0]  ;;  %v6679_v62 = vor.u32 %v8720_v49, %v6678_v47  ;;  %3909 = vmatpush.bf16.msrb.mxu0 %v6423_v55 }
  0x53   :  { %v6406_v52 = vld [vmem:[#allocation5 + $0x4a0] sm:$0xf]  ;;  %v8652_v53 = vld [vmem:[#allocation5 + $0x4ac] sm:$0xf0]  ;;  %v6807_v2 = vor.u32 %v8752_v51, %v6806_v50  ;;  %3923 = vmatpush.bf16.msrb.mxu1 %v6551_v61 }
  0x54   :  { %v169_v54 = vld [vmem:[#allocation2] sm:$0xff]  ;;  %v8684_v57 = vld [vmem:[#allocation5 + $0x5ac] sm:$0xf0]  ;;  %v6407_v9 = vor.u32 %v8652_v53, %v6406_v52  ;;  %3937 = vmatpush.bf16.msrb.mxu2 %v6679_v62 }
  0x55   :  { %v6534_v56 = vld [vmem:[#allocation5 + $0x5a0] sm:$0xf]  ;;  %v8716_v59 = vld [vmem:[#allocation5 + $0x6ac] sm:$0xf0]  ;;  %249 = vst [vmem:[#allocation1] ss:$4 sm:$0xff] %v169_v54  ;;  %3951 = vmatpush.bf16.msrb.mxu3 %v6807_v2 }
  0x56   :  { %v6662_v58 = vld [vmem:[#allocation5 + $0x6a0] sm:$0xf]  ;;  %v8748_v3 = vld [vmem:[#allocation5 + $0x7ac] sm:$0xf0]  ;;  %v6535_v12 = vor.u32 %v8684_v57, %v6534_v56  ;;  %3910 = vmatpush.bf16.msrb.mxu0 %v6407_v9 }
  0x57   :  { %v6790_v63 = vld [vmem:[#allocation5 + $0x7a0] sm:$0xf]  ;;  %v175_v4 = vld [vmem:[#allocation2 + $0x2c] sm:$0xff]  ;;  %v6663_v13 = vor.u32 %v8716_v59, %v6662_v58 }
  0x58   :  { %v184_v5 = vld [vmem:[#allocation2 + $0x6c] sm:$0xff]  ;;  %v6390_v6 = vld [vmem:[#allocation5 + $0x480] sm:$0xf]  ;;  %259 = vst [vmem:[#allocation1 + $0x21] ss:$4 sm:$0xff] %v175_v4  ;;  %v6791_v15 = vor.u32 %v8748_v3, %v6790_v63  ;;  %3924 = vmatpush.bf16.msrb.mxu1 %v6535_v12 }
  0x59   :  { %v8648_v7 = vld [vmem:[#allocation5 + $0x48c] sm:$0xf0]  ;;  %255 = vst [vmem:[#allocation1 + $0x3] ss:$4 sm:$0xff] %v184_v5  ;;  %v6518_v10 = vld [vmem:[#allocation5 + $0x580] sm:$0xf]  ;;  %3938 = vmatpush.bf16.msrb.mxu2 %v6663_v13 }
  0x5a   :  { %v180_v8 = vld [vmem:[#allocation2 + $0x50] sm:$0xff]  ;;  %v6646_v16 = vld [vmem:[#allocation5 + $0x680] sm:$0xf]  ;;  %v6391_v20 = vor.u32 %v8648_v7, %v6390_v6  ;;  %3952 = vmatpush.bf16.msrb.mxu3 %v6791_v15  ;;  %v199_v15 = vld [vmem:[#allocation2 + $0xd8] sm:$0xff] }
  0x5b   :  { %v8680_v14 = vld [vmem:[#allocation5 + $0x58c] sm:$0xf0]  ;;  %261 = vst [vmem:[#allocation1 + $0x22] ss:$4 sm:$0xff] %v180_v8  ;;  %v6774_v18 = vld [vmem:[#allocation5 + $0x780] sm:$0xf] }
  0x5c   :  { %v8712_v17 = vld [vmem:[#allocation5 + $0x68c] sm:$0xf0]  ;;  %v6519_v21 = vor.u32 %v8680_v14, %v6518_v10  ;;  %v6374_v23 = vld [vmem:[#allocation5 + $0x460] sm:$0xf]  ;;  %3911 = vmatpush.bf16.msrb.mxu0 %v6391_v20  ;;  %v194_v14 = vld [vmem:[#allocation2 + $0xb4] sm:$0xff] }
  0x5d   :  { %v8744_v19 = vld [vmem:[#allocation5 + $0x78c] sm:$0xf0]  ;;  %v6647_v22 = vor.u32 %v8712_v17, %v6646_v16  ;;  %v6502_v25 = vld [vmem:[#allocation5 + $0x560] sm:$0xf] }
  0x5e   :  { %v8644_v24 = vld [vmem:[#allocation5 + $0x46c] sm:$0xf0]  ;;  %v6775_v26 = vor.u32 %v8744_v19, %v6774_v18  ;;  %v6630_v28 = vld [vmem:[#allocation5 + $0x660] sm:$0xf]  ;;  %3925 = vmatpush.bf16.msrb.mxu1 %v6519_v21 }
  0x5f   :  { %v8676_v27 = vld [vmem:[#allocation5 + $0x56c] sm:$0xf0]  ;;  %v6758_v31 = vld [vmem:[#allocation5 + $0x760] sm:$0xf]  ;;  %v6375_v34 = vor.u32 %v8644_v24, %v6374_v23  ;;  %3939 = vmatpush.bf16.msrb.mxu2 %v6647_v22 }
  0x60   :  { %v8708_v29 = vld [vmem:[#allocation5 + $0x66c] sm:$0xf0]  ;;  %v177_v33 = vld [vmem:[#allocation2 + $0x3c] sm:$0xff]  ;;  %v6503_v39 = vor.u32 %v8676_v27, %v6502_v25  ;;  %3953 = vmatpush.bf16.msrb.mxu3 %v6775_v26  ;;  %v266_v24 = vld.sshfl [vmem:[#allocation1 + $0x10] sm:$0xff pattern:$0x73625140] }
  0x61   :  { %v8740_v32 = vld [vmem:[#allocation5 + $0x76c] sm:$0xf0]  ;;  %v6358_v35 = vld [vmem:[#allocation5 + $0x440] sm:$0xf]  ;;  %v6631_v40 = vor.u32 %v8708_v29, %v6630_v28  ;;  %3912 = vmatpush.bf16.msrb.mxu0 %v6375_v34  ;;  %v176_v29 = vld [vmem:[#allocation2 + $0x34] sm:$0xff] }
  0x62   :  { %v8640_v36 = vld [vmem:[#allocation5 + $0x44c] sm:$0xf0]  ;;  %v6486_v37 = vld [vmem:[#allocation5 + $0x540] sm:$0xf]  ;;  %v6759_v47 = vor.u32 %v8740_v32, %v6758_v31  ;;  %3926 = vmatpush.bf16.msrb.mxu1 %v6503_v39 }
  0x63   :  { %v182_v38 = vld [vmem:[#allocation2 + $0x60] sm:$0xff]  ;;  %v8672_v41 = vld [vmem:[#allocation5 + $0x54c] sm:$0xf0]  ;;  %v9610_v45 = vld.sshfl [vmem:[#allocation1 + $0x20] sm:$0xff pattern:$0x73625140]  ;;  %v6359_v50 = vor.u32 %v8640_v36, %v6358_v35  ;;  %3940 = vmatpush.bf16.msrb.mxu2 %v6631_v40 }
  0x64   :  { %v6614_v42 = vld [vmem:[#allocation5 + $0x640] sm:$0xf]  ;;  %v8704_v43 = vld [vmem:[#allocation5 + $0x64c] sm:$0xf0]  ;;  %v6487_v53 = vor.u32 %v8672_v41, %v6486_v37  ;;  %3954 = vmatpush.bf16.msrb.mxu3 %v6759_v47 }
  0x65   :  { %v9612_v46 = vld.sshfl [vmem:[#allocation1 + $0x28] sm:$0xff pattern:$0x73625140]  ;;  %v9614_v48 = vld.sshfl [vmem:[#allocation1 + $0x30] sm:$0xff pattern:$0x73625140]  ;;  %v6615_v54 = vor.u32 %v8704_v43, %v6614_v42  ;;  %3913 = vmatpush.bf16.msrb.mxu0 %v6359_v50 }
  0x66   :  { %v9616_v49 = vld.sshfl [vmem:[#allocation1 + $0x38] sm:$0xff pattern:$0x73625140]  ;;  %v6742_v51 = vld [vmem:[#allocation5 + $0x740] sm:$0xf]  ;;  %3927 = vmatpush.bf16.msrb.mxu1 %v6487_v53 }
  0x67   :  { %276 = vst [vmem:[#allocation1 + $0x20] ss:$4 sm:$0xff] %v172_v30  ;;  %v8736_v52 = vld [vmem:[#allocation5 + $0x74c] sm:$0xf0]  ;;  %v6342_v55 = vld [vmem:[#allocation5 + $0x420] sm:$0xf]  ;;  %3941 = vmatpush.bf16.msrb.mxu2 %v6615_v54 }
  0x68   :  { %277 = vst [vmem:[#allocation1 + $0x21] ss:$4 sm:$0xff] %v177_v33  ;;  %v8636_v56 = vld [vmem:[#allocation5 + $0x42c] sm:$0xf0]  ;;  %v6743_v57 = vor.u32 %v8736_v52, %v6742_v51  ;;  %v6470_v58 = vld [vmem:[#allocation5 + $0x520] sm:$0xf] }
  0x69   :  { %278 = vst [vmem:[#allocation1 + $0x22] ss:$4 sm:$0xff] %v182_v38  ;;  %v8668_v59 = vld [vmem:[#allocation5 + $0x52c] sm:$0xf0]  ;;  %v6598_v60 = vld [vmem:[#allocation5 + $0x620] sm:$0xf]  ;;  %v6343_v62 = vor.u32 %v8636_v56, %v6342_v55 }
  0x6a   :  { %279 = vst [vmem:[#allocation1 + $0x23] ss:$4 sm:$0xff] %v187_v44  ;;  %v8700_v61 = vld [vmem:[#allocation5 + $0x62c] sm:$0xf0]  ;;  %v6726_v63 = vld [vmem:[#allocation5 + $0x720] sm:$0xf]  ;;  %v6471_v1 = vor.u32 %v8668_v59, %v6470_v58  ;;  %3955 = vmatpush.bf16.msrb.mxu3 %v6743_v57 }
  0x6b   :  { %v8732_v0 = vld [vmem:[#allocation5 + $0x72c] sm:$0xf0]  ;;  %v6599_v2 = vor.u32 %v8700_v61, %v6598_v60  ;;  %v6326_v3 = vld [vmem:[#allocation5 + $0x400] sm:$0xf]  ;;  %3914 = vmatpush.bf16.msrb.mxu0 %v6343_v62  ;;  %v181_v30 = vld [vmem:[#allocation2 + $0x58] sm:$0xff] }
  0x6c   :  { %v8632_v4 = vld [vmem:[#allocation5 + $0x40c] sm:$0xf0]  ;;  %v6454_v5 = vld [vmem:[#allocation5 + $0x500] sm:$0xf]  ;;  %v6727_v6 = vor.u32 %v8732_v0, %v6726_v63  ;;  %3928 = vmatpush.bf16.msrb.mxu1 %v6471_v1  ;;  %v178_v59 = vld [vmem:[#allocation2 + $0x44] sm:$0xf] }
  0x6d   :  { %v8664_v7 = vld [vmem:[#allocation5 + $0x50c] sm:$0xf0]  ;;  %v6582_v8 = vld [vmem:[#allocation5 + $0x600] sm:$0xf]  ;;  %v6327_v12 = vor.u32 %v8632_v4, %v6326_v3  ;;  %3942 = vmatpush.bf16.msrb.mxu2 %v6599_v2  ;;  %v183_v63 = vld [vmem:[#allocation2 + $0x68] sm:$0xf] }
  0x6e   :  { %v8696_v9 = vld [vmem:[#allocation5 + $0x60c] sm:$0xf0]  ;;  %v6710_v10 = vld [vmem:[#allocation5 + $0x700] sm:$0xf]  ;;  %v6455_v16 = vor.u32 %v8664_v7, %v6454_v5  ;;  %3956 = vmatpush.bf16.msrb.mxu3 %v6727_v6  ;;  %v188_v3 = vld [vmem:[#allocation2 + $0x8c] sm:$0xf] }
  0x6f   :  { %v8728_v11 = vld [vmem:[#allocation5 + $0x70c] sm:$0xf0]  ;;  %v6583_v17 = vor.u32 %v8696_v9, %v6582_v8  ;;  %v264_v21 = vld.sshfl [vmem:[#allocation1] sm:$0xff pattern:$0x73625140]  ;;  %3915 = vmatpush.bf16.msrb.mxu0 %v6327_v12 }
  0x70   :  { %v189_v13 = vld [vmem:[#allocation2 + $0x90] sm:$0xff]  ;;  %v6711_v20 = vor.u32 %v8728_v11, %v6710_v10  ;;  %v204_v25 = vld [vmem:[#allocation2 + $0xfc] sm:$0xff]  ;;  %3929 = vmatpush.bf16.msrb.mxu1 %v6455_v16 }
  0x71   :  { %v9618_v18 = vld.sshfl [vmem:[#allocation1 + $0x20] sm:$0xff pattern:$0x73625140]  ;;  %v9620_v19 = vld.sshfl [vmem:[#allocation1 + $0x28] sm:$0xff pattern:$0x73625140]  ;;  %3943 = vmatpush.bf16.msrb.mxu2 %v6583_v17 }
  0x72   :  { %v9622_v22 = vld.sshfl [vmem:[#allocation1 + $0x30] sm:$0xff pattern:$0x73625140]  ;;  %v9624_v23 = vld.sshfl [vmem:[#allocation1 + $0x38] sm:$0xff pattern:$0x73625140]  ;;  %3957 = vmatpush.bf16.msrb.mxu3 %v6711_v20 }
  0x73   :  { %292 = vst [vmem:[#allocation1 + $0x20] ss:$4 sm:$0xff] %v189_v13  ;;  %v265_v26 = vld.sshfl [vmem:[#allocation1 + $0x8] sm:$0xff pattern:$0x73625140]  ;;  %v171_v28 = vld [vmem:[#allocation2 + $0x10] sm:$0xff] }
  0x74   :  { %293 = vst [vmem:[#allocation1 + $0x21] ss:$4 sm:$0xff] %v194_v14  ;;  %v267_v27 = vld.sshfl [vmem:[#allocation1 + $0x18] sm:$0xff pattern:$0x73625140]  ;;  %v186_v31 = vld [vmem:[#allocation2 + $0x7c] sm:$0xff] }
  0x75   :  { %294 = vst [vmem:[#allocation1 + $0x22] ss:$4 sm:$0xff] %v199_v15  ;;  %v6950_v32 = vld [vmem:[#allocation5 + $0x8e0] sm:$0xf]  ;;  %v8788_v33 = vld [vmem:[#allocation5 + $0x8ec] sm:$0xf0] }
  0x76   :  { %295 = vst [vmem:[#allocation1 + $0x23] ss:$4 sm:$0xff] %v204_v25  ;;  %v7078_v34 = vld [vmem:[#allocation5 + $0x9e0] sm:$0xf]  ;;  %v8820_v35 = vld [vmem:[#allocation5 + $0x9ec] sm:$0xf0]  ;;  %v6951_v52 = vor.u32 %v8788_v33, %v6950_v32 }
  0x77   :  { %272 = vst [vmem:[#allocation1] ss:$4 sm:$0xff] %v171_v28  ;;  %v7206_v36 = vld [vmem:[#allocation5 + $0xae0] sm:$0xf]  ;;  %v8852_v37 = vld [vmem:[#allocation5 + $0xaec] sm:$0xf0]  ;;  %v7079_v53 = vor.u32 %v8820_v35, %v7078_v34 }
  0x78   :  { %273 = vst [vmem:[#allocation1 + $0x1] ss:$4 sm:$0xff] %v176_v29  ;;  %v7334_v38 = vld [vmem:[#allocation5 + $0xbe0] sm:$0xf]  ;;  %v8884_v39 = vld [vmem:[#allocation5 + $0xbec] sm:$0xf0]  ;;  %v7207_v57 = vor.u32 %v8852_v37, %v7206_v36 }
  0x79   :  { %274 = vst [vmem:[#allocation1 + $0x2] ss:$4 sm:$0xff] %v181_v30  ;;  %v6934_v42 = vld [vmem:[#allocation5 + $0x8c0] sm:$0xf]  ;;  %v8784_v43 = vld [vmem:[#allocation5 + $0x8cc] sm:$0xf0]  ;;  %v7335_v58 = vor.u32 %v8884_v39, %v7334_v38 }
  0x7a   :  { %275 = vst [vmem:[#allocation1 + $0x3] ss:$4 sm:$0xff] %v186_v31  ;;  %v173_v54 = vld [vmem:[#allocation2 + $0x20] sm:$0xf]  ;;  %v8816_v61 = vld [vmem:[#allocation5 + $0x9cc] sm:$0xf0]  ;;  %v6935_v12 = vor.u32 %v8784_v43, %v6934_v42 }
  0x7b   :  { %v7062_v60 = vld [vmem:[#allocation5 + $0x9c0] sm:$0xf]  ;;  %v8848_v0 = vld [vmem:[#allocation5 + $0xacc] sm:$0xf0]  ;;  %v190_v36 = vld [vmem:[#allocation2 + $0x98] sm:$0xff] }
  0x7c   :  { %v7190_v62 = vld [vmem:[#allocation5 + $0xac0] sm:$0xf]  ;;  %v8880_v2 = vld [vmem:[#allocation5 + $0xbcc] sm:$0xf0]  ;;  %v7063_v13 = vor.u32 %v8816_v61, %v7062_v60 }
  0x7d   :  { %v298_v40 = vld.sshfl [vmem:[#allocation1 + $0x20] sm:$0xff pattern:$0x73625140]  ;;  %v300_v41 = vld.sshfl [vmem:[#allocation1 + $0x30] sm:$0xff pattern:$0x73625140]  ;;  %v7191_v14 = vor.u32 %v8848_v0, %v7190_v62 }
  0x7e   :  { %v9626_v44 = vpack.c.bf16 %v298_v40, %v264_v21  ;;  %v9628_v47 = vpack.c.bf16 %v300_v41, %v266_v24  ;;  %v299_v50 = vld.sshfl [vmem:[#allocation1 + $0x28] sm:$0xff pattern:$0x73625140]  ;;  %v301_v51 = vld.sshfl [vmem:[#allocation1 + $0x38] sm:$0xff pattern:$0x73625140] }
  0x7f   :  { %v9630_v55 = vpack.c.bf16 %v299_v50, %v265_v26  ;;  %v9632_v56 = vpack.c.bf16 %v301_v51, %v267_v27  ;;  %v7318_v1 = vld [vmem:[#allocation5 + $0xbc0] sm:$0xf]  ;;  %v8780_v7 = vld [vmem:[#allocation5 + $0x8ac] sm:$0xf0] }
  0x80   :  { %3860 = vmatmul.bf16.vlgmr.msra.gmra.mxu0 %v9626_v44  ;;  %3888 = vmatmul.bf16.vlgmr.msra.gmra.mxu2 %v9628_v47  ;;  %v6918_v6 = vld [vmem:[#allocation5 + $0x8a0] sm:$0xf]  ;;  %v8812_v9 = vld [vmem:[#allocation5 + $0x9ac] sm:$0xf0]  ;;  %v7319_v15 = vor.u32 %v8880_v2, %v7318_v1 }
  0x81   :  { %3874 = vmatmul.bf16.vlgmr.msra.gmra.mxu1 %v9630_v55  ;;  %3902 = vmatmul.bf16.vlgmr.msra.gmra.mxu3 %v9632_v56  ;;  %v9638_v4 = vld.sshfl [vmem:[#allocation1] sm:$0xff pattern:$0x73625140]  ;;  %v9640_v5 = vld.sshfl [vmem:[#allocation1 + $0x8] sm:$0xff pattern:$0x73625140]  ;;  %v6919_v24 = vor.u32 %v8780_v7, %v6918_v6 }
  0x82   :  { %v7046_v8 = vld [vmem:[#allocation5 + $0x9a0] sm:$0xf]  ;;  %3964 = vmatpush.bf16.msra.mxu0 %v6951_v52  ;;  %3978 = vmatpush.bf16.msra.mxu1 %v7079_v53  ;;  %v9642_v10 = vld.sshfl [vmem:[#allocation1 + $0x10] sm:$0xff pattern:$0x73625140] }
  0x83   :  { %v9644_v11 = vld.sshfl [vmem:[#allocation1 + $0x18] sm:$0xff pattern:$0x73625140]  ;;  %3992 = vmatpush.bf16.msra.mxu2 %v7207_v57  ;;  %4006 = vmatpush.bf16.msra.mxu3 %v7335_v58  ;;  %v7174_v16 = vld [vmem:[#allocation5 + $0xaa0] sm:$0xf]  ;;  %v7047_v25 = vor.u32 %v8812_v9, %v7046_v8 }
  0x84   :  { %288 = vst [vmem:[#allocation1] ss:$4 sm:$0xff] %v173_v54  ;;  %v8844_v17 = vld [vmem:[#allocation5 + $0xaac] sm:$0xf0]  ;;  %v7302_v20 = vld [vmem:[#allocation5 + $0xba0] sm:$0xf] }
  0x85   :  { %289 = vst [vmem:[#allocation1 + $0x1] ss:$4 sm:$0xff] %v178_v59  ;;  %v8876_v21 = vld [vmem:[#allocation5 + $0xbac] sm:$0xf0]  ;;  %v6902_v26 = vld [vmem:[#allocation5 + $0x880] sm:$0xf]  ;;  %v7175_v28 = vor.u32 %v8844_v17, %v7174_v16 }
  0x86   :  { %290 = vst [vmem:[#allocation1 + $0x2] ss:$4 sm:$0xff] %v183_v63  ;;  %3965 = vmatpush.bf16.msra.mxu0 %v6935_v12  ;;  %3979 = vmatpush.bf16.msra.mxu1 %v7063_v13  ;;  %v8776_v27 = vld [vmem:[#allocation5 + $0x88c] sm:$0xf0]  ;;  %v7303_v29 = vor.u32 %v8876_v21, %v7302_v20  ;;  %v7030_v30 = vld [vmem:[#allocation5 + $0x980] sm:$0xf] }
  0x87   :  { %291 = vst [vmem:[#allocation1 + $0x3] ss:$4 sm:$0xff] %v188_v3  ;;  %3993 = vmatpush.bf16.msra.mxu2 %v7191_v14  ;;  %4007 = vmatpush.bf16.msra.mxu3 %v7319_v15  ;;  %v8808_v31 = vld [vmem:[#allocation5 + $0x98c] sm:$0xf0]  ;;  %v7158_v32 = vld [vmem:[#allocation5 + $0xa80] sm:$0xf]  ;;  %v6903_v38 = vor.u32 %v8776_v27, %v6902_v26 }
  0x88   :  { %v8840_v33 = vld [vmem:[#allocation5 + $0xa8c] sm:$0xf0]  ;;  %v7286_v34 = vld [vmem:[#allocation5 + $0xb80] sm:$0xf]  ;;  %v7031_v39 = vor.u32 %v8808_v31, %v7030_v30  ;;  %v205_v54 = vld [vmem:[#allocation2 + $0x104] sm:$0xff] }
  0x89   :  { %v8872_v35 = vld [vmem:[#allocation5 + $0xb8c] sm:$0xf0]  ;;  %v195_v37 = vld [vmem:[#allocation2 + $0xbc] sm:$0xff]  ;;  %v7159_v43 = vor.u32 %v8840_v33, %v7158_v32 }
  0x8a   :  { %3966 = vmatpush.bf16.msra.mxu0 %v6919_v24  ;;  %3980 = vmatpush.bf16.msra.mxu1 %v7047_v25  ;;  %v6886_v40 = vld [vmem:[#allocation5 + $0x860] sm:$0xf]  ;;  %v8772_v41 = vld [vmem:[#allocation5 + $0x86c] sm:$0xf0]  ;;  %v7287_v50 = vor.u32 %v8872_v35, %v7286_v34 }
  0x8b   :  { %v200_v42 = vld [vmem:[#allocation2 + $0xe0] sm:$0xff]  ;;  %3994 = vmatpush.bf16.msra.mxu2 %v7175_v28  ;;  %4008 = vmatpush.bf16.msra.mxu3 %v7303_v29  ;;  %v8804_v52 = vld [vmem:[#allocation5 + $0x96c] sm:$0xf0]  ;;  %v6887_v0 = vor.u32 %v8772_v41, %v6886_v40 }
  0x8c   :  { %v7014_v51 = vld [vmem:[#allocation5 + $0x960] sm:$0xf]  ;;  %v8836_v57 = vld [vmem:[#allocation5 + $0xa6c] sm:$0xf0]  ;;  %v196_v41 = vld [vmem:[#allocation2 + $0xc4] sm:$0xff] }
  0x8d   :  { %v7142_v53 = vld [vmem:[#allocation5 + $0xa60] sm:$0xf]  ;;  %v8868_v59 = vld [vmem:[#allocation5 + $0xb6c] sm:$0xf0]  ;;  %v7015_v1 = vor.u32 %v8804_v52, %v7014_v51  ;;  %307 = vst [vmem:[#allocation1 + $0x21] ss:$4 sm:$0xff] %v196_v41 }
  0x8e   :  { %v7270_v58 = vld [vmem:[#allocation5 + $0xb60] sm:$0xf]  ;;  %v9646_v60 = vld.sshfl [vmem:[#allocation1] sm:$0xff pattern:$0x73625140]  ;;  %3967 = vmatpush.bf16.msra.mxu0 %v6903_v38  ;;  %3981 = vmatpush.bf16.msra.mxu1 %v7031_v39  ;;  %v7143_v6 = vor.u32 %v8836_v57, %v7142_v53 }
  0x8f   :  { %v9648_v61 = vld.sshfl [vmem:[#allocation1 + $0x8] sm:$0xff pattern:$0x73625140]  ;;  %v8768_v63 = vld [vmem:[#allocation5 + $0x84c] sm:$0xf0]  ;;  %3995 = vmatpush.bf16.msra.mxu2 %v7159_v43  ;;  %4009 = vmatpush.bf16.msra.mxu3 %v7287_v50  ;;  %v7271_v7 = vor.u32 %v8868_v59, %v7270_v58 }
  0x90   :  { %v6870_v62 = vld [vmem:[#allocation5 + $0x840] sm:$0xf]  ;;  %302 = vst [vmem:[#allocation1] ss:$4 sm:$0xff] %v190_v36  ;;  %v8800_v3 = vld [vmem:[#allocation5 + $0x94c] sm:$0xf0] }
  0x91   :  { %v6998_v2 = vld [vmem:[#allocation5 + $0x940] sm:$0xf]  ;;  %303 = vst [vmem:[#allocation1 + $0x1] ss:$4 sm:$0xff] %v195_v37  ;;  %v8832_v9 = vld [vmem:[#allocation5 + $0xa4c] sm:$0xf0]  ;;  %v6871_v14 = vor.u32 %v8768_v63, %v6870_v62 }
  0x92   :  { %v7126_v8 = vld [vmem:[#allocation5 + $0xa40] sm:$0xf]  ;;  %304 = vst [vmem:[#allocation1 + $0x2] ss:$4 sm:$0xff] %v200_v42  ;;  %v8864_v13 = vld [vmem:[#allocation5 + $0xb4c] sm:$0xf0]  ;;  %3968 = vmatpush.bf16.msra.mxu0 %v6887_v0  ;;  %3982 = vmatpush.bf16.msra.mxu1 %v7015_v1  ;;  %v6999_v15 = vor.u32 %v8800_v3, %v6998_v2 }
  0x93   :  { %v7254_v12 = vld [vmem:[#allocation5 + $0xb40] sm:$0xf]  ;;  %305 = vst [vmem:[#allocation1 + $0x3] ss:$4 sm:$0xff] %v205_v54  ;;  %v8764_v17 = vld [vmem:[#allocation5 + $0x82c] sm:$0xf0]  ;;  %3996 = vmatpush.bf16.msra.mxu2 %v7143_v6  ;;  %4010 = vmatpush.bf16.msra.mxu3 %v7271_v7  ;;  %v7127_v21 = vor.u32 %v8832_v9, %v7126_v8 }
  0x94   :  { %v6854_v16 = vld [vmem:[#allocation5 + $0x820] sm:$0xf]  ;;  %v7255_v24 = vor.u32 %v8864_v13, %v7254_v12  ;;  %v8796_v25 = vld [vmem:[#allocation5 + $0x92c] sm:$0xf0]  ;;  %v201_v9 = vld [vmem:[#allocation2 + $0xe8] sm:$0xff] }
  0x95   :  { %v6982_v20 = vld [vmem:[#allocation5 + $0x920] sm:$0xf]  ;;  %v8828_v27 = vld [vmem:[#allocation5 + $0xa2c] sm:$0xf0]  ;;  %v6855_v34 = vor.u32 %v8764_v17, %v6854_v16  ;;  %308 = vst [vmem:[#allocation1 + $0x22] ss:$4 sm:$0xff] %v201_v9 }
  0x96   :  { %v7110_v26 = vld [vmem:[#allocation5 + $0xa20] sm:$0xf]  ;;  %v8860_v29 = vld [vmem:[#allocation5 + $0xb2c] sm:$0xf0]  ;;  %3969 = vmatpush.bf16.msra.mxu0 %v6871_v14  ;;  %3983 = vmatpush.bf16.msra.mxu1 %v6999_v15  ;;  %v6983_v35 = vor.u32 %v8796_v25, %v6982_v20 }
  0x97   :  { %v7238_v28 = vld [vmem:[#allocation5 + $0xb20] sm:$0xf]  ;;  %v8760_v31 = vld [vmem:[#allocation5 + $0x80c] sm:$0xf0]  ;;  %3997 = vmatpush.bf16.msra.mxu2 %v7127_v21  ;;  %4011 = vmatpush.bf16.msra.mxu3 %v7255_v24  ;;  %v7111_v50 = vor.u32 %v8828_v27, %v7110_v26 }
  0x98   :  { %v6838_v30 = vld [vmem:[#allocation5 + $0x800] sm:$0xf]  ;;  %v8792_v33 = vld [vmem:[#allocation5 + $0x90c] sm:$0xf0]  ;;  %v7239_v63 = vor.u32 %v8860_v29, %v7238_v28 }
  0x99   :  { %v6966_v32 = vld [vmem:[#allocation5 + $0x900] sm:$0xf]  ;;  %v8916_v37 = vld [vmem:[#allocation5 + $0xcec] sm:$0xf0]  ;;  %v6839_v0 = vor.u32 %v8760_v31, %v6838_v30 }
  0x9a   :  { %v7462_v36 = vld [vmem:[#allocation5 + $0xce0] sm:$0xf]  ;;  %v8948_v39 = vld [vmem:[#allocation5 + $0xdec] sm:$0xf0]  ;;  %3970 = vmatpush.bf16.msra.mxu0 %v6855_v34  ;;  %3984 = vmatpush.bf16.msra.mxu1 %v6983_v35 }
  0x9b   :  { %v7590_v38 = vld [vmem:[#allocation5 + $0xde0] sm:$0xf]  ;;  %v310_v42 = vld.sshfl [vmem:[#allocation1] sm:$0xff pattern:$0x73625140]  ;;  %v7463_v12 = vor.u32 %v8916_v37, %v7462_v36  ;;  %3998 = vmatpush.bf16.msra.mxu2 %v7111_v50  ;;  %4012 = vmatpush.bf16.msra.mxu3 %v7239_v63 }
  0x9c   :  { %v191_v40 = vld [vmem:[#allocation2 + $0xa0] sm:$0xff]  ;;  %v312_v43 = vld.sshfl [vmem:[#allocation1 + $0x10] sm:$0xff pattern:$0x73625140]  ;;  %v8824_v52 = vld [vmem:[#allocation5 + $0xa0c] sm:$0xf0]  ;;  %v9651_v57 = vpack.c.bf16 %v310_v42, %v9610_v45  ;;  %v6967_v45 = vor.u32 %v8792_v33, %v6966_v32  ;;  %v7591_v13 = vor.u32 %v8948_v39, %v7590_v38 }
  0x9d   :  { %v7094_v51 = vld [vmem:[#allocation5 + $0xa00] sm:$0xf]  ;;  %v8856_v54 = vld [vmem:[#allocation5 + $0xb0c] sm:$0xf0]  ;;  %v9654_v58 = vpack.c.bf16 %v312_v43, %v9614_v48  ;;  %306 = vst [vmem:[#allocation1 + $0x20] ss:$4 sm:$0xff] %v191_v40 }
  0x9e   :  { %v7222_v53 = vld [vmem:[#allocation5 + $0xb00] sm:$0xf]  ;;  %v313_v62 = vld.sshfl [vmem:[#allocation1 + $0x18] sm:$0xff pattern:$0x73625140]  ;;  %3916 = vmatmul.bf16.vlgmr.msrb.gmra.mxu0 %v9651_v57  ;;  %v7095_v16 = vor.u32 %v8824_v52, %v7094_v51  ;;  %3985 = vmatpush.bf16.msra.mxu1 %v6967_v45 }
  0x9f   :  { %v311_v59 = vld.sshfl [vmem:[#allocation1 + $0x8] sm:$0xff pattern:$0x73625140]  ;;  %v8980_v2 = vld [vmem:[#allocation5 + $0xeec] sm:$0xf0]  ;;  %v9660_v7 = vpack.c.bf16 %v313_v62, %v9616_v49  ;;  %3944 = vmatmul.bf16.vlgmr.msrb.gmra.mxu2 %v9654_v58  ;;  %v7223_v17 = vor.u32 %v8856_v54, %v7222_v53  ;;  %3971 = vmatpush.bf16.msra.mxu0 %v6839_v0 }
  0xa0   :  { %v7718_v1 = vld [vmem:[#allocation5 + $0xee0] sm:$0xf]  ;;  %v9657_v6 = vpack.c.bf16 %v311_v59, %v9612_v46  ;;  %v9012_v8 = vld [vmem:[#allocation5 + $0xfec] sm:$0xf0]  ;;  %3999 = vmatpush.bf16.msra.mxu2 %v7095_v16 }
  0xa1   :  { %v7846_v3 = vld [vmem:[#allocation5 + $0xfe0] sm:$0xf]  ;;  %v206_v48 = vld [vmem:[#allocation2 + $0x10c] sm:$0xff]  ;;  %3958 = vmatmul.bf16.vlgmr.msrb.gmra.mxu3 %v9660_v7  ;;  %v7719_v20 = vor.u32 %v8980_v2, %v7718_v1 }
  0xa2   :  { %v7446_v14 = vld [vmem:[#allocation5 + $0xcc0] sm:$0xf]  ;;  %v8912_v46 = vld [vmem:[#allocation5 + $0xccc] sm:$0xf0]  ;;  %3930 = vmatmul.bf16.vlgmr.msrb.gmra.mxu1 %v9657_v6  ;;  %309 = vst [vmem:[#allocation1 + $0x23] ss:$4 sm:$0xff] %v206_v48  ;;  %v7847_v21 = vor.u32 %v9012_v8, %v7846_v3  ;;  %4013 = vmatpush.bf16.msra.mxu3 %v7223_v17 }
  0xa3   :  { %v7574_v49 = vld [vmem:[#allocation5 + $0xdc0] sm:$0xf]  ;;  %v8944_v15 = vld [vmem:[#allocation5 + $0xdcc] sm:$0xf0]  ;;  %4020 = vmatpush.bf16.msrb.mxu0 %v7463_v12  ;;  %4034 = vmatpush.bf16.msrb.mxu1 %v7591_v13  ;;  %v7447_v26 = vor.u32 %v8912_v46, %v7446_v14 }
  0xa4   :  { %v7702_v24 = vld [vmem:[#allocation5 + $0xec0] sm:$0xf]  ;;  %v8976_v25 = vld [vmem:[#allocation5 + $0xecc] sm:$0xf0]  ;;  %v7575_v27 = vor.u32 %v8944_v15, %v7574_v49  ;;  %4048 = vmatpush.bf16.msrb.mxu2 %v7719_v20 }
  0xa5   :  { %v7830_v28 = vld [vmem:[#allocation5 + $0xfc0] sm:$0xf]  ;;  %v9008_v29 = vld [vmem:[#allocation5 + $0xfcc] sm:$0xf0]  ;;  %v7703_v34 = vor.u32 %v8976_v25, %v7702_v24 }
  0xa6   :  { %v7430_v30 = vld [vmem:[#allocation5 + $0xca0] sm:$0xf]  ;;  %v8908_v31 = vld [vmem:[#allocation5 + $0xcac] sm:$0xf0]  ;;  %4062 = vmatpush.bf16.msrb.mxu3 %v7847_v21  ;;  %v7831_v35 = vor.u32 %v9008_v29, %v7830_v28 }
  0xa7   :  { %v7558_v32 = vld [vmem:[#allocation5 + $0xda0] sm:$0xf]  ;;  %v8940_v33 = vld [vmem:[#allocation5 + $0xdac] sm:$0xf0]  ;;  %4021 = vmatpush.bf16.msrb.mxu0 %v7447_v26  ;;  %4035 = vmatpush.bf16.msrb.mxu1 %v7575_v27  ;;  %v7431_v37 = vor.u32 %v8908_v31, %v7430_v30 }
  0xa8   :  { %v7686_v36 = vld [vmem:[#allocation5 + $0xea0] sm:$0xf]  ;;  %v7559_v38 = vor.u32 %v8940_v33, %v7558_v32  ;;  %v8972_v39 = vld [vmem:[#allocation5 + $0xeac] sm:$0xf0]  ;;  %4049 = vmatpush.bf16.msrb.mxu2 %v7703_v34 }
  0xa9   :  { %v7814_v40 = vld [vmem:[#allocation5 + $0xfa0] sm:$0xf]  ;;  %v9004_v41 = vld [vmem:[#allocation5 + $0xfac] sm:$0xf0]  ;;  %v7687_v54 = vor.u32 %v8972_v39, %v7686_v36 }
  0xaa   :  { %v314_v42 = vld.sshfl [vmem:[#allocation1 + $0x20] sm:$0xff pattern:$0x73625140]  ;;  %v316_v43 = vld.sshfl [vmem:[#allocation1 + $0x30] sm:$0xff pattern:$0x73625140]  ;;  %4063 = vmatpush.bf16.msrb.mxu3 %v7831_v35  ;;  %v7815_v59 = vor.u32 %v9004_v41, %v7814_v40 }
  0xab   :  { %v7414_v50 = vld [vmem:[#allocation5 + $0xc80] sm:$0xf]  ;;  %v8904_v51 = vld [vmem:[#allocation5 + $0xc8c] sm:$0xf0]  ;;  %v9667_v1 = vpack.c.bf16 %v314_v42, %v9638_v4  ;;  %v9670_v2 = vpack.c.bf16 %v316_v43, %v9642_v10  ;;  %4022 = vmatpush.bf16.msrb.mxu0 %v7431_v37  ;;  %4036 = vmatpush.bf16.msrb.mxu1 %v7559_v38 }
  0xac   :  { %v315_v52 = vld.sshfl [vmem:[#allocation1 + $0x28] sm:$0xff pattern:$0x73625140]  ;;  %v317_v53 = vld.sshfl [vmem:[#allocation1 + $0x38] sm:$0xff pattern:$0x73625140]  ;;  %v7415_v12 = vor.u32 %v8904_v51, %v7414_v50  ;;  %4050 = vmatpush.bf16.msrb.mxu2 %v7687_v54 }
  0xad   :  { %v7542_v62 = vld [vmem:[#allocation5 + $0xd80] sm:$0xf]  ;;  %v8936_v63 = vld [vmem:[#allocation5 + $0xd8c] sm:$0xf0]  ;;  %v9673_v9 = vpack.c.bf16 %v315_v52, %v9640_v5  ;;  %v9676_v48 = vpack.c.bf16 %v317_v53, %v9644_v11  ;;  %v192_v52 = vld [vmem:[#allocation2 + $0xa8] sm:$0xff] }
  0xae   :  { %v7670_v0 = vld [vmem:[#allocation5 + $0xe80] sm:$0xf]  ;;  %v8968_v3 = vld [vmem:[#allocation5 + $0xe8c] sm:$0xf0]  ;;  %v7543_v13 = vor.u32 %v8936_v63, %v7542_v62  ;;  %4064 = vmatpush.bf16.msrb.mxu3 %v7815_v59  ;;  %3972 = vmatmul.bf16.vlgmr.msra.gmra.mxu0 %v9667_v1  ;;  %318 = vst [vmem:[#allocation1] ss:$4 sm:$0xff] %v192_v52 }
  0xaf   :  { %v7798_v45 = vld [vmem:[#allocation5 + $0xf80] sm:$0xf]  ;;  %v9000_v8 = vld [vmem:[#allocation5 + $0xf8c] sm:$0xf0]  ;;  %v7671_v4 = vor.u32 %v8968_v3, %v7670_v0  ;;  %4000 = vmatmul.bf16.vlgmr.msra.gmra.mxu2 %v9670_v2  ;;  %4023 = vmatpush.bf16.msrb.mxu0 %v7415_v12  ;;  %v207_v3 = vld [vmem:[#allocation2 + $0x114] sm:$0xff] }
  0xb0   :  { %v7398_v14 = vld [vmem:[#allocation5 + $0xc60] sm:$0xf]  ;;  %v8900_v46 = vld [vmem:[#allocation5 + $0xc6c] sm:$0xf0]  ;;  %v7799_v10 = vor.u32 %v9000_v8, %v7798_v45  ;;  %4037 = vmatpush.bf16.msrb.mxu1 %v7543_v13  ;;  %321 = vst [vmem:[#allocation1 + $0x3] ss:$4 sm:$0xff] %v207_v3 }
  0xb1   :  { %v7526_v49 = vld [vmem:[#allocation5 + $0xd60] sm:$0xf]  ;;  %v8932_v15 = vld [vmem:[#allocation5 + $0xd6c] sm:$0xf0]  ;;  %4014 = vmatmul.bf16.vlgmr.msra.gmra.mxu3 %v9676_v48  ;;  %v7399_v11 = vor.u32 %v8900_v46, %v7398_v14  ;;  %4051 = vmatpush.bf16.msrb.mxu2 %v7671_v4 }
  0xb2   :  { %v7654_v16 = vld [vmem:[#allocation5 + $0xe60] sm:$0xf]  ;;  %v8964_v5 = vld [vmem:[#allocation5 + $0xe6c] sm:$0xf0]  ;;  %3986 = vmatmul.bf16.vlgmr.msra.gmra.mxu1 %v9673_v9  ;;  %v7527_v21 = vor.u32 %v8932_v15, %v7526_v49  ;;  %4065 = vmatpush.bf16.msrb.mxu3 %v7799_v10 }
  0xb3   :  { %v7782_v17 = vld [vmem:[#allocation5 + $0xf60] sm:$0xf]  ;;  %v8996_v20 = vld [vmem:[#allocation5 + $0xf6c] sm:$0xf0]  ;;  %v7655_v26 = vor.u32 %v8964_v5, %v7654_v16  ;;  %4024 = vmatpush.bf16.msrb.mxu0 %v7399_v11 }
  0xb4   :  { %v7382_v24 = vld [vmem:[#allocation5 + $0xc40] sm:$0xf]  ;;  %v8896_v25 = vld [vmem:[#allocation5 + $0xc4c] sm:$0xf0]  ;;  %v7783_v27 = vor.u32 %v8996_v20, %v7782_v17  ;;  %4038 = vmatpush.bf16.msrb.mxu1 %v7527_v21  ;;  %v8530_v17 = vld [vmem:[#allocation5 + $0xe4] sm:$0xf] }
  0xb5   :  { %v7510_v28 = vld [vmem:[#allocation5 + $0xd40] sm:$0xf]  ;;  %v8928_v29 = vld [vmem:[#allocation5 + $0xd4c] sm:$0xf0]  ;;  %v7383_v36 = vor.u32 %v8896_v25, %v7382_v24  ;;  %4052 = vmatpush.bf16.msrb.mxu2 %v7655_v26  ;;  %v5928_v21 = vld [vmem:[#allocation5 + $0xf0] sm:$0xf0] }
  0xb6   :  { %v7638_v30 = vld [vmem:[#allocation5 + $0xe40] sm:$0xf]  ;;  %v8960_v31 = vld [vmem:[#allocation5 + $0xe4c] sm:$0xf0]  ;;  %v7511_v37 = vor.u32 %v8928_v29, %v7510_v28  ;;  %4066 = vmatpush.bf16.msrb.mxu3 %v7783_v27  ;;  %v8562_v24 = vld [vmem:[#allocation5 + $0x1e4] sm:$0xf] }
  0xb7   :  { %v7766_v32 = vld [vmem:[#allocation5 + $0xf40] sm:$0xf]  ;;  %v8992_v33 = vld [vmem:[#allocation5 + $0xf4c] sm:$0xf0]  ;;  %v7639_v41 = vor.u32 %v8960_v31, %v7638_v30  ;;  %4025 = vmatpush.bf16.msrb.mxu0 %v7383_v36  ;;  %v6056_v25 = vld [vmem:[#allocation5 + $0x1f0] sm:$0xf0] }
  0xb8   :  { %v7366_v34 = vld [vmem:[#allocation5 + $0xc20] sm:$0xf]  ;;  %v8892_v35 = vld [vmem:[#allocation5 + $0xc2c] sm:$0xf0]  ;;  %v7767_v42 = vor.u32 %v8992_v33, %v7766_v32  ;;  %4039 = vmatpush.bf16.msrb.mxu1 %v7511_v37  ;;  %v8526_v36 = vld [vmem:[#allocation5 + $0xc4] sm:$0xf] }
  0xb9   :  { %v7494_v38 = vld [vmem:[#allocation5 + $0xd20] sm:$0xf]  ;;  %v8924_v39 = vld [vmem:[#allocation5 + $0xd2c] sm:$0xf0]  ;;  %v7367_v45 = vor.u32 %v8892_v35, %v7366_v34  ;;  %4053 = vmatpush.bf16.msrb.mxu2 %v7639_v41  ;;  %v5931_v34 = vor.u32 %v8530_v17, %v5928_v21  ;;  %v6059_v35 = vor.u32 %v8562_v24, %v6056_v25  ;;  %v5912_v37 = vld [vmem:[#allocation5 + $0xd0] sm:$0xf0] }
  0xba   :  { %v7622_v40 = vld [vmem:[#allocation5 + $0xe20] sm:$0xf]  ;;  %v8956_v43 = vld [vmem:[#allocation5 + $0xe2c] sm:$0xf0]  ;;  %v7495_v8 = vor.u32 %v8924_v39, %v7494_v38  ;;  %4067 = vmatpush.bf16.msrb.mxu3 %v7767_v42  ;;  %v8558_v38 = vld [vmem:[#allocation5 + $0x1c4] sm:$0xf] }
  0xbb   :  { %v7750_v50 = vld [vmem:[#allocation5 + $0xf20] sm:$0xf]  ;;  %v8988_v51 = vld [vmem:[#allocation5 + $0xf2c] sm:$0xf0]  ;;  %v7623_v14 = vor.u32 %v8956_v43, %v7622_v40  ;;  %4026 = vmatpush.bf16.msrb.mxu0 %v7367_v45  ;;  %v6040_v39 = vld [vmem:[#allocation5 + $0x1d0] sm:$0xf0] }
  0xbc   :  { %v197_v53 = vld [vmem:[#allocation2 + $0xcc] sm:$0xff]  ;;  %v7350_v59 = vld [vmem:[#allocation5 + $0xc00] sm:$0xf]  ;;  %v7751_v46 = vor.u32 %v8988_v51, %v7750_v50  ;;  %4040 = vmatpush.bf16.msrb.mxu1 %v7495_v8  ;;  %v6043_v3 = vor.u32 %v8558_v38, %v6040_v39  ;;  %v8550_v17 = vld [vmem:[#allocation5 + $0x184] sm:$0xf] }
  0xbd   :  { %v202_v54 = vld [vmem:[#allocation2 + $0xf0] sm:$0xff]  ;;  %v7478_v63 = vld [vmem:[#allocation5 + $0xd00] sm:$0xf]  ;;  %319 = vst [vmem:[#allocation1 + $0x1] ss:$4 sm:$0xff] %v197_v53  ;;  %4054 = vmatpush.bf16.msrb.mxu2 %v7623_v14 }
  0xbe   :  { %v8888_v62 = vld [vmem:[#allocation5 + $0xc0c] sm:$0xf0]  ;;  %v7606_v12 = vld [vmem:[#allocation5 + $0xe00] sm:$0xf]  ;;  %320 = vst [vmem:[#allocation1 + $0x2] ss:$4 sm:$0xff] %v202_v54  ;;  %4068 = vmatpush.bf16.msrb.mxu3 %v7751_v46 }
  0xbf   :  { %v8920_v0 = vld [vmem:[#allocation5 + $0xd0c] sm:$0xf0]  ;;  %v7734_v4 = vld [vmem:[#allocation5 + $0xf00] sm:$0xf]  ;;  %v7351_v20 = vor.u32 %v8888_v62, %v7350_v59  ;;  %v5915_v62 = vor.u32 %v8526_v36, %v5912_v37 }
  0xc0   :  { %v8952_v13 = vld [vmem:[#allocation5 + $0xe0c] sm:$0xf0]  ;;  %v7974_v49 = vld [vmem:[#allocation5 + $0x10e0] sm:$0xf]  ;;  %v7479_v11 = vor.u32 %v8920_v0, %v7478_v63 }
  0xc1   :  { %v8984_v10 = vld [vmem:[#allocation5 + $0xf0c] sm:$0xf0]  ;;  %v8102_v16 = vld [vmem:[#allocation5 + $0x11e0] sm:$0xf]  ;;  %v7607_v26 = vor.u32 %v8952_v13, %v7606_v12  ;;  %4027 = vmatpush.bf16.msrb.mxu0 %v7351_v20  ;;  %v8522_v12 = vld [vmem:[#allocation5 + $0xa4] sm:$0xf] }
  0xc2   :  { %v9044_v15 = vld [vmem:[#allocation5 + $0x10ec] sm:$0xf0]  ;;  %v7735_v27 = vor.u32 %v8984_v10, %v7734_v4  ;;  %v7958_v28 = vld [vmem:[#allocation5 + $0x10c0] sm:$0xf]  ;;  %4041 = vmatpush.bf16.msrb.mxu1 %v7479_v11  ;;  %v6024_v13 = vld [vmem:[#allocation5 + $0x1b0] sm:$0xf0] }
  0xc3   :  { %v9076_v5 = vld [vmem:[#allocation5 + $0x11ec] sm:$0xf0]  ;;  %v7975_v29 = vor.u32 %v9044_v15, %v7974_v49  ;;  %v8086_v32 = vld [vmem:[#allocation5 + $0x11c0] sm:$0xf]  ;;  %4055 = vmatpush.bf16.msrb.mxu2 %v7607_v26  ;;  %v6008_v20 = vld [vmem:[#allocation5 + $0x190] sm:$0xf0] }
  0xc4   :  { %v8103_v30 = vor.u32 %v9076_v5, %v8102_v16  ;;  %v9040_v31 = vld [vmem:[#allocation5 + $0x10cc] sm:$0xf0]  ;;  %4069 = vmatpush.bf16.msrb.mxu3 %v7735_v27  ;;  %v7942_v50 = vld [vmem:[#allocation5 + $0x10a0] sm:$0xf]  ;;  %v8518_v16 = vld [vmem:[#allocation5 + $0x84] sm:$0xf]  ;;  %v6011_v27 = vor.u32 %v8550_v17, %v6008_v20 }
  0xc5   :  { %v9072_v33 = vld [vmem:[#allocation5 + $0x11cc] sm:$0xf0]  ;;  %v326_v40 = vld.sshfl [vmem:[#allocation1] sm:$0xff pattern:$0x73625140]  ;;  %v7959_v42 = vor.u32 %v9040_v31, %v7958_v28  ;;  %4076 = vmatpush.bf16.msra.mxu0 %v7975_v29 }
  0xc6   :  { %v328_v41 = vld.sshfl [vmem:[#allocation1 + $0x10] sm:$0xff pattern:$0x73625140]  ;;  %v8087_v43 = vor.u32 %v9072_v33, %v8086_v32  ;;  %v9036_v51 = vld [vmem:[#allocation5 + $0x10ac] sm:$0xf0]  ;;  %4090 = vmatpush.bf16.msra.mxu1 %v8103_v30  ;;  %v9683_v52 = vpack.c.bf16 %v326_v40, %v9618_v18 }
  0xc7   :  { %v9686_v53 = vpack.c.bf16 %v328_v41, %v9622_v22  ;;  %v327_v54 = vld.sshfl [vmem:[#allocation1 + $0x8] sm:$0xff pattern:$0x73625140]  ;;  %v329_v59 = vld.sshfl [vmem:[#allocation1 + $0x18] sm:$0xff pattern:$0x73625140]  ;;  %4104 = vmatpush.bf16.msra.mxu2 %v5931_v34 }
  0xc8   :  { %4118 = vmatpush.bf16.msra.mxu3 %v6059_v35  ;;  %v9689_v63 = vpack.c.bf16 %v327_v54, %v9620_v19  ;;  %v9692_v0 = vpack.c.bf16 %v329_v59, %v9624_v23  ;;  %v8070_v45 = vld [vmem:[#allocation5 + $0x11a0] sm:$0xf]  ;;  %v9068_v8 = vld [vmem:[#allocation5 + $0x11ac] sm:$0xf0]  ;;  %4028 = vmatmul.bf16.vlgmr.msrb.gmra.mxu0 %v9683_v52  ;;  %v5896_v18 = vld [vmem:[#allocation5 + $0xb0] sm:$0xf0]  ;;  %v7943_v19 = vor.u32 %v9036_v51, %v7942_v50 }
  0xc9   :  { %4056 = vmatmul.bf16.vlgmr.msrb.gmra.mxu2 %v9686_v53  ;;  %v8554_v22 = vld [vmem:[#allocation5 + $0x1a4] sm:$0xf]  ;;  %4077 = vmatpush.bf16.msra.mxu0 %v7959_v42  ;;  %v8071_v23 = vor.u32 %v9068_v8, %v8070_v45  ;;  %v7926_v14 = vld [vmem:[#allocation5 + $0x1080] sm:$0xf]  ;;  %v9032_v46 = vld [vmem:[#allocation5 + $0x108c] sm:$0xf0]  ;;  %v5899_v4 = vor.u32 %v8522_v12, %v5896_v18 }
  0xca   :  { %4042 = vmatmul.bf16.vlgmr.msrb.gmra.mxu1 %v9689_v63  ;;  %4070 = vmatmul.bf16.vlgmr.msrb.gmra.mxu3 %v9692_v0  ;;  %v6027_v10 = vor.u32 %v8554_v22, %v6024_v13  ;;  %v8054_v49 = vld [vmem:[#allocation5 + $0x1180] sm:$0xf]  ;;  %v9064_v15 = vld [vmem:[#allocation5 + $0x118c] sm:$0xf0]  ;;  %v5880_v5 = vld [vmem:[#allocation5 + $0x90] sm:$0xf0]  ;;  %v7927_v11 = vor.u32 %v9032_v46, %v7926_v14 }
  0xcb   :  { %4091 = vmatpush.bf16.msra.mxu1 %v8087_v43  ;;  %4105 = vmatpush.bf16.msra.mxu2 %v5915_v62  ;;  %v8055_v21 = vor.u32 %v9064_v15, %v8054_v49  ;;  %v7910_v24 = vld [vmem:[#allocation5 + $0x1060] sm:$0xf]  ;;  %v9028_v25 = vld [vmem:[#allocation5 + $0x106c] sm:$0xf0]  ;;  %v5883_v26 = vor.u32 %v8518_v16, %v5880_v5  ;;  %v8514_v30 = vld [vmem:[#allocation5 + $0x64] sm:$0xf] }
  0xcc   :  { %4119 = vmatpush.bf16.msra.mxu3 %v6043_v3  ;;  %v8038_v28 = vld [vmem:[#allocation5 + $0x1160] sm:$0xf]  ;;  %v9060_v29 = vld [vmem:[#allocation5 + $0x116c] sm:$0xf0]  ;;  %v5864_v31 = vld [vmem:[#allocation5 + $0x70] sm:$0xf0]  ;;  %v7911_v36 = vor.u32 %v9028_v25, %v7910_v24 }
  0xcd   :  { %4078 = vmatpush.bf16.msra.mxu0 %v7943_v19  ;;  %v8546_v32 = vld [vmem:[#allocation5 + $0x164] sm:$0xf]  ;;  %v5992_v33 = vld [vmem:[#allocation5 + $0x170] sm:$0xf0]  ;;  %v7894_v34 = vld [vmem:[#allocation5 + $0x1040] sm:$0xf]  ;;  %v8039_v37 = vor.u32 %v9060_v29, %v8038_v28  ;;  %v5867_v41 = vor.u32 %v8514_v30, %v5864_v31 }
  0xce   :  { %v9024_v35 = vld [vmem:[#allocation5 + $0x104c] sm:$0xf0]  ;;  %v8022_v38 = vld [vmem:[#allocation5 + $0x1140] sm:$0xf]  ;;  %v8510_v40 = vld [vmem:[#allocation5 + $0x44] sm:$0xf]  ;;  %v5995_v42 = vor.u32 %v8546_v32, %v5992_v33 }
  0xcf   :  { %4092 = vmatpush.bf16.msra.mxu1 %v8071_v23  ;;  %4106 = vmatpush.bf16.msra.mxu2 %v5899_v4  ;;  %v9056_v39 = vld [vmem:[#allocation5 + $0x114c] sm:$0xf0]  ;;  %v5848_v43 = vld [vmem:[#allocation5 + $0x50] sm:$0xf0]  ;;  %v8542_v50 = vld [vmem:[#allocation5 + $0x144] sm:$0xf]  ;;  %v7895_v12 = vor.u32 %v9024_v35, %v7894_v34 }
  0xd0   :  { %4120 = vmatpush.bf16.msra.mxu3 %v6027_v10  ;;  %v5976_v51 = vld [vmem:[#allocation5 + $0x150] sm:$0xf0]  ;;  %v193_v54 = vld [vmem:[#allocation2 + $0xb0] sm:$0xf]  ;;  %v203_v62 = vld [vmem:[#allocation2 + $0xf8] sm:$0xf]  ;;  %v8023_v18 = vor.u32 %v9056_v39, %v8022_v38  ;;  %v5851_v19 = vor.u32 %v8510_v40, %v5848_v43 }
  0xd1   :  { %4079 = vmatpush.bf16.msra.mxu0 %v7927_v11  ;;  %v198_v59 = vld [vmem:[#allocation2 + $0xd4] sm:$0xf]  ;;  %v7878_v3 = vld [vmem:[#allocation5 + $0x1020] sm:$0xf]  ;;  %v9020_v45 = vld [vmem:[#allocation5 + $0x102c] sm:$0xf0]  ;;  %v5979_v23 = vor.u32 %v8542_v50, %v5976_v51 }
  0xd2   :  { %v208_v8 = vld [vmem:[#allocation2 + $0x11c] sm:$0xf]  ;;  %322 = vst [vmem:[#allocation1 + $0x20] ss:$4 sm:$0xff] %v193_v54  ;;  %v8006_v22 = vld [vmem:[#allocation5 + $0x1120] sm:$0xf]  ;;  %v7879_v15 = vor.u32 %v9020_v45, %v7878_v3 }
  0xd3   :  { %4093 = vmatpush.bf16.msra.mxu1 %v8055_v21  ;;  %4107 = vmatpush.bf16.msra.mxu2 %v5883_v26  ;;  %v9052_v13 = vld [vmem:[#allocation5 + $0x112c] sm:$0xf0]  ;;  %323 = vst [vmem:[#allocation1 + $0x21] ss:$4 sm:$0xff] %v198_v59  ;;  %v8506_v14 = vld [vmem:[#allocation5 + $0x24] sm:$0xf] }
  0xd4   :  { %4121 = vmatpush.bf16.msra.mxu3 %v6011_v27  ;;  %v5832_v46 = vld [vmem:[#allocation5 + $0x30] sm:$0xf0]  ;;  %324 = vst [vmem:[#allocation1 + $0x22] ss:$4 sm:$0xff] %v203_v62  ;;  %v8538_v4 = vld [vmem:[#allocation5 + $0x124] sm:$0xf]  ;;  %v8007_v16 = vor.u32 %v9052_v13, %v8006_v22 }
  0xd5   :  { %4080 = vmatpush.bf16.msra.mxu0 %v7911_v36  ;;  %v5960_v10 = vld [vmem:[#allocation5 + $0x130] sm:$0xf0]  ;;  %325 = vst [vmem:[#allocation1 + $0x23] ss:$4 sm:$0xff] %v208_v8  ;;  %v7862_v49 = vld [vmem:[#allocation5 + $0x1000] sm:$0xf]  ;;  %v5835_v11 = vor.u32 %v8506_v14, %v5832_v46 }
  0xd6   :  { %v9016_v5 = vld [vmem:[#allocation5 + $0x100c] sm:$0xf0]  ;;  %v7990_v17 = vld [vmem:[#allocation5 + $0x1100] sm:$0xf]  ;;  %v5963_v21 = vor.u32 %v8538_v4, %v5960_v10  ;;  %v8502_v24 = vld [vmem:[#allocation5 + $0x4] sm:$0xf] }
  0xd7   :  { %4094 = vmatpush.bf16.msra.mxu1 %v8039_v37  ;;  %4108 = vmatpush.bf16.msra.mxu2 %v5867_v41  ;;  %v9048_v20 = vld [vmem:[#allocation5 + $0x110c] sm:$0xf0]  ;;  %v5816_v25 = vld [vmem:[#allocation5 + $0x10] sm:$0xf0]  ;;  %v8534_v26 = vld [vmem:[#allocation5 + $0x104] sm:$0xf]  ;;  %v7863_v33 = vor.u32 %v9016_v5, %v7862_v49 }
  0xd8   :  { %4122 = vmatpush.bf16.msra.mxu3 %v5995_v42  ;;  %v5944_v27 = vld [vmem:[#allocation5 + $0x110] sm:$0xf0]  ;;  %v8594_v28 = vld [vmem:[#allocation5 + $0x2e4] sm:$0xf]  ;;  %v7991_v34 = vor.u32 %v9048_v20, %v7990_v17  ;;  %v5819_v38 = vor.u32 %v8502_v24, %v5816_v25 }
  0xd9   :  { %4081 = vmatpush.bf16.msra.mxu0 %v7895_v12  ;;  %v6184_v29 = vld [vmem:[#allocation5 + $0x2f0] sm:$0xf0]  ;;  %v8626_v30 = vld [vmem:[#allocation5 + $0x3e4] sm:$0xf]  ;;  %v5947_v39 = vor.u32 %v8534_v26, %v5944_v27 }
  0xda   :  { %v6312_v31 = vld [vmem:[#allocation5 + $0x3f0] sm:$0xf0]  ;;  %v8658_v32 = vld [vmem:[#allocation5 + $0x4e4] sm:$0xf]  ;;  %v6187_v42 = vor.u32 %v8594_v28, %v6184_v29 }
  0xdb   :  { %4095 = vmatpush.bf16.msra.mxu1 %v8023_v18  ;;  %4109 = vmatpush.bf16.msra.mxu2 %v5851_v19  ;;  %v6440_v35 = vld [vmem:[#allocation5 + $0x4f0] sm:$0xf0]  ;;  %v8690_v36 = vld [vmem:[#allocation5 + $0x5e4] sm:$0xf]  ;;  %v6315_v43 = vor.u32 %v8626_v30, %v6312_v31 }
  0xdc   :  { %4123 = vmatpush.bf16.msra.mxu3 %v5979_v23  ;;  %v6568_v37 = vld [vmem:[#allocation5 + $0x5f0] sm:$0xf0]  ;;  %v330_v40 = vld.sshfl [vmem:[#allocation1 + $0x20] sm:$0xff pattern:$0x73625140]  ;;  %v6443_v54 = vor.u32 %v8658_v32, %v6440_v35 }
  0xdd   :  { %4082 = vmatpush.bf16.msra.mxu0 %v7879_v15  ;;  %v331_v41 = vld.sshfl [vmem:[#allocation1 + $0x28] sm:$0xff pattern:$0x73625140]  ;;  %v6168_v51 = vld [vmem:[#allocation5 + $0x2d0] sm:$0xf0]  ;;  %v6571_v59 = vor.u32 %v8690_v36, %v6568_v37  ;;  %v9699_v8 = vpack.c.bf16 %v330_v40, %v9646_v60 }
  0xde   :  { %v8590_v50 = vld [vmem:[#allocation5 + $0x2c4] sm:$0xf]  ;;  %v6296_v3 = vld [vmem:[#allocation5 + $0x3d0] sm:$0xf0]  ;;  %v9702_v12 = vpack.c.bf16 %v331_v41, %v9648_v61 }
  0xdf   :  { %4096 = vmatpush.bf16.msra.mxu1 %v8007_v16  ;;  %4110 = vmatpush.bf16.msra.mxu2 %v5835_v11  ;;  %v8622_v62 = vld [vmem:[#allocation5 + $0x3c4] sm:$0xf]  ;;  %v6424_v18 = vld [vmem:[#allocation5 + $0x4d0] sm:$0xf0]  ;;  %v6171_v19 = vor.u32 %v8590_v50, %v6168_v51 }
  0xe0   :  { %4124 = vmatpush.bf16.msra.mxu3 %v5963_v21  ;;  %v8654_v45 = vld [vmem:[#allocation5 + $0x4c4] sm:$0xf]  ;;  %v6552_v13 = vld [vmem:[#allocation5 + $0x5d0] sm:$0xf0]  ;;  %v6299_v23 = vor.u32 %v8622_v62, %v6296_v3 }
  0xe1   :  { %4083 = vmatpush.bf16.msra.mxu0 %v7863_v33  ;;  %v8686_v22 = vld [vmem:[#allocation5 + $0x5c4] sm:$0xf]  ;;  %v6152_v46 = vld [vmem:[#allocation5 + $0x2b0] sm:$0xf0]  ;;  %v6427_v4 = vor.u32 %v8654_v45, %v6424_v18 }
  0xe2   :  { %v8586_v14 = vld [vmem:[#allocation5 + $0x2a4] sm:$0xf]  ;;  %v6555_v10 = vor.u32 %v8686_v22, %v6552_v13  ;;  %v6280_v49 = vld [vmem:[#allocation5 + $0x3b0] sm:$0xf0] }
  0xe3   :  { %4097 = vmatpush.bf16.msra.mxu1 %v7991_v34  ;;  %4111 = vmatpush.bf16.msra.mxu2 %v5819_v38  ;;  %v8618_v60 = vld [vmem:[#allocation5 + $0x3a4] sm:$0xf]  ;;  %v6408_v61 = vld [vmem:[#allocation5 + $0x4b0] sm:$0xf0]  ;;  %v6155_v17 = vor.u32 %v8586_v14, %v6152_v46 }
  0xe4   :  { %4125 = vmatpush.bf16.msra.mxu3 %v5947_v39  ;;  %v8650_v15 = vld [vmem:[#allocation5 + $0x4a4] sm:$0xf]  ;;  %4084 = vmatmul.bf16.vlgmr.msra.gmra.mxu0 %v9699_v8  ;;  %v6536_v5 = vld [vmem:[#allocation5 + $0x5b0] sm:$0xf0]  ;;  %v6283_v20 = vor.u32 %v8618_v60, %v6280_v49 }
  0xe5   :  { %4132 = vmatpush.bf16.msrb.mxu0 %v6187_v42  ;;  %v8682_v16 = vld [vmem:[#allocation5 + $0x5a4] sm:$0xf]  ;;  %v6136_v21 = vld [vmem:[#allocation5 + $0x290] sm:$0xf0]  ;;  %v6411_v24 = vor.u32 %v8650_v15, %v6408_v61 }
  0xe6   :  { %4098 = vmatmul.bf16.vlgmr.msra.gmra.mxu1 %v9702_v12  ;;  %4112 = vmatmul.bf16.vlgmr.msra.gmra.mxu2 %v9626_v44  ;;  %v8582_v11 = vld [vmem:[#allocation5 + $0x284] sm:$0xf]  ;;  %v6539_v25 = vor.u32 %v8682_v16, %v6536_v5  ;;  %v6264_v27 = vld [vmem:[#allocation5 + $0x390] sm:$0xf0] }
  0xe7   :  { %4146 = vmatpush.bf16.msrb.mxu1 %v6315_v43  ;;  %4160 = vmatpush.bf16.msrb.mxu2 %v6443_v54  ;;  %v8614_v26 = vld [vmem:[#allocation5 + $0x384] sm:$0xf]  ;;  %v6392_v29 = vld [vmem:[#allocation5 + $0x490] sm:$0xf0]  ;;  %v6139_v32 = vor.u32 %v8582_v11, %v6136_v21 }
  0xe8   :  { %4174 = vmatpush.bf16.msrb.mxu3 %v6571_v59  ;;  %v8646_v28 = vld [vmem:[#allocation5 + $0x484] sm:$0xf]  ;;  %v6520_v31 = vld [vmem:[#allocation5 + $0x590] sm:$0xf0]  ;;  %v6267_v33 = vor.u32 %v8614_v26, %v6264_v27 }
  0xe9   :  { %4126 = vmatmul.bf16.vlgmr.msra.gmra.mxu3 %v9630_v55  ;;  %4133 = vmatpush.bf16.msrb.mxu0 %v6171_v19  ;;  %v8678_v30 = vld [vmem:[#allocation5 + $0x584] sm:$0xf]  ;;  %v6120_v35 = vld [vmem:[#allocation5 + $0x270] sm:$0xf0]  ;;  %v6395_v36 = vor.u32 %v8646_v28, %v6392_v29 }
  0xea   :  { %v8578_v34 = vld [vmem:[#allocation5 + $0x264] sm:$0xf]  ;;  %v6523_v37 = vor.u32 %v8678_v30, %v6520_v31  ;;  %v6248_v39 = vld [vmem:[#allocation5 + $0x370] sm:$0xf0] }
  0xeb   :  { %4147 = vmatpush.bf16.msrb.mxu1 %v6299_v23  ;;  %4161 = vmatpush.bf16.msrb.mxu2 %v6427_v4  ;;  %v8610_v38 = vld [vmem:[#allocation5 + $0x364] sm:$0xf]  ;;  %v6376_v41 = vld [vmem:[#allocation5 + $0x470] sm:$0xf0]  ;;  %v6123_v50 = vor.u32 %v8578_v34, %v6120_v35 }
  0xec   :  { %4175 = vmatpush.bf16.msrb.mxu3 %v6555_v10  ;;  %v8642_v40 = vld [vmem:[#allocation5 + $0x464] sm:$0xf]  ;;  %v6504_v43 = vld [vmem:[#allocation5 + $0x570] sm:$0xf0]  ;;  %v6251_v51 = vor.u32 %v8610_v38, %v6248_v39 }
  0xed   :  { %4134 = vmatpush.bf16.msrb.mxu0 %v6155_v17  ;;  %v8674_v42 = vld [vmem:[#allocation5 + $0x564] sm:$0xf]  ;;  %v6104_v59 = vld [vmem:[#allocation5 + $0x250] sm:$0xf0]  ;;  %v6379_v62 = vor.u32 %v8642_v40, %v6376_v41 }
  0xee   :  { %v8574_v54 = vld [vmem:[#allocation5 + $0x244] sm:$0xf]  ;;  %v6507_v3 = vor.u32 %v8674_v42, %v6504_v43  ;;  %v6232_v18 = vld [vmem:[#allocation5 + $0x350] sm:$0xf0] }
  0xef   :  { %4148 = vmatpush.bf16.msrb.mxu1 %v6283_v20  ;;  %4162 = vmatpush.bf16.msrb.mxu2 %v6411_v24  ;;  %v8606_v45 = vld [vmem:[#allocation5 + $0x344] sm:$0xf]  ;;  %v6360_v13 = vld [vmem:[#allocation5 + $0x450] sm:$0xf0]  ;;  %v6107_v14 = vor.u32 %v8574_v54, %v6104_v59  ;;  %v9708_v54 = vld [vmem:[#allocation7] sm:$0xf] }
  0xf0   :  { %4176 = vmatpush.bf16.msrb.mxu3 %v6539_v25  ;;  %v8638_v22 = vld [vmem:[#allocation5 + $0x444] sm:$0xf]  ;;  %v6488_v23 = vld [vmem:[#allocation5 + $0x550] sm:$0xf0]  ;;  %v6235_v46 = vor.u32 %v8606_v45, %v6232_v18 }
  0xf1   :  { %4135 = vmatpush.bf16.msrb.mxu0 %v6139_v32  ;;  %v8670_v19 = vld [vmem:[#allocation5 + $0x544] sm:$0xf]  ;;  %v6088_v10 = vld [vmem:[#allocation5 + $0x230] sm:$0xf0]  ;;  %v6363_v60 = vor.u32 %v8638_v22, %v6360_v13 }
  0xf2   :  { %v8570_v4 = vld [vmem:[#allocation5 + $0x224] sm:$0xf]  ;;  %v6491_v49 = vor.u32 %v8670_v19, %v6488_v23  ;;  %v6216_v61 = vld [vmem:[#allocation5 + $0x330] sm:$0xf0] }
  0xf3   :  { %4149 = vmatpush.bf16.msrb.mxu1 %v6267_v33  ;;  %4163 = vmatpush.bf16.msrb.mxu2 %v6395_v36  ;;  %v8602_v15 = vld [vmem:[#allocation5 + $0x324] sm:$0xf]  ;;  %v6344_v5 = vld [vmem:[#allocation5 + $0x430] sm:$0xf0]  ;;  %v6091_v21 = vor.u32 %v8570_v4, %v6088_v10  ;;  %v10044_v10 = vperm.slane %v9708_v54, 0 }
  0xf4   :  { %4177 = vmatpush.bf16.msrb.mxu3 %v6523_v37  ;;  %v8634_v16 = vld [vmem:[#allocation5 + $0x424] sm:$0xf]  ;;  %v6472_v20 = vld [vmem:[#allocation5 + $0x530] sm:$0xf0]  ;;  %v6219_v24 = vor.u32 %v8602_v15, %v6216_v61 }
  0xf5   :  { %4136 = vmatpush.bf16.msrb.mxu0 %v6123_v50  ;;  %v8666_v17 = vld [vmem:[#allocation5 + $0x524] sm:$0xf]  ;;  %v6072_v25 = vld [vmem:[#allocation5 + $0x210] sm:$0xf0]  ;;  %v6347_v28 = vor.u32 %v8634_v16, %v6344_v5 }
  0xf6   :  { %v8566_v11 = vld [vmem:[#allocation5 + $0x204] sm:$0xf]  ;;  %v6200_v27 = vld [vmem:[#allocation5 + $0x310] sm:$0xf0]  ;;  %v6475_v29 = vor.u32 %v8666_v17, %v6472_v20 }
  0xf7   :  { %4150 = vmatpush.bf16.msrb.mxu1 %v6251_v51  ;;  %4164 = vmatpush.bf16.msrb.mxu2 %v6379_v62  ;;  %v8598_v26 = vld [vmem:[#allocation5 + $0x304] sm:$0xf]  ;;  %v6328_v31 = vld [vmem:[#allocation5 + $0x410] sm:$0xf0]  ;;  %v6075_v39 = vor.u32 %v8566_v11, %v6072_v25 }
  0xf8   :  { %4178 = vmatpush.bf16.msrb.mxu3 %v6507_v3  ;;  %v8630_v30 = vld [vmem:[#allocation5 + $0x404] sm:$0xf]  ;;  %v6456_v33 = vld [vmem:[#allocation5 + $0x510] sm:$0xf0]  ;;  %v6203_v40 = vor.u32 %v8598_v26, %v6200_v27 }
  0xf9   :  { %4137 = vmatpush.bf16.msrb.mxu0 %v6107_v14  ;;  %v8662_v32 = vld [vmem:[#allocation5 + $0x504] sm:$0xf]  ;;  %v6696_v35 = vld [vmem:[#allocation5 + $0x6f0] sm:$0xf0]  ;;  %v6331_v50 = vor.u32 %v8630_v30, %v6328_v31 }
  0xfa   :  { %v8722_v34 = vld [vmem:[#allocation5 + $0x6e4] sm:$0xf]  ;;  %v6824_v37 = vld [vmem:[#allocation5 + $0x7f0] sm:$0xf0]  ;;  %v6459_v51 = vor.u32 %v8662_v32, %v6456_v33 }
  0xfb   :  { %4151 = vmatpush.bf16.msrb.mxu1 %v6235_v46  ;;  %4165 = vmatpush.bf16.msrb.mxu2 %v6363_v60  ;;  %v8754_v36 = vld [vmem:[#allocation5 + $0x7e4] sm:$0xf]  ;;  %v6952_v41 = vld [vmem:[#allocation5 + $0x8f0] sm:$0xf0]  ;;  %v6699_v59 = vor.u32 %v8722_v34, %v6696_v35 }
  0xfc   :  { %4179 = vmatpush.bf16.msrb.mxu3 %v6491_v49  ;;  %v8786_v38 = vld [vmem:[#allocation5 + $0x8e4] sm:$0xf]  ;;  %v7080_v43 = vld [vmem:[#allocation5 + $0x9f0] sm:$0xf0]  ;;  %v6827_v62 = vor.u32 %v8754_v36, %v6824_v37 }
  0xfd   :  { %4138 = vmatpush.bf16.msrb.mxu0 %v6091_v21  ;;  %v8818_v42 = vld [vmem:[#allocation5 + $0x9e4] sm:$0xf]  ;;  %v6680_v45 = vld [vmem:[#allocation5 + $0x6d0] sm:$0xf0]  ;;  %v6955_v18 = vor.u32 %v8786_v38, %v6952_v41  ;;  %v3861_v21 = vpop.f32.mrf.mxu0 }
  0xfe   :  { %v8718_v3 = vld [vmem:[#allocation5 + $0x6c4] sm:$0xf]  ;;  %v7083_v22 = vor.u32 %v8818_v42, %v7080_v43  ;;  %v6808_v19 = vld [vmem:[#allocation5 + $0x7d0] sm:$0xf0]  ;;  %v3862_v27 = vadd.f32 %v3861_v21, %v10044_v10  ;;  %v8561_v10 = vld [vmem:[#allocation5 + $0x1d4] sm:$0xf0] }
  0xff   :  { %4152 = vmatpush.bf16.msrb.mxu1 %v6219_v24  ;;  %4166 = vmatpush.bf16.msrb.mxu2 %v6347_v28  ;;  %v8750_v13 = vld [vmem:[#allocation5 + $0x7c4] sm:$0xf]  ;;  %v6936_v14 = vld [vmem:[#allocation5 + $0x8d0] sm:$0xf0]  ;;  %v6683_v60 = vor.u32 %v8718_v3, %v6680_v45  ;;  %v3875_v28 = vpop.f32.mrf.mxu1 }
 0x100   :  { %4180 = vmatpush.bf16.msrb.mxu3 %v6475_v29  ;;  %v8782_v23 = vld [vmem:[#allocation5 + $0x8c4] sm:$0xf]  ;;  %v7064_v4 = vld [vmem:[#allocation5 + $0x9d0] sm:$0xf0]  ;;  %v6811_v49 = vor.u32 %v8750_v13, %v6808_v19  ;;  %v3876_v33 = vadd.f32 %v3875_v28, %v3862_v27 }
 0x101   :  { %4139 = vmatpush.bf16.msrb.mxu0 %v6075_v39  ;;  %v8814_v46 = vld [vmem:[#allocation5 + $0x9c4] sm:$0xf]  ;;  %v6664_v61 = vld [vmem:[#allocation5 + $0x6b0] sm:$0xf0]  ;;  %v6939_v16 = vor.u32 %v8782_v23, %v6936_v14 }
 0x102   :  { %v8714_v15 = vld [vmem:[#allocation5 + $0x6a4] sm:$0xf]  ;;  %v7067_v5 = vor.u32 %v8814_v46, %v7064_v4  ;;  %v6792_v20 = vld [vmem:[#allocation5 + $0x7b0] sm:$0xf0] }
 0x103   :  { %4153 = vmatpush.bf16.msrb.mxu1 %v6203_v40  ;;  %4167 = vmatpush.bf16.msrb.mxu2 %v6331_v50  ;;  %v8746_v17 = vld [vmem:[#allocation5 + $0x7a4] sm:$0xf]  ;;  %v6920_v24 = vld [vmem:[#allocation5 + $0x8b0] sm:$0xf0]  ;;  %v6667_v29 = vor.u32 %v8714_v15, %v6664_v61  ;;  %v3889_v42 = vpop.f32.mrf.mxu2 }
 0x104   :  { %4181 = vmatpush.bf16.msrb.mxu3 %v6459_v51  ;;  %v8778_v11 = vld [vmem:[#allocation5 + $0x8a4] sm:$0xf]  ;;  %4140 = vmatmul.bf16.vlgmr.msrb.gmra.mxu0 %v9628_v47  ;;  %v7048_v26 = vld [vmem:[#allocation5 + $0x9b0] sm:$0xf0]  ;;  %v6795_v30 = vor.u32 %v8746_v17, %v6792_v20  ;;  %v3903_v19 = vpop.f32.mrf.mxu3 }
 0x105   :  { %4188 = vmatpush.bf16.msra.mxu0 %v6699_v59  ;;  %v8810_v25 = vld [vmem:[#allocation5 + $0x9a4] sm:$0xf]  ;;  %v6648_v32 = vld [vmem:[#allocation5 + $0x690] sm:$0xf0]  ;;  %v6923_v34 = vor.u32 %v8778_v11, %v6920_v24 }
 0x106   :  { %4168 = vmatmul.bf16.vlgmr.msrb.gmra.mxu2 %v9651_v57  ;;  %4154 = vmatmul.bf16.vlgmr.msrb.gmra.mxu1 %v9632_v56  ;;  %v8710_v31 = vld [vmem:[#allocation5 + $0x684] sm:$0xf]  ;;  %v7051_v35 = vor.u32 %v8810_v25, %v7048_v26  ;;  %v6776_v37 = vld [vmem:[#allocation5 + $0x790] sm:$0xf0] }
 0x107   :  { %4202 = vmatpush.bf16.msra.mxu1 %v6827_v62  ;;  %4216 = vmatpush.bf16.msra.mxu2 %v6955_v18  ;;  %v8742_v36 = vld [vmem:[#allocation5 + $0x784] sm:$0xf]  ;;  %v6904_v39 = vld [vmem:[#allocation5 + $0x890] sm:$0xf0]  ;;  %v6651_v43 = vor.u32 %v8710_v31, %v6648_v32  ;;  %v3890_v62 = vadd.f32 %v3889_v42, %v3876_v33 }
 0x108   :  { %4230 = vmatpush.bf16.msra.mxu3 %v7083_v22  ;;  %v8774_v38 = vld [vmem:[#allocation5 + $0x884] sm:$0xf]  ;;  %v7032_v41 = vld [vmem:[#allocation5 + $0x990] sm:$0xf0]  ;;  %v6779_v50 = vor.u32 %v8742_v36, %v6776_v37 }
 0x109   :  { %4182 = vmatmul.bf16.vlgmr.msrb.gmra.mxu3 %v9657_v6  ;;  %4189 = vmatpush.bf16.msra.mxu0 %v6683_v60  ;;  %v8806_v40 = vld [vmem:[#allocation5 + $0x984] sm:$0xf]  ;;  %v6632_v59 = vld [vmem:[#allocation5 + $0x670] sm:$0xf0]  ;;  %v6907_v3 = vor.u32 %v8774_v38, %v6904_v39  ;;  %v9717_v4 = vadd.f32 %v3903_v19, %v3890_v62  ;;  %v9719_v38 = vpop.f32.mrf.mxu0 }
 0x10a   :  { %v8706_v51 = vld [vmem:[#allocation5 + $0x664] sm:$0xf]  ;;  %v7035_v45 = vor.u32 %v8806_v40, %v7032_v41  ;;  %v6760_v22 = vld [vmem:[#allocation5 + $0x770] sm:$0xf0]  ;;  %v9721_v40 = vpop.f32.mrf.mxu1 }
 0x10b   :  { %4203 = vmatpush.bf16.msra.mxu1 %v6811_v49  ;;  %4217 = vmatpush.bf16.msra.mxu2 %v6939_v16  ;;  %v8738_v18 = vld [vmem:[#allocation5 + $0x764] sm:$0xf]  ;;  %v6888_v23 = vld [vmem:[#allocation5 + $0x870] sm:$0xf0]  ;;  %v6635_v60 = vor.u32 %v8706_v51, %v6632_v59 }
 0x10c   :  { %4231 = vmatpush.bf16.msra.mxu3 %v7067_v5  ;;  %v8770_v13 = vld [vmem:[#allocation5 + $0x864] sm:$0xf]  ;;  %v7016_v46 = vld [vmem:[#allocation5 + $0x970] sm:$0xf0]  ;;  %v6763_v49 = vor.u32 %v8738_v18, %v6760_v22 }
 0x10d   :  { %4190 = vmatpush.bf16.msra.mxu0 %v6667_v29  ;;  %v8802_v14 = vld [vmem:[#allocation5 + $0x964] sm:$0xf]  ;;  %v6616_v61 = vld [vmem:[#allocation5 + $0x650] sm:$0xf0]  ;;  %v6891_v16 = vor.u32 %v8770_v13, %v6888_v23 }
 0x10e   :  { %v8702_v15 = vld [vmem:[#allocation5 + $0x644] sm:$0xf]  ;;  %v7019_v5 = vor.u32 %v8802_v14, %v7016_v46  ;;  %v6744_v20 = vld [vmem:[#allocation5 + $0x750] sm:$0xf0] }
 0x10f   :  { %4204 = vmatpush.bf16.msra.mxu1 %v6795_v30  ;;  %4218 = vmatpush.bf16.msra.mxu2 %v6923_v34  ;;  %v8734_v17 = vld [vmem:[#allocation5 + $0x744] sm:$0xf]  ;;  %v6872_v21 = vld [vmem:[#allocation5 + $0x850] sm:$0xf0]  ;;  %v6619_v26 = vor.u32 %v8702_v15, %v6616_v61 }
 0x110   :  { %4232 = vmatpush.bf16.msra.mxu3 %v7051_v35  ;;  %v8766_v11 = vld [vmem:[#allocation5 + $0x844] sm:$0xf]  ;;  %v7000_v25 = vld [vmem:[#allocation5 + $0x950] sm:$0xf0]  ;;  %v6747_v27 = vor.u32 %v8734_v17, %v6744_v20 }
 0x111   :  { %4191 = vmatpush.bf16.msra.mxu0 %v6651_v43  ;;  %v8798_v24 = vld [vmem:[#allocation5 + $0x944] sm:$0xf]  ;;  %v6600_v29 = vld [vmem:[#allocation5 + $0x630] sm:$0xf0]  ;;  %v6875_v30 = vor.u32 %v8766_v11, %v6872_v21  ;;  %v9725_v11 = vpop.f32.mrf.mxu3 }
 0x112   :  { %v8698_v28 = vld [vmem:[#allocation5 + $0x624] sm:$0xf]  ;;  %v7003_v31 = vor.u32 %v8798_v24, %v7000_v25  ;;  %v6728_v33 = vld [vmem:[#allocation5 + $0x730] sm:$0xf0] }
 0x113   :  { %4205 = vmatpush.bf16.msra.mxu1 %v6779_v50  ;;  %4219 = vmatpush.bf16.msra.mxu2 %v6907_v3  ;;  %v8730_v32 = vld [vmem:[#allocation5 + $0x724] sm:$0xf]  ;;  %v6856_v35 = vld [vmem:[#allocation5 + $0x830] sm:$0xf0]  ;;  %v6603_v41 = vor.u32 %v8698_v28, %v6600_v29 }
 0x114   :  { %4233 = vmatpush.bf16.msra.mxu3 %v7035_v45  ;;  %v8762_v34 = vld [vmem:[#allocation5 + $0x824] sm:$0xf]  ;;  %v6984_v37 = vld [vmem:[#allocation5 + $0x930] sm:$0xf0]  ;;  %v6731_v42 = vor.u32 %v8730_v32, %v6728_v33 }
 0x115   :  { %4192 = vmatpush.bf16.msra.mxu0 %v6635_v60  ;;  %v8794_v36 = vld [vmem:[#allocation5 + $0x924] sm:$0xf]  ;;  %v6584_v43 = vld [vmem:[#allocation5 + $0x610] sm:$0xf0]  ;;  %v6859_v59 = vor.u32 %v8762_v34, %v6856_v35 }
 0x116   :  { %v8694_v39 = vld [vmem:[#allocation5 + $0x604] sm:$0xf]  ;;  %v6712_v51 = vld [vmem:[#allocation5 + $0x710] sm:$0xf0]  ;;  %v6987_v62 = vor.u32 %v8794_v36, %v6984_v37 }
 0x117   :  { %4206 = vmatpush.bf16.msra.mxu1 %v6763_v49  ;;  %4220 = vmatpush.bf16.msra.mxu2 %v6891_v16  ;;  %v8726_v50 = vld [vmem:[#allocation5 + $0x704] sm:$0xf]  ;;  %v6840_v45 = vld [vmem:[#allocation5 + $0x810] sm:$0xf0]  ;;  %v6587_v60 = vor.u32 %v8694_v39, %v6584_v43 }
 0x118   :  { %4234 = vmatpush.bf16.msra.mxu3 %v7019_v5  ;;  %v8758_v3 = vld [vmem:[#allocation5 + $0x804] sm:$0xf]  ;;  %v6968_v22 = vld [vmem:[#allocation5 + $0x910] sm:$0xf0]  ;;  %v6715_v49 = vor.u32 %v8726_v50, %v6712_v51  ;;  %v9723_v5 = vpop.f32.mrf.mxu2 }
 0x119   :  { %4193 = vmatpush.bf16.msra.mxu0 %v6619_v26  ;;  %v8790_v18 = vld [vmem:[#allocation5 + $0x904] sm:$0xf]  ;;  %v7208_v19 = vld [vmem:[#allocation5 + $0xaf0] sm:$0xf0]  ;;  %v6843_v17 = vor.u32 %v8758_v3, %v6840_v45 }
 0x11a   :  { %v8850_v13 = vld [vmem:[#allocation5 + $0xae4] sm:$0xf]  ;;  %v7336_v14 = vld [vmem:[#allocation5 + $0xbf0] sm:$0xf0]  ;;  %v6971_v20 = vor.u32 %v8790_v18, %v6968_v22 }
 0x11b   :  { %4207 = vmatpush.bf16.msra.mxu1 %v6747_v27  ;;  %4221 = vmatpush.bf16.msra.mxu2 %v6875_v30  ;;  %v8882_v23 = vld [vmem:[#allocation5 + $0xbe4] sm:$0xf]  ;;  %v7464_v15 = vld [vmem:[#allocation5 + $0xcf0] sm:$0xf0]  ;;  %v7211_v21 = vor.u32 %v8850_v13, %v7208_v19  ;;  %v3917_v35 = vpop.f32.mrf.mxu0 }
 0x11c   :  { %4235 = vmatpush.bf16.msra.mxu3 %v7003_v31  ;;  %v8914_v46 = vld [vmem:[#allocation5 + $0xce4] sm:$0xf]  ;;  %v7592_v16 = vld [vmem:[#allocation5 + $0xdf0] sm:$0xf0]  ;;  %v7339_v24 = vor.u32 %v8882_v23, %v7336_v14  ;;  %v3918_v36 = vadd.f32 %v3917_v35, %v9717_v4 }
 0x11d   :  { %4194 = vmatpush.bf16.msra.mxu0 %v6603_v41  ;;  %v8946_v61 = vld [vmem:[#allocation5 + $0xde4] sm:$0xf]  ;;  %v7192_v26 = vld [vmem:[#allocation5 + $0xad0] sm:$0xf0]  ;;  %v7467_v27 = vor.u32 %v8914_v46, %v7464_v15 }
 0x11e   :  { %v8846_v25 = vld [vmem:[#allocation5 + $0xac4] sm:$0xf]  ;;  %v7595_v28 = vor.u32 %v8946_v61, %v7592_v16  ;;  %v7320_v30 = vld [vmem:[#allocation5 + $0xbd0] sm:$0xf0] }
 0x11f   :  { %4208 = vmatpush.bf16.msra.mxu1 %v6731_v42  ;;  %4222 = vmatpush.bf16.msra.mxu2 %v6859_v59  ;;  %v8878_v29 = vld [vmem:[#allocation5 + $0xbc4] sm:$0xf]  ;;  %v7448_v32 = vld [vmem:[#allocation5 + $0xcd0] sm:$0xf0]  ;;  %v3931_v37 = vpop.f32.mrf.mxu1  ;;  %v7195_v39 = vor.u32 %v8846_v25, %v7192_v26 }
 0x120   :  { %4236 = vmatpush.bf16.msra.mxu3 %v6987_v62  ;;  %v8910_v31 = vld [vmem:[#allocation5 + $0xcc4] sm:$0xf]  ;;  %v7576_v34 = vld [vmem:[#allocation5 + $0xdd0] sm:$0xf0]  ;;  %v7323_v41 = vor.u32 %v8878_v29, %v7320_v30  ;;  %v3932_v45 = vadd.f32 %v3931_v37, %v3918_v36 }
 0x121   :  { %4195 = vmatpush.bf16.msra.mxu0 %v6587_v60  ;;  %v8942_v33 = vld [vmem:[#allocation5 + $0xdc4] sm:$0xf]  ;;  %v7176_v43 = vld [vmem:[#allocation5 + $0xab0] sm:$0xf0]  ;;  %v7451_v50 = vor.u32 %v8910_v31, %v7448_v32 }
 0x122   :  { %v8842_v42 = vld [vmem:[#allocation5 + $0xaa4] sm:$0xf]  ;;  %v7579_v51 = vor.u32 %v8942_v33, %v7576_v34  ;;  %v7304_v62 = vld [vmem:[#allocation5 + $0xbb0] sm:$0xf0]  ;;  %v3945_v46 = vpop.f32.mrf.mxu2 }
 0x123   :  { %4209 = vmatpush.bf16.msra.mxu1 %v6715_v49  ;;  %4223 = vmatpush.bf16.msra.mxu2 %v6843_v17  ;;  %v8874_v59 = vld [vmem:[#allocation5 + $0xba4] sm:$0xf]  ;;  %v7432_v4 = vld [vmem:[#allocation5 + $0xcb0] sm:$0xf0]  ;;  %v7179_v13 = vor.u32 %v8842_v42, %v7176_v43  ;;  %v3946_v17 = vadd.f32 %v3945_v46, %v3932_v45  ;;  %v9732_v26 = vpop.f32.mrf.mxu0 }
 0x124   :  { %4237 = vmatpush.bf16.msra.mxu3 %v6971_v20  ;;  %v8906_v3 = vld [vmem:[#allocation5 + $0xca4] sm:$0xf]  ;;  %4196 = vmatmul.bf16.vlgmr.msra.gmra.mxu0 %v9654_v58  ;;  %v7560_v22 = vld [vmem:[#allocation5 + $0xdb0] sm:$0xf0]  ;;  %v7307_v19 = vor.u32 %v8874_v59, %v7304_v62  ;;  %v3959_v20 = vpop.f32.mrf.mxu3  ;;  %10046 = vst [vmem:[#allocation28_spill] sm:$0xff] %v9732_v26 }
 0x125   :  { %4244 = vmatpush.bf16.msrb.mxu0 %v7211_v21  ;;  %v8938_v18 = vld [vmem:[#allocation5 + $0xda4] sm:$0xf]  ;;  %v7160_v14 = vld [vmem:[#allocation5 + $0xa90] sm:$0xf0]  ;;  %v7435_v60 = vor.u32 %v8906_v3, %v7432_v4  ;;  %v7710_v26 = vld [vmem:[#allocation5 + $0xec8] sm:$0xf] }
 0x126   :  { %4224 = vmatmul.bf16.vlgmr.msra.gmra.mxu2 %v9667_v1  ;;  %4210 = vmatmul.bf16.vlgmr.msra.gmra.mxu1 %v9660_v7  ;;  %v8838_v23 = vld [vmem:[#allocation5 + $0xa84] sm:$0xf]  ;;  %v7563_v49 = vor.u32 %v8938_v18, %v7560_v22  ;;  %v7288_v61 = vld [vmem:[#allocation5 + $0xb90] sm:$0xf0] }
 0x127   :  { %4258 = vmatpush.bf16.msrb.mxu1 %v7339_v24  ;;  %4272 = vmatpush.bf16.msrb.mxu2 %v7467_v27  ;;  %v8870_v15 = vld [vmem:[#allocation5 + $0xb84] sm:$0xf]  ;;  %v7416_v21 = vld [vmem:[#allocation5 + $0xc90] sm:$0xf0]  ;;  %v3960_v27 = vadd.f32 %v3959_v20, %v3946_v17  ;;  %v7163_v29 = vor.u32 %v8838_v23, %v7160_v14 }
 0x128   :  { %4286 = vmatpush.bf16.msrb.mxu3 %v7595_v28  ;;  %v8902_v16 = vld [vmem:[#allocation5 + $0xc84] sm:$0xf]  ;;  %v7544_v25 = vld [vmem:[#allocation5 + $0xd90] sm:$0xf0]  ;;  %v9734_v28 = vpop.f32.mrf.mxu1  ;;  %v7291_v30 = vor.u32 %v8870_v15, %v7288_v61 }
 0x129   :  { %4238 = vmatmul.bf16.vlgmr.msra.gmra.mxu3 %v9673_v9  ;;  %4245 = vmatpush.bf16.msrb.mxu0 %v7195_v39  ;;  %v8934_v24 = vld [vmem:[#allocation5 + $0xd84] sm:$0xf]  ;;  %10047 = vst [vmem:[#allocation29_spill] sm:$0xff] %v9734_v28  ;;  %v7144_v32 = vld [vmem:[#allocation5 + $0xa70] sm:$0xf0]  ;;  %v7419_v33 = vor.u32 %v8902_v16, %v7416_v21 }
 0x12a   :  { %v8834_v31 = vld [vmem:[#allocation5 + $0xa64] sm:$0xf]  ;;  %v7547_v34 = vor.u32 %v8934_v24, %v7544_v25  ;;  %v7272_v36 = vld [vmem:[#allocation5 + $0xb70] sm:$0xf0]  ;;  %v9736_v62 = vpop.f32.mrf.mxu2  ;;  %v8945_v28 = vld [vmem:[#allocation5 + $0xdd4] sm:$0xf0] }
 0x12b   :  { %4259 = vmatpush.bf16.msrb.mxu1 %v7323_v41  ;;  %4273 = vmatpush.bf16.msrb.mxu2 %v7451_v50  ;;  %v8866_v35 = vld [vmem:[#allocation5 + $0xb64] sm:$0xf]  ;;  %v7400_v39 = vld [vmem:[#allocation5 + $0xc70] sm:$0xf0]  ;;  %v7147_v43 = vor.u32 %v8834_v31, %v7144_v32  ;;  %10048 = vst [vmem:[#allocation30_spill] sm:$0xff] %v9736_v62  ;;  %v3973_v46 = vpop.f32.mrf.mxu0 }
 0x12c   :  { %4287 = vmatpush.bf16.msrb.mxu3 %v7579_v51  ;;  %v8898_v37 = vld [vmem:[#allocation5 + $0xc64] sm:$0xf]  ;;  %v7528_v42 = vld [vmem:[#allocation5 + $0xd70] sm:$0xf0]  ;;  %v7275_v50 = vor.u32 %v8866_v35, %v7272_v36  ;;  %v7582_v62 = vld [vmem:[#allocation5 + $0xdc8] sm:$0xf] }
 0x12d   :  { %4246 = vmatpush.bf16.msrb.mxu0 %v7179_v13  ;;  %v8930_v41 = vld [vmem:[#allocation5 + $0xd64] sm:$0xf]  ;;  %v7128_v59 = vld [vmem:[#allocation5 + $0xa50] sm:$0xf0]  ;;  %v7403_v3 = vor.u32 %v8898_v37, %v7400_v39  ;;  %v9738_v13 = vpop.f32.mrf.mxu3 }
 0x12e   :  { %v8830_v51 = vld [vmem:[#allocation5 + $0xa44] sm:$0xf]  ;;  %v7531_v45 = vor.u32 %v8930_v41, %v7528_v42  ;;  %v7256_v18 = vld [vmem:[#allocation5 + $0xb50] sm:$0xf0]  ;;  %10049 = vst [vmem:[#allocation31_spill] sm:$0xff] %v9738_v13 }
 0x12f   :  { %4260 = vmatpush.bf16.msrb.mxu1 %v7307_v19  ;;  %4274 = vmatpush.bf16.msrb.mxu2 %v7435_v60  ;;  %v8862_v4 = vld [vmem:[#allocation5 + $0xb44] sm:$0xf]  ;;  %v7384_v19 = vld [vmem:[#allocation5 + $0xc50] sm:$0xf0]  ;;  %v3974_v60 = vadd.f32 %v3973_v46, %v3960_v27  ;;  %v7131_v15 = vor.u32 %v8830_v51, %v7128_v59 }
 0x130   :  { %4288 = vmatpush.bf16.msrb.mxu3 %v7563_v49  ;;  %v8894_v22 = vld [vmem:[#allocation5 + $0xc44] sm:$0xf]  ;;  %v7512_v14 = vld [vmem:[#allocation5 + $0xd50] sm:$0xf0]  ;;  %v3987_v49 = vpop.f32.mrf.mxu1  ;;  %v7259_v61 = vor.u32 %v8862_v4, %v7256_v18 }
 0x131   :  { %4247 = vmatpush.bf16.msrb.mxu0 %v7163_v29  ;;  %v8926_v23 = vld [vmem:[#allocation5 + $0xd44] sm:$0xf]  ;;  %v7112_v17 = vld [vmem:[#allocation5 + $0xa30] sm:$0xf0]  ;;  %v7387_v20 = vor.u32 %v8894_v22, %v7384_v19 }
 0x132   :  { %v8826_v16 = vld [vmem:[#allocation5 + $0xa24] sm:$0xf]  ;;  %v7515_v21 = vor.u32 %v8926_v23, %v7512_v14  ;;  %v7240_v25 = vld [vmem:[#allocation5 + $0xb30] sm:$0xf0]  ;;  %v4001_v41 = vpop.f32.mrf.mxu2 }
 0x133   :  { %4261 = vmatpush.bf16.msrb.mxu1 %v7291_v30  ;;  %4275 = vmatpush.bf16.msrb.mxu2 %v7419_v33  ;;  %v8858_v24 = vld [vmem:[#allocation5 + $0xb24] sm:$0xf]  ;;  %v3988_v30 = vadd.f32 %v3987_v49, %v3974_v60  ;;  %v7368_v31 = vld [vmem:[#allocation5 + $0xc30] sm:$0xf0]  ;;  %v7115_v27 = vor.u32 %v8826_v16, %v7112_v17 }
 0x134   :  { %4289 = vmatpush.bf16.msrb.mxu3 %v7547_v34  ;;  %v8890_v29 = vld [vmem:[#allocation5 + $0xc24] sm:$0xf]  ;;  %v7496_v33 = vld [vmem:[#allocation5 + $0xd30] sm:$0xf0]  ;;  %v7243_v35 = vor.u32 %v8858_v24, %v7240_v25 }
 0x135   :  { %4248 = vmatpush.bf16.msrb.mxu0 %v7147_v43  ;;  %v8922_v32 = vld [vmem:[#allocation5 + $0xd24] sm:$0xf]  ;;  %v7096_v36 = vld [vmem:[#allocation5 + $0xa10] sm:$0xf0]  ;;  %v7371_v42 = vor.u32 %v8890_v29, %v7368_v31 }
 0x136   :  { %v8822_v34 = vld [vmem:[#allocation5 + $0xa04] sm:$0xf]  ;;  %v7224_v39 = vld [vmem:[#allocation5 + $0xb10] sm:$0xf0]  ;;  %v7499_v43 = vor.u32 %v8922_v32, %v7496_v33 }
 0x137   :  { %4262 = vmatpush.bf16.msrb.mxu1 %v7275_v50  ;;  %4276 = vmatpush.bf16.msrb.mxu2 %v7403_v3  ;;  %v8854_v37 = vld [vmem:[#allocation5 + $0xb04] sm:$0xf]  ;;  %v7352_v51 = vld [vmem:[#allocation5 + $0xc10] sm:$0xf0]  ;;  %v4002_v3 = vadd.f32 %v4001_v41, %v3988_v30  ;;  %v7099_v60 = vor.u32 %v8822_v34, %v7096_v36  ;;  %v9742_v36 = vpop.f32.mrf.mxu0 }
 0x138   :  { %4290 = vmatpush.bf16.msrb.mxu3 %v7531_v45  ;;  %v8886_v50 = vld [vmem:[#allocation5 + $0xc04] sm:$0xf]  ;;  %v4015_v45 = vpop.f32.mrf.mxu3  ;;  %v7480_v4 = vld [vmem:[#allocation5 + $0xd10] sm:$0xf0]  ;;  %v7227_v49 = vor.u32 %v8854_v37, %v7224_v39  ;;  %10050 = vst [vmem:[#allocation32_spill] sm:$0xff] %v9742_v36  ;;  %v9744_v37 = vpop.f32.mrf.mxu1 }
 0x139   :  { %4249 = vmatpush.bf16.msrb.mxu0 %v7131_v15  ;;  %v8918_v59 = vld [vmem:[#allocation5 + $0xd04] sm:$0xf]  ;;  %v7720_v22 = vld [vmem:[#allocation5 + $0xef0] sm:$0xf0]  ;;  %v9740_v46 = vadd.f32 %v4015_v45, %v4002_v3  ;;  %v7355_v17 = vor.u32 %v8886_v50, %v7352_v51  ;;  %10051 = vst [vmem:[#allocation33_spill] sm:$0xff] %v9744_v37 }
 0x13a   :  { %v8978_v18 = vld [vmem:[#allocation5 + $0xee4] sm:$0xf]  ;;  %v7848_v23 = vld [vmem:[#allocation5 + $0xff0] sm:$0xf0]  ;;  %v8817_v37 = vld [vmem:[#allocation5 + $0x9d4] sm:$0xf0] }
 0x13b   :  { %4263 = vmatpush.bf16.msrb.mxu1 %v7259_v61  ;;  %4277 = vmatpush.bf16.msrb.mxu2 %v7387_v20  ;;  %v9010_v19 = vld [vmem:[#allocation5 + $0xfe4] sm:$0xf]  ;;  %v7976_v15 = vld [vmem:[#allocation5 + $0x10f0] sm:$0xf0]  ;;  %v7483_v20 = vor.u32 %v8918_v59, %v7480_v4  ;;  %v7198_v36 = vld [vmem:[#allocation5 + $0xac8] sm:$0xf] }
 0x13c   :  { %4291 = vmatpush.bf16.msrb.mxu3 %v7515_v21  ;;  %v9042_v14 = vld [vmem:[#allocation5 + $0x10e4] sm:$0xf]  ;;  %v8104_v16 = vld [vmem:[#allocation5 + $0x11f0] sm:$0xf0]  ;;  %v7723_v21 = vor.u32 %v8978_v18, %v7720_v22  ;;  %v7851_v24 = vor.u32 %v9010_v19, %v7848_v23 }
 0x13d   :  { %4250 = vmatpush.bf16.msrb.mxu0 %v7115_v27  ;;  %v9074_v61 = vld [vmem:[#allocation5 + $0x11e4] sm:$0xf]  ;;  %v7704_v29 = vld [vmem:[#allocation5 + $0xed0] sm:$0xf0]  ;;  %v7979_v30 = vor.u32 %v9042_v14, %v7976_v15  ;;  %v9750_v15 = vpop.f32.mrf.mxu2 }
 0x13e   :  { %v8974_v25 = vld [vmem:[#allocation5 + $0xec4] sm:$0xf]  ;;  %v8107_v31 = vor.u32 %v9074_v61, %v8104_v16  ;;  %v7832_v33 = vld [vmem:[#allocation5 + $0xfd0] sm:$0xf0]  ;;  %10052 = vst [vmem:[#allocation34_spill] sm:$0xff] %v9750_v15 }
 0x13f   :  { %4264 = vmatpush.bf16.msrb.mxu1 %v7243_v35  ;;  %4278 = vmatpush.bf16.msrb.mxu2 %v7371_v42  ;;  %v9006_v32 = vld [vmem:[#allocation5 + $0xfc4] sm:$0xf]  ;;  %v7960_v34 = vld [vmem:[#allocation5 + $0x10d0] sm:$0xf0]  ;;  %v7707_v39 = vor.u32 %v8974_v25, %v7704_v29  ;;  %v6686_v15 = vld [vmem:[#allocation5 + $0x6c8] sm:$0xf] }
 0x140   :  { %4292 = vmatpush.bf16.msrb.mxu3 %v7499_v43  ;;  %v9038_v41 = vld [vmem:[#allocation5 + $0x10c4] sm:$0xf]  ;;  %v8088_v35 = vld [vmem:[#allocation5 + $0x11d0] sm:$0xf0]  ;;  %v7835_v42 = vor.u32 %v9006_v32, %v7832_v33 }
 0x141   :  { %4251 = vmatpush.bf16.msrb.mxu0 %v7099_v60  ;;  %v9070_v27 = vld [vmem:[#allocation5 + $0x11c4] sm:$0xf]  ;;  %v7688_v50 = vld [vmem:[#allocation5 + $0xeb0] sm:$0xf0]  ;;  %v7963_v51 = vor.u32 %v9038_v41, %v7960_v34 }
 0x142   :  { %v8970_v43 = vld [vmem:[#allocation5 + $0xea4] sm:$0xf]  ;;  %v8091_v59 = vor.u32 %v9070_v27, %v8088_v35  ;;  %v7816_v45 = vld [vmem:[#allocation5 + $0xfb0] sm:$0xf0] }
 0x143   :  { %4265 = vmatpush.bf16.msrb.mxu1 %v7227_v49  ;;  %4279 = vmatpush.bf16.msrb.mxu2 %v7355_v17  ;;  %v9002_v3 = vld [vmem:[#allocation5 + $0xfa4] sm:$0xf]  ;;  %v7944_v18 = vld [vmem:[#allocation5 + $0x10b0] sm:$0xf0]  ;;  %v7691_v23 = vor.u32 %v8970_v43, %v7688_v50 }
 0x144   :  { %4293 = vmatpush.bf16.msrb.mxu3 %v7483_v20  ;;  %v9034_v4 = vld [vmem:[#allocation5 + $0x10a4] sm:$0xf]  ;;  %4252 = vmatmul.bf16.vlgmr.msrb.gmra.mxu0 %v9670_v2  ;;  %v8072_v19 = vld [vmem:[#allocation5 + $0x11b0] sm:$0xf0]  ;;  %v7819_v14 = vor.u32 %v9002_v3, %v7816_v45 }
 0x145   :  { %4300 = vmatpush.bf16.msra.mxu0 %v7723_v21  ;;  %v9066_v22 = vld [vmem:[#allocation5 + $0x11a4] sm:$0xf]  ;;  %v7672_v49 = vld [vmem:[#allocation5 + $0xe90] sm:$0xf0]  ;;  %v7947_v61 = vor.u32 %v9034_v4, %v7944_v18 }
 0x146   :  { %4280 = vmatmul.bf16.vlgmr.msrb.gmra.mxu2 %v9683_v52  ;;  %4266 = vmatmul.bf16.vlgmr.msrb.gmra.mxu1 %v9676_v48  ;;  %v8966_v60 = vld [vmem:[#allocation5 + $0xe84] sm:$0xf]  ;;  %v8075_v16 = vor.u32 %v9066_v22, %v8072_v19  ;;  %v7800_v20 = vld [vmem:[#allocation5 + $0xf90] sm:$0xf0] }
 0x147   :  { %4314 = vmatpush.bf16.msra.mxu1 %v7851_v24  ;;  %4328 = vmatpush.bf16.msra.mxu2 %v7979_v30  ;;  %v8998_v17 = vld [vmem:[#allocation5 + $0xf84] sm:$0xf]  ;;  %v9752_v24 = vpop.f32.mrf.mxu3  ;;  %v7928_v25 = vld [vmem:[#allocation5 + $0x1090] sm:$0xf0]  ;;  %v7675_v33 = vor.u32 %v8966_v60, %v7672_v49  ;;  %v4043_v34 = vpop.f32.mrf.mxu1 }
 0x148   :  { %4342 = vmatpush.bf16.msra.mxu3 %v8107_v31  ;;  %v9030_v21 = vld [vmem:[#allocation5 + $0x1084] sm:$0xf]  ;;  %10053 = vst [vmem:[#allocation35_spill] sm:$0xff] %v9752_v24  ;;  %v8056_v30 = vld [vmem:[#allocation5 + $0x1190] sm:$0xf0]  ;;  %v4029_v31 = vpop.f32.mrf.mxu0  ;;  %v7803_v41 = vor.u32 %v8998_v17, %v7800_v20 }
 0x149   :  { %4294 = vmatmul.bf16.vlgmr.msrb.gmra.mxu3 %v9689_v63  ;;  %4301 = vmatpush.bf16.msra.mxu0 %v7707_v39  ;;  %v9062_v29 = vld [vmem:[#allocation5 + $0x1184] sm:$0xf]  ;;  %v4030_v32 = vadd.f32 %v4029_v31, %v9740_v46  ;;  %v7656_v35 = vld [vmem:[#allocation5 + $0xe70] sm:$0xf0]  ;;  %v7931_v39 = vor.u32 %v9030_v21, %v7928_v25  ;;  %v6174_v24 = vld [vmem:[#allocation5 + $0x2c8] sm:$0xf] }
 0x14a   :  { %v8962_v27 = vld [vmem:[#allocation5 + $0xe64] sm:$0xf]  ;;  %v7784_v50 = vld [vmem:[#allocation5 + $0xf70] sm:$0xf0] }
 0x14b   :  { %4315 = vmatpush.bf16.msra.mxu1 %v7835_v42  ;;  %4329 = vmatpush.bf16.msra.mxu2 %v7963_v51  ;;  %v8059_v42 = vor.u32 %v9062_v29, %v8056_v30  ;;  %v8994_v43 = vld [vmem:[#allocation5 + $0xf64] sm:$0xf]  ;;  %v7912_v3 = vld [vmem:[#allocation5 + $0x1070] sm:$0xf0]  ;;  %v7659_v18 = vor.u32 %v8962_v27, %v7656_v35 }
 0x14c   :  { %4343 = vmatpush.bf16.msra.mxu3 %v8091_v59  ;;  %v9026_v51 = vld [vmem:[#allocation5 + $0x1064] sm:$0xf]  ;;  %v4044_v59 = vadd.f32 %v4043_v34, %v4030_v32  ;;  %v8040_v4 = vld [vmem:[#allocation5 + $0x1170] sm:$0xf0]  ;;  %v7787_v46 = vor.u32 %v8994_v43, %v7784_v50  ;;  %v4057_v60 = vpop.f32.mrf.mxu2 }
 0x14d   :  { %4302 = vmatpush.bf16.msra.mxu0 %v7691_v23  ;;  %v9058_v45 = vld [vmem:[#allocation5 + $0x1164] sm:$0xf]  ;;  %v7640_v19 = vld [vmem:[#allocation5 + $0xe50] sm:$0xf0]  ;;  %v7915_v23 = vor.u32 %v9026_v51, %v7912_v3 }
 0x14e   :  { %v8958_v22 = vld [vmem:[#allocation5 + $0xe44] sm:$0xf]  ;;  %v4058_v17 = vadd.f32 %v4057_v60, %v4044_v59  ;;  %v7896_v21 = vld [vmem:[#allocation5 + $0x1050] sm:$0xf0] }
 0x14f   :  { %4316 = vmatpush.bf16.msra.mxu1 %v7819_v14  ;;  %4330 = vmatpush.bf16.msra.mxu2 %v7947_v61  ;;  %v8043_v14 = vor.u32 %v9058_v45, %v8040_v4  ;;  %v8990_v49 = vld [vmem:[#allocation5 + $0xf44] sm:$0xf]  ;;  %v7768_v61 = vld [vmem:[#allocation5 + $0xf50] sm:$0xf0]  ;;  %v4071_v20 = vpop.f32.mrf.mxu3  ;;  %v7643_v31 = vor.u32 %v8958_v22, %v7640_v19 }
 0x150   :  { %4344 = vmatpush.bf16.msra.mxu3 %v8075_v16  ;;  %v9022_v16 = vld [vmem:[#allocation5 + $0x1044] sm:$0xf]  ;;  %v8024_v29 = vld [vmem:[#allocation5 + $0x1150] sm:$0xf0]  ;;  %v9755_v30 = vadd.f32 %v4071_v20, %v4058_v17  ;;  %v7771_v32 = vor.u32 %v8990_v49, %v7768_v61  ;;  %v5934_v61 = vld [vmem:[#allocation5 + $0xe8] sm:$0xf] }
 0x151   :  { %4303 = vmatpush.bf16.msra.mxu0 %v7675_v33  ;;  %v9054_v25 = vld [vmem:[#allocation5 + $0x1144] sm:$0xf]  ;;  %v7899_v34 = vor.u32 %v9022_v16, %v7896_v21  ;;  %v7880_v43 = vld [vmem:[#allocation5 + $0x1030] sm:$0xf0]  ;;  %v8533_v16 = vld [vmem:[#allocation5 + $0xf4] sm:$0xf0] }
 0x152   :  { %v8954_v33 = vld [vmem:[#allocation5 + $0xe24] sm:$0xf]  ;;  %v8027_v27 = vor.u32 %v9054_v25, %v8024_v29  ;;  %v8008_v51 = vld [vmem:[#allocation5 + $0x1130] sm:$0xf0]  ;;  %v6062_v17 = vld [vmem:[#allocation5 + $0x1e8] sm:$0xf] }
 0x153   :  { %4317 = vmatpush.bf16.msra.mxu1 %v7803_v41  ;;  %4331 = vmatpush.bf16.msra.mxu2 %v7931_v39  ;;  %v7624_v41 = vld [vmem:[#allocation5 + $0xe30] sm:$0xf0]  ;;  %v8986_v35 = vld [vmem:[#allocation5 + $0xf24] sm:$0xf]  ;;  %v8565_v20 = vld [vmem:[#allocation5 + $0x1f4] sm:$0xf0] }
 0x154   :  { %4345 = vmatpush.bf16.msra.mxu3 %v8059_v42  ;;  %v7752_v39 = vld [vmem:[#allocation5 + $0xf30] sm:$0xf0]  ;;  %v9018_v42 = vld [vmem:[#allocation5 + $0x1024] sm:$0xf]  ;;  %v7627_v3 = vor.u32 %v8954_v33, %v7624_v41  ;;  %v6190_v21 = vld [vmem:[#allocation5 + $0x2e8] sm:$0xf] }
 0x155   :  { %4304 = vmatpush.bf16.msra.mxu0 %v7659_v18  ;;  %v9050_v50 = vld [vmem:[#allocation5 + $0x1124] sm:$0xf]  ;;  %v7755_v45 = vor.u32 %v8986_v35, %v7752_v39  ;;  %v7608_v4 = vld [vmem:[#allocation5 + $0xe10] sm:$0xf0]  ;;  %v7883_v22 = vor.u32 %v9018_v42, %v7880_v43  ;;  %v8629_v33 = vld [vmem:[#allocation5 + $0x3f4] sm:$0xf0]  ;;  %v6063_v35 = vor.u32 %v8565_v20, %v6062_v17 }
 0x156   :  { %v8950_v59 = vld [vmem:[#allocation5 + $0xe04] sm:$0xf]  ;;  %v8011_v19 = vor.u32 %v9050_v50, %v8008_v51  ;;  %v7992_v49 = vld [vmem:[#allocation5 + $0x1110] sm:$0xf0]  ;;  %v5918_v39 = vld [vmem:[#allocation5 + $0xc8] sm:$0xf] }
 0x157   :  { %4318 = vmatpush.bf16.msra.mxu1 %v7787_v46  ;;  %4332 = vmatpush.bf16.msra.mxu2 %v7915_v23  ;;  %v8982_v18 = vld [vmem:[#allocation5 + $0xf04] sm:$0xf]  ;;  %v7736_v46 = vld [vmem:[#allocation5 + $0xf10] sm:$0xf0]  ;;  %v7611_v25 = vor.u32 %v8950_v59, %v7608_v4  ;;  %v8529_v42 = vld [vmem:[#allocation5 + $0xd4] sm:$0xf0]  ;;  %v9757_v4 = vpop.f32.mrf.mxu0 }
 0x158   :  { %4346 = vmatpush.bf16.msra.mxu3 %v8043_v14  ;;  %v9014_v23 = vld [vmem:[#allocation5 + $0x1004] sm:$0xf]  ;;  %v7864_v14 = vld [vmem:[#allocation5 + $0x1010] sm:$0xf0]  ;;  %v7739_v29 = vor.u32 %v8982_v18, %v7736_v46  ;;  %v6046_v51 = vld [vmem:[#allocation5 + $0x1c8] sm:$0xf]  ;;  %v9759_v18 = vpop.f32.mrf.mxu1  ;;  %v5919_v46 = vor.u32 %v8529_v42, %v5918_v39 }
 0x159   :  { %4305 = vmatpush.bf16.msra.mxu0 %v7643_v31  ;;  %v9046_v60 = vld [vmem:[#allocation5 + $0x1104] sm:$0xf]  ;;  %v8597_v31 = vld [vmem:[#allocation5 + $0x2f4] sm:$0xf0]  ;;  %v7867_v41 = vor.u32 %v9014_v23, %v7864_v14  ;;  %10054 = vst [vmem:[#allocation36_spill] sm:$0xff] %v9757_v4 }
 0x15a   :  { %v6191_v43 = vor.u32 %v8597_v31, %v6190_v21  ;;  %v8593_v59 = vld [vmem:[#allocation5 + $0x2d4] sm:$0xf0]  ;;  %10055 = vst [vmem:[#allocation37_spill] sm:$0xff] %v9759_v18  ;;  %v6286_v20 = vld [vmem:[#allocation5 + $0x3a8] sm:$0xf] }
 0x15b   :  { %4319 = vmatpush.bf16.msra.mxu1 %v7771_v32  ;;  %4333 = vmatpush.bf16.msra.mxu2 %v7899_v34  ;;  %v6318_v32 = vld [vmem:[#allocation5 + $0x3e8] sm:$0xf]  ;;  %v7995_v34 = vor.u32 %v9046_v60, %v7992_v49  ;;  %v8525_v23 = vld [vmem:[#allocation5 + $0xb4] sm:$0xf0]  ;;  %v6175_v14 = vor.u32 %v8593_v59, %v6174_v24 }
 0x15c   :  { %4347 = vmatpush.bf16.msra.mxu3 %v8027_v27  ;;  %v5935_v27 = vor.u32 %v8533_v16, %v5934_v61  ;;  %v6319_v50 = vor.u32 %v8629_v33, %v6318_v32  ;;  %v6030_v49 = vld [vmem:[#allocation5 + $0x1a8] sm:$0xf]  ;;  %v8557_v61 = vld [vmem:[#allocation5 + $0x1b4] sm:$0xf0] }
 0x15d   :  { %4306 = vmatpush.bf16.msra.mxu0 %v7627_v3  ;;  %v6302_v3 = vld [vmem:[#allocation5 + $0x3c8] sm:$0xf]  ;;  %v8589_v17 = vld [vmem:[#allocation5 + $0x2b4] sm:$0xf0] }
 0x15e   :  { %v6158_v16 = vld [vmem:[#allocation5 + $0x2a8] sm:$0xf]  ;;  %v8621_v21 = vld [vmem:[#allocation5 + $0x3b4] sm:$0xf0] }
 0x15f   :  { %4320 = vmatpush.bf16.msra.mxu1 %v7755_v45  ;;  %4334 = vmatpush.bf16.msra.mxu2 %v7883_v22  ;;  %v8625_v45 = vld [vmem:[#allocation5 + $0x3d4] sm:$0xf0]  ;;  %v6047_v22 = vor.u32 %v8561_v10, %v6046_v51  ;;  %v5886_v24 = vld [vmem:[#allocation5 + $0x88] sm:$0xf]  ;;  %v6159_v31 = vor.u32 %v8589_v17, %v6158_v16  ;;  %v6287_v32 = vor.u32 %v8621_v21, %v6286_v20  ;;  %v9767_v51 = vpop.f32.mrf.mxu3  ;;  %v9772_v21 = vld [vmem:[#allocation7] sm:$0xf] }
 0x160   :  { %4348 = vmatpush.bf16.msra.mxu3 %v8011_v19  ;;  %v5902_v19 = vld [vmem:[#allocation5 + $0xa8] sm:$0xf]  ;;  %v6303_v60 = vor.u32 %v8625_v45, %v6302_v3  ;;  %v8617_v42 = vld [vmem:[#allocation5 + $0x394] sm:$0xf0]  ;;  %10057 = vst [vmem:[#allocation39_spill] sm:$0xff] %v9767_v51 }
 0x161   :  { %4307 = vmatpush.bf16.msra.mxu0 %v7611_v25  ;;  %v5903_v10 = vor.u32 %v8525_v23, %v5902_v19  ;;  %v6031_v25 = vor.u32 %v8557_v61, %v6030_v49  ;;  %v6014_v33 = vld [vmem:[#allocation5 + $0x188] sm:$0xf]  ;;  %v8581_v16 = vld [vmem:[#allocation5 + $0x274] sm:$0xf0] }
 0x162   :  { %v6270_v39 = vld [vmem:[#allocation5 + $0x388] sm:$0xf]  ;;  %v8613_v20 = vld [vmem:[#allocation5 + $0x374] sm:$0xf0] }
 0x163   :  { %4321 = vmatpush.bf16.msra.mxu1 %v7739_v29  ;;  %4335 = vmatpush.bf16.msra.mxu2 %v7867_v41  ;;  %v8521_v29 = vld [vmem:[#allocation5 + $0x94] sm:$0xf0]  ;;  %v6271_v23 = vor.u32 %v8617_v42, %v6270_v39  ;;  %v6126_v49 = vld [vmem:[#allocation5 + $0x268] sm:$0xf] }
 0x164   :  { %4349 = vmatpush.bf16.msra.mxu3 %v7995_v34  ;;  %4308 = vmatmul.bf16.vlgmr.msra.gmra.mxu0 %v9686_v53  ;;  %v8553_v41 = vld [vmem:[#allocation5 + $0x194] sm:$0xf0]  ;;  %v6142_v34 = vld [vmem:[#allocation5 + $0x288] sm:$0xf]  ;;  %v5887_v3 = vor.u32 %v8521_v29, %v5886_v24 }
 0x165   :  { %4356 = vmatpush.bf16.msrb.mxu0 %v5935_v27  ;;  %v9765_v27 = vpop.f32.mrf.mxu2  ;;  %v6015_v45 = vor.u32 %v8553_v41, %v6014_v33  ;;  %v6254_v17 = vld [vmem:[#allocation5 + $0x368] sm:$0xf]  ;;  %v8513_v29 = vld [vmem:[#allocation5 + $0x54] sm:$0xf0] }
 0x166   :  { %4336 = vmatmul.bf16.vlgmr.msra.gmra.mxu2 %v9699_v8  ;;  %4322 = vmatmul.bf16.vlgmr.msra.gmra.mxu1 %v9692_v0  ;;  %10056 = vst [vmem:[#allocation38_spill] sm:$0xff] %v9765_v27  ;;  %v5854_v24 = vld [vmem:[#allocation5 + $0x48] sm:$0xf]  ;;  %v8545_v41 = vld [vmem:[#allocation5 + $0x154] sm:$0xf0] }
 0x167   :  { %4370 = vmatpush.bf16.msrb.mxu1 %v6063_v35  ;;  %4384 = vmatpush.bf16.msrb.mxu2 %v6191_v43  ;;  %v8585_v35 = vld [vmem:[#allocation5 + $0x294] sm:$0xf0]  ;;  %v4085_v43 = vpop.f32.mrf.mxu0  ;;  %v5982_v33 = vld [vmem:[#allocation5 + $0x148] sm:$0xf] }
 0x168   :  { %4398 = vmatpush.bf16.msrb.mxu3 %v6319_v50  ;;  %v4099_v50 = vpop.f32.mrf.mxu1  ;;  %v4086_v59 = vadd.f32 %v4085_v43, %v9755_v30  ;;  %v6143_v19 = vor.u32 %v8585_v35, %v6142_v34  ;;  %v10045_v30 = vperm.slane %v9772_v21, 1  ;;  %v6110_v34 = vld [vmem:[#allocation5 + $0x248] sm:$0xf]  ;;  %v8577_v35 = vld [vmem:[#allocation5 + $0x254] sm:$0xf0] }
 0x169   :  { %4350 = vmatmul.bf16.vlgmr.msra.gmra.mxu3 %v9702_v12  ;;  %4357 = vmatpush.bf16.msrb.mxu0 %v5919_v46  ;;  %v5870_v46 = vld [vmem:[#allocation5 + $0x68] sm:$0xf]  ;;  %v8609_v42 = vld [vmem:[#allocation5 + $0x354] sm:$0xf0] }
 0x16a   :  { %v9770_v61 = vadd.f32 %v4099_v50, %v4086_v59  ;;  %v6238_v39 = vld [vmem:[#allocation5 + $0x348] sm:$0xf]  ;;  %v5855_v59 = vor.u32 %v8513_v29, %v5854_v24  ;;  %v8505_v24 = vld [vmem:[#allocation5 + $0x14] sm:$0xf0] }
 0x16b   :  { %4371 = vmatpush.bf16.msrb.mxu1 %v6047_v22  ;;  %4385 = vmatpush.bf16.msrb.mxu2 %v6175_v14  ;;  %v8517_v22 = vld [vmem:[#allocation5 + $0x74] sm:$0xf0]  ;;  %v5998_v14 = vld [vmem:[#allocation5 + $0x168] sm:$0xf] }
 0x16c   :  { %4399 = vmatpush.bf16.msrb.mxu3 %v6303_v60  ;;  %v8549_v60 = vld [vmem:[#allocation5 + $0x174] sm:$0xf0]  ;;  %10058 = vst [vmem:[#allocation40_spill] sm:$0xff] %v9770_v61  ;;  %v5950_v29 = vld [vmem:[#allocation5 + $0x108] sm:$0xf] }
 0x16d   :  { %4358 = vmatpush.bf16.msrb.mxu0 %v5903_v10  ;;  %v5871_v10 = vor.u32 %v8517_v22, %v5870_v46  ;;  %v4113_v43 = vpop.f32.mrf.mxu2  ;;  %v8509_v46 = vld [vmem:[#allocation5 + $0x34] sm:$0xf0]  ;;  %v4127_v22 = vpop.f32.mrf.mxu3  ;;  %v6702_v51 = vld [vmem:[#allocation5 + $0x6e8] sm:$0xf] }
 0x16e   :  { %v4114_v50 = vadd.f32 %v4113_v43, %v10045_v30  ;;  %v8605_v61 = vld [vmem:[#allocation5 + $0x334] sm:$0xf0]  ;;  %v5822_v43 = vld [vmem:[#allocation5 + $0x8] sm:$0xf] }
 0x16f   :  { %4372 = vmatpush.bf16.msrb.mxu1 %v6031_v25  ;;  %4386 = vmatpush.bf16.msrb.mxu2 %v6159_v31  ;;  %v5999_v25 = vor.u32 %v8549_v60, %v5998_v14  ;;  %v6127_v31 = vor.u32 %v8581_v16, %v6126_v49  ;;  %v5966_v14 = vld [vmem:[#allocation5 + $0x128] sm:$0xf]  ;;  %v8541_v60 = vld [vmem:[#allocation5 + $0x134] sm:$0xf0] }
 0x170   :  { %4400 = vmatpush.bf16.msrb.mxu3 %v6287_v32  ;;  %v6255_v32 = vor.u32 %v8613_v20, %v6254_v17  ;;  %v6094_v49 = vld [vmem:[#allocation5 + $0x228] sm:$0xf]  ;;  %v9777_v16 = vadd.f32 %v4127_v22, %v4114_v50  ;;  %v8573_v17 = vld [vmem:[#allocation5 + $0x234] sm:$0xf0] }
 0x171   :  { %4359 = vmatpush.bf16.msrb.mxu0 %v5887_v3  ;;  %v5983_v3 = vor.u32 %v8545_v41, %v5982_v33  ;;  %v6222_v20 = vld [vmem:[#allocation5 + $0x328] sm:$0xf]  ;;  %v8537_v33 = vld [vmem:[#allocation5 + $0x114] sm:$0xf0] }
 0x172   :  { %v6078_v41 = vld [vmem:[#allocation5 + $0x208] sm:$0xf]  ;;  %v8661_v50 = vld [vmem:[#allocation5 + $0x4f4] sm:$0xf0] }
 0x173   :  { %4373 = vmatpush.bf16.msrb.mxu1 %v6015_v45  ;;  %4387 = vmatpush.bf16.msrb.mxu2 %v6143_v19  ;;  %v5838_v45 = vld [vmem:[#allocation5 + $0x28] sm:$0xf]  ;;  %v6111_v19 = vor.u32 %v8577_v35, %v6110_v34  ;;  %v8569_v34 = vld [vmem:[#allocation5 + $0x214] sm:$0xf0] }
 0x174   :  { %4401 = vmatpush.bf16.msrb.mxu3 %v6271_v23  ;;  %v6239_v23 = vor.u32 %v8609_v42, %v6238_v39  ;;  %v6206_v35 = vld [vmem:[#allocation5 + $0x308] sm:$0xf]  ;;  %v8601_v39 = vld [vmem:[#allocation5 + $0x314] sm:$0xf0] }
 0x175   :  { %4360 = vmatpush.bf16.msrb.mxu0 %v5871_v10  ;;  %v5839_v10 = vor.u32 %v8509_v46, %v5838_v45  ;;  %v6446_v42 = vld [vmem:[#allocation5 + $0x4e8] sm:$0xf]  ;;  %v8693_v30 = vld [vmem:[#allocation5 + $0x5f4] sm:$0xf0] }
 0x176   :  { %v6574_v22 = vld [vmem:[#allocation5 + $0x5e8] sm:$0xf]  ;;  %v8725_v45 = vld [vmem:[#allocation5 + $0x6f4] sm:$0xf0] }
 0x177   :  { %4374 = vmatpush.bf16.msrb.mxu1 %v5999_v25  ;;  %4388 = vmatpush.bf16.msrb.mxu2 %v6127_v31  ;;  %v5967_v25 = vor.u32 %v8541_v60, %v5966_v14  ;;  %v6095_v31 = vor.u32 %v8573_v17, %v6094_v49  ;;  %v6830_v46 = vld [vmem:[#allocation5 + $0x7e8] sm:$0xf]  ;;  %v8757_v14 = vld [vmem:[#allocation5 + $0x7f4] sm:$0xf0]  ;;  %v6575_v60 = vor.u32 %v8693_v30, %v6574_v22 }
 0x178   :  { %4402 = vmatpush.bf16.msrb.mxu3 %v6255_v32  ;;  %v6223_v32 = vor.u32 %v8605_v61, %v6222_v20  ;;  %v6207_v61 = vor.u32 %v8601_v39, %v6206_v35  ;;  %v6430_v49 = vld [vmem:[#allocation5 + $0x4c8] sm:$0xf]  ;;  %v8657_v17 = vld [vmem:[#allocation5 + $0x4d4] sm:$0xf0]  ;;  %v6703_v20 = vor.u32 %v8725_v45, %v6702_v51  ;;  %v6831_v27 = vor.u32 %v8757_v14, %v6830_v46  ;;  %v9781_v51 = vpop.f32.mrf.mxu1  ;;  %v9789_v46 = vpop.f32.mrf.mxu3 }
 0x179   :  { %4361 = vmatpush.bf16.msrb.mxu0 %v5855_v59  ;;  %v5823_v59 = vor.u32 %v8505_v24, %v5822_v43  ;;  %v6558_v18 = vld [vmem:[#allocation5 + $0x5c8] sm:$0xf]  ;;  %v8689_v4 = vld [vmem:[#allocation5 + $0x5d4] sm:$0xf0]  ;;  %v9779_v24 = vpop.f32.mrf.mxu0  ;;  %10060 = vst [vmem:[#allocation42_spill] sm:$0xff] %v9781_v51 }
 0x17a   :  { %v8721_v43 = vld [vmem:[#allocation5 + $0x6d4] sm:$0xf0]  ;;  %10059 = vst [vmem:[#allocation41_spill] sm:$0xff] %v9779_v24  ;;  %v6559_v30 = vor.u32 %v8689_v4, %v6558_v18  ;;  %v6670_v39 = vld [vmem:[#allocation5 + $0x6a8] sm:$0xf] }
 0x17b   :  { %4375 = vmatpush.bf16.msrb.mxu1 %v5983_v3  ;;  %4389 = vmatpush.bf16.msrb.mxu2 %v6111_v19  ;;  %v5951_v3 = vor.u32 %v8537_v33, %v5950_v29  ;;  %v6079_v19 = vor.u32 %v8569_v34, %v6078_v41  ;;  %v6431_v29 = vor.u32 %v8657_v17, %v6430_v49  ;;  %v6414_v33 = vld [vmem:[#allocation5 + $0x4a8] sm:$0xf]  ;;  %v8685_v35 = vld [vmem:[#allocation5 + $0x5b4] sm:$0xf0] }
 0x17c   :  { %4403 = vmatpush.bf16.msrb.mxu3 %v6239_v23  ;;  %v6447_v23 = vor.u32 %v8661_v50, %v6446_v42  ;;  %v6542_v34 = vld [vmem:[#allocation5 + $0x5a8] sm:$0xf]  ;;  %v8717_v42 = vld [vmem:[#allocation5 + $0x6b4] sm:$0xf0] }
 0x17d   :  { %4362 = vmatpush.bf16.msrb.mxu0 %v5839_v10  ;;  %v6814_v10 = vld [vmem:[#allocation5 + $0x7c8] sm:$0xf]  ;;  %v8749_v22 = vld [vmem:[#allocation5 + $0x7b4] sm:$0xf0]  ;;  %v6543_v4 = vor.u32 %v8685_v35, %v6542_v34 }
 0x17e   :  { %v6798_v50 = vld [vmem:[#allocation5 + $0x7a8] sm:$0xf]  ;;  %v8745_v49 = vld [vmem:[#allocation5 + $0x794] sm:$0xf0] }
 0x17f   :  { %4376 = vmatpush.bf16.msrb.mxu1 %v5967_v25  ;;  %4390 = vmatpush.bf16.msrb.mxu2 %v6095_v31  ;;  %v8753_v25 = vld [vmem:[#allocation5 + $0x7d4] sm:$0xf0]  ;;  %v6398_v18 = vld [vmem:[#allocation5 + $0x488] sm:$0xf]  ;;  %v6799_v45 = vor.u32 %v8749_v22, %v6798_v50 }
 0x180   :  { %4404 = vmatpush.bf16.msrb.mxu3 %v6223_v32  ;;  %v8653_v31 = vld [vmem:[#allocation5 + $0x4b4] sm:$0xf0]  ;;  %v6687_v32 = vor.u32 %v8721_v43, %v6686_v15  ;;  %v6815_v41 = vor.u32 %v8753_v25, %v6814_v10  ;;  %v6526_v14 = vld [vmem:[#allocation5 + $0x588] sm:$0xf] }
 0x181   :  { %4363 = vmatpush.bf16.msrb.mxu0 %v5823_v59  ;;  %v9785_v59 = vpop.f32.mrf.mxu2  ;;  %v6415_v15 = vor.u32 %v8653_v31, %v6414_v33  ;;  %v4141_v17 = vpop.f32.mrf.mxu0  ;;  %v6382_v25 = vld [vmem:[#allocation5 + $0x468] sm:$0xf]  ;;  %v8741_v50 = vld [vmem:[#allocation5 + $0x774] sm:$0xf0] }
 0x182   :  { %v6638_v34 = vld [vmem:[#allocation5 + $0x668] sm:$0xf] }
 0x183   :  { %4377 = vmatpush.bf16.msrb.mxu1 %v5951_v3  ;;  %4391 = vmatpush.bf16.msrb.mxu2 %v6079_v19  ;;  %v6671_v3 = vor.u32 %v8717_v42, %v6670_v39  ;;  %v8681_v19 = vld [vmem:[#allocation5 + $0x594] sm:$0xf0]  ;;  %v4155_v31 = vpop.f32.mrf.mxu1  ;;  %v6766_v42 = vld [vmem:[#allocation5 + $0x768] sm:$0xf] }
 0x184   :  { %4405 = vmatpush.bf16.msrb.mxu3 %v6207_v61  ;;  %4364 = vmatmul.bf16.vlgmr.msrb.gmra.mxu0 %v9626_v44  ;;  %v6654_v61 = vld [vmem:[#allocation5 + $0x688] sm:$0xf]  ;;  %v6527_v10 = vor.u32 %v8681_v19, %v6526_v14  ;;  %v8709_v39 = vld [vmem:[#allocation5 + $0x674] sm:$0xf0] }
 0x185   :  { %4412 = vmatpush.bf16.msra.mxu0 %v6447_v23  ;;  %v8713_v23 = vld [vmem:[#allocation5 + $0x694] sm:$0xf0]  ;;  %v6622_v19 = vld [vmem:[#allocation5 + $0x648] sm:$0xf] }
 0x186   :  { %4392 = vmatmul.bf16.vlgmr.msrb.gmra.mxu2 %v9628_v47  ;;  %4378 = vmatmul.bf16.vlgmr.msrb.gmra.mxu1 %v9630_v55  ;;  %v8673_v14 = vld [vmem:[#allocation5 + $0x554] sm:$0xf0]  ;;  %v7070_v24 = vld [vmem:[#allocation5 + $0x9c8] sm:$0xf] }
 0x187   :  { %4426 = vmatpush.bf16.msra.mxu1 %v6575_v60  ;;  %4440 = vmatpush.bf16.msra.mxu2 %v6703_v20  ;;  %v6782_v60 = vld [vmem:[#allocation5 + $0x788] sm:$0xf]  ;;  %v4142_v20 = vadd.f32 %v4141_v17, %v9777_v16 }
 0x188   :  { %4454 = vmatpush.bf16.msra.mxu3 %v6831_v27  ;;  %v8649_v27 = vld [vmem:[#allocation5 + $0x494] sm:$0xf0]  ;;  %v6783_v33 = vor.u32 %v8745_v49, %v6782_v60  ;;  %v6750_v60 = vld [vmem:[#allocation5 + $0x748] sm:$0xf] }
 0x189   :  { %4406 = vmatmul.bf16.vlgmr.msrb.gmra.mxu3 %v9632_v56  ;;  %4413 = vmatpush.bf16.msra.mxu0 %v6431_v29  ;;  %v6399_v43 = vor.u32 %v8649_v27, %v6398_v18  ;;  %v8645_v29 = vld [vmem:[#allocation5 + $0x474] sm:$0xf0]  ;;  %v4156_v35 = vadd.f32 %v4155_v31, %v4142_v20  ;;  %v6639_v18 = vor.u32 %v8709_v39, %v6638_v34  ;;  %v6478_v31 = vld [vmem:[#allocation5 + $0x528] sm:$0xf] }
 0x18a   :  { %v6383_v22 = vor.u32 %v8645_v29, %v6382_v25  ;;  %v6767_v27 = vor.u32 %v8741_v50, %v6766_v42  ;;  %v8737_v49 = vld [vmem:[#allocation5 + $0x754] sm:$0xf0]  ;;  %v6350_v25 = vld [vmem:[#allocation5 + $0x428] sm:$0xf] }
 0x18b   :  { %4427 = vmatpush.bf16.msra.mxu1 %v6559_v30  ;;  %4441 = vmatpush.bf16.msra.mxu2 %v6687_v32  ;;  %v6655_v30 = vor.u32 %v8713_v23, %v6654_v61  ;;  %v6510_v32 = vld [vmem:[#allocation5 + $0x568] sm:$0xf]  ;;  %v8705_v23 = vld [vmem:[#allocation5 + $0x654] sm:$0xf0] }
 0x18c   :  { %4455 = vmatpush.bf16.msra.mxu3 %v6815_v41  ;;  %v8677_v41 = vld [vmem:[#allocation5 + $0x574] sm:$0xf0]  ;;  %v4183_v17 = vpop.f32.mrf.mxu3  ;;  %v6334_v42 = vld [vmem:[#allocation5 + $0x408] sm:$0xf] }
 0x18d   :  { %4414 = vmatpush.bf16.msra.mxu0 %v6415_v15  ;;  %v6511_v16 = vor.u32 %v8677_v41, %v6510_v32  ;;  %v6366_v15 = vld [vmem:[#allocation5 + $0x448] sm:$0xf]  ;;  %v8637_v29 = vld [vmem:[#allocation5 + $0x434] sm:$0xf0] }
 0x18e   :  { %v8669_v32 = vld [vmem:[#allocation5 + $0x534] sm:$0xf0]  ;;  %v6606_v41 = vld [vmem:[#allocation5 + $0x628] sm:$0xf]  ;;  %v6351_v50 = vor.u32 %v8637_v29, %v6350_v25 }
 0x18f   :  { %4428 = vmatpush.bf16.msra.mxu1 %v6543_v4  ;;  %4442 = vmatpush.bf16.msra.mxu2 %v6671_v3  ;;  %v8641_v4 = vld [vmem:[#allocation5 + $0x454] sm:$0xf0]  ;;  %v4169_v3 = vpop.f32.mrf.mxu2  ;;  %v7342_v29 = vld [vmem:[#allocation5 + $0xbe8] sm:$0xf] }
 0x190   :  { %4456 = vmatpush.bf16.msra.mxu3 %v6799_v45  ;;  %v6494_v45 = vld [vmem:[#allocation5 + $0x548] sm:$0xf]  ;;  %v4170_v61 = vadd.f32 %v4169_v3, %v4156_v35  ;;  %v8701_v34 = vld [vmem:[#allocation5 + $0x634] sm:$0xf0] }
 0x191   :  { %4415 = vmatpush.bf16.msra.mxu0 %v6399_v43  ;;  %v6367_v43 = vor.u32 %v8641_v4, %v6366_v15  ;;  %v6734_v35 = vld [vmem:[#allocation5 + $0x728] sm:$0xf]  ;;  %v8733_v39 = vld [vmem:[#allocation5 + $0x734] sm:$0xf0] }
 0x192   :  { %v9792_v20 = vadd.f32 %v4183_v17, %v4170_v61  ;;  %v6462_v15 = vld [vmem:[#allocation5 + $0x508] sm:$0xf]  ;;  %v8665_v4 = vld [vmem:[#allocation5 + $0x514] sm:$0xf0] }
 0x193   :  { %4429 = vmatpush.bf16.msra.mxu1 %v6527_v10  ;;  %4443 = vmatpush.bf16.msra.mxu2 %v6655_v30  ;;  %v6495_v10 = vor.u32 %v8673_v14, %v6494_v45  ;;  %v6623_v30 = vor.u32 %v8705_v23, %v6622_v19  ;;  %v6590_v3 = vld [vmem:[#allocation5 + $0x608] sm:$0xf]  ;;  %v8697_v45 = vld [vmem:[#allocation5 + $0x614] sm:$0xf0] }
 0x194   :  { %4457 = vmatpush.bf16.msra.mxu3 %v6783_v33  ;;  %v6751_v33 = vor.u32 %v8737_v49, %v6750_v60  ;;  %v6718_v14 = vld [vmem:[#allocation5 + $0x708] sm:$0xf]  ;;  %v8729_v19 = vld [vmem:[#allocation5 + $0x714] sm:$0xf0] }
 0x195   :  { %4416 = vmatpush.bf16.msra.mxu0 %v6383_v22  ;;  %v6479_v22 = vor.u32 %v8669_v32, %v6478_v31  ;;  %v6958_v61 = vld [vmem:[#allocation5 + $0x8e8] sm:$0xf]  ;;  %v8789_v23 = vld [vmem:[#allocation5 + $0x8f4] sm:$0xf0] }
 0x196   :  { %v7086_v60 = vld [vmem:[#allocation5 + $0x9e8] sm:$0xf]  ;;  %v8821_v49 = vld [vmem:[#allocation5 + $0x9f4] sm:$0xf0]  ;;  %v6959_v32 = vor.u32 %v8789_v23, %v6958_v61 }
 0x197   :  { %4430 = vmatpush.bf16.msra.mxu1 %v6511_v16  ;;  %4444 = vmatpush.bf16.msra.mxu2 %v6639_v18  ;;  %v8633_v16 = vld [vmem:[#allocation5 + $0x414] sm:$0xf0]  ;;  %v6607_v18 = vor.u32 %v8701_v34, %v6606_v41  ;;  %v7214_v17 = vld [vmem:[#allocation5 + $0xae8] sm:$0xf]  ;;  %v7087_v41 = vor.u32 %v8821_v49, %v7086_v60 }
 0x198   :  { %4458 = vmatpush.bf16.msra.mxu3 %v6767_v27  ;;  %v6735_v27 = vor.u32 %v8733_v39, %v6734_v35  ;;  %v8853_v25 = vld [vmem:[#allocation5 + $0xaf4] sm:$0xf0]  ;;  %v6942_v34 = vld [vmem:[#allocation5 + $0x8c8] sm:$0xf] }
 0x199   :  { %4417 = vmatpush.bf16.msra.mxu0 %v6367_v43  ;;  %v6335_v43 = vor.u32 %v8633_v16, %v6334_v42  ;;  %v8885_v31 = vld [vmem:[#allocation5 + $0xbf4] sm:$0xf0]  ;;  %v7215_v39 = vor.u32 %v8853_v25, %v7214_v17  ;;  %v9794_v16 = vpop.f32.mrf.mxu0  ;;  %v7182_v23 = vld [vmem:[#allocation5 + $0xaa8] sm:$0xf] }
 0x19a   :  { %v8785_v35 = vld [vmem:[#allocation5 + $0x8d4] sm:$0xf0]  ;;  %v7343_v51 = vor.u32 %v8885_v31, %v7342_v29  ;;  %v7310_v49 = vld [vmem:[#allocation5 + $0xba8] sm:$0xf] }
 0x19b   :  { %4431 = vmatpush.bf16.msra.mxu1 %v6495_v10  ;;  %4445 = vmatpush.bf16.msra.mxu2 %v6623_v30  ;;  %v6463_v10 = vor.u32 %v8665_v4, %v6462_v15  ;;  %v6591_v30 = vor.u32 %v8697_v45, %v6590_v3  ;;  %v8849_v42 = vld [vmem:[#allocation5 + $0xad4] sm:$0xf0]  ;;  %v9796_v15 = vpop.f32.mrf.mxu1  ;;  %v6943_v4 = vor.u32 %v8785_v35, %v6942_v34  ;;  %v7038_v29 = vld [vmem:[#allocation5 + $0x988] sm:$0xf] }
 0x19c   :  { %4459 = vmatpush.bf16.msra.mxu3 %v6751_v33  ;;  %v6719_v33 = vor.u32 %v8729_v19, %v6718_v14  ;;  %v8781_v3 = vld [vmem:[#allocation5 + $0x8b4] sm:$0xf0]  ;;  %v7199_v45 = vor.u32 %v8849_v42, %v7198_v36  ;;  %v7054_v19 = vld [vmem:[#allocation5 + $0x9a8] sm:$0xf] }
 0x19d   :  { %4418 = vmatpush.bf16.msra.mxu0 %v6351_v50  ;;  %v7326_v50 = vld [vmem:[#allocation5 + $0xbc8] sm:$0xf]  ;;  %v8813_v61 = vld [vmem:[#allocation5 + $0x9b4] sm:$0xf0] }
 0x19e   :  { %v8845_v60 = vld [vmem:[#allocation5 + $0xab4] sm:$0xf0]  ;;  %v6910_v36 = vld [vmem:[#allocation5 + $0x888] sm:$0xf] }
 0x19f   :  { %4432 = vmatpush.bf16.msra.mxu1 %v6479_v22  ;;  %4446 = vmatpush.bf16.msra.mxu2 %v6607_v18  ;;  %v8881_v22 = vld [vmem:[#allocation5 + $0xbd4] sm:$0xf0]  ;;  %v7071_v18 = vor.u32 %v8817_v37, %v7070_v24  ;;  %v7055_v24 = vor.u32 %v8813_v61, %v7054_v19  ;;  %v7150_v19 = vld [vmem:[#allocation5 + $0xa68] sm:$0xf] }
 0x1a0   :  { %4460 = vmatpush.bf16.msra.mxu3 %v6735_v27  ;;  %v6926_v27 = vld [vmem:[#allocation5 + $0x8a8] sm:$0xf]  ;;  %v7327_v14 = vor.u32 %v8881_v22, %v7326_v50  ;;  %v8877_v17 = vld [vmem:[#allocation5 + $0xbb4] sm:$0xf0] }
 0x1a1   :  { %4419 = vmatpush.bf16.msra.mxu0 %v6335_v43  ;;  %v6927_v37 = vor.u32 %v8781_v3, %v6926_v27  ;;  %v9802_v43 = vpop.f32.mrf.mxu2  ;;  %v7311_v25 = vor.u32 %v8877_v17, %v7310_v49  ;;  %v8809_v31 = vld [vmem:[#allocation5 + $0x994] sm:$0xf0]  ;;  %v4197_v35 = vpop.f32.mrf.mxu0 }
 0x1a2   :  { %v8873_v34 = vld [vmem:[#allocation5 + $0xb94] sm:$0xf0]  ;;  %v7039_v50 = vor.u32 %v8809_v31, %v7038_v29  ;;  %v7134_v31 = vld [vmem:[#allocation5 + $0xa48] sm:$0xf] }
 0x1a3   :  { %4433 = vmatpush.bf16.msra.mxu1 %v6463_v10  ;;  %4447 = vmatpush.bf16.msra.mxu2 %v6591_v30  ;;  %v7183_v10 = vor.u32 %v8845_v60, %v7182_v23  ;;  %v7166_v30 = vld [vmem:[#allocation5 + $0xa88] sm:$0xf]  ;;  %v4211_v22 = vpop.f32.mrf.mxu1  ;;  %v8837_v23 = vld [vmem:[#allocation5 + $0xa74] sm:$0xf0] }
 0x1a4   :  { %4461 = vmatpush.bf16.msra.mxu3 %v6719_v33  ;;  %4420 = vmatmul.bf16.vlgmr.msra.gmra.mxu0 %v9651_v57  ;;  %v9804_v33 = vpop.f32.mrf.mxu3  ;;  %v7278_v60 = vld [vmem:[#allocation5 + $0xb68] sm:$0xf]  ;;  %v8869_v49 = vld [vmem:[#allocation5 + $0xb74] sm:$0xf0] }
 0x1a5   :  { %4468 = vmatpush.bf16.msrb.mxu0 %v6959_v32  ;;  %v8841_v32 = vld [vmem:[#allocation5 + $0xa94] sm:$0xf0] }
 0x1a6   :  { %4448 = vmatmul.bf16.vlgmr.msra.gmra.mxu2 %v9654_v58  ;;  %4434 = vmatmul.bf16.vlgmr.msra.gmra.mxu1 %v9657_v6  ;;  %v7167_v27 = vor.u32 %v8841_v32, %v7166_v30  ;;  %v8801_v29 = vld [vmem:[#allocation5 + $0x954] sm:$0xf0] }
 0x1a7   :  { %4482 = vmatpush.bf16.msrb.mxu1 %v7087_v41  ;;  %4496 = vmatpush.bf16.msrb.mxu2 %v7215_v39  ;;  %v7294_v41 = vld [vmem:[#allocation5 + $0xb88] sm:$0xf]  ;;  %v4198_v39 = vadd.f32 %v4197_v35, %v9792_v20  ;;  %v8865_v35 = vld [vmem:[#allocation5 + $0xb54] sm:$0xf0] }
 0x1a8   :  { %4510 = vmatpush.bf16.msrb.mxu3 %v7343_v51  ;;  %v8777_v51 = vld [vmem:[#allocation5 + $0x894] sm:$0xf0]  ;;  %v7295_v3 = vor.u32 %v8873_v34, %v7294_v41  ;;  %v7262_v34 = vld [vmem:[#allocation5 + $0xb48] sm:$0xf] }
 0x1a9   :  { %4462 = vmatmul.bf16.vlgmr.msra.gmra.mxu3 %v9660_v7  ;;  %4469 = vmatpush.bf16.msrb.mxu0 %v6943_v4  ;;  %v6911_v42 = vor.u32 %v8777_v51, %v6910_v36  ;;  %v6894_v4 = vld [vmem:[#allocation5 + $0x868] sm:$0xf]  ;;  %v4212_v61 = vadd.f32 %v4211_v22, %v4198_v39  ;;  %v7151_v36 = vor.u32 %v8837_v23, %v7150_v19  ;;  %v8833_v41 = vld [vmem:[#allocation5 + $0xa54] sm:$0xf0] }
 0x1aa   :  { %v7279_v51 = vor.u32 %v8869_v49, %v7278_v60  ;;  %v6862_v22 = vld [vmem:[#allocation5 + $0x828] sm:$0xf]  ;;  %v8829_v19 = vld [vmem:[#allocation5 + $0xa34] sm:$0xf0] }
 0x1ab   :  { %4483 = vmatpush.bf16.msrb.mxu1 %v7071_v18  ;;  %4497 = vmatpush.bf16.msrb.mxu2 %v7199_v45  ;;  %v8773_v18 = vld [vmem:[#allocation5 + $0x874] sm:$0xf0]  ;;  %v7022_v45 = vld [vmem:[#allocation5 + $0x968] sm:$0xf] }
 0x1ac   :  { %4511 = vmatpush.bf16.msrb.mxu3 %v7327_v14  ;;  %v8805_v14 = vld [vmem:[#allocation5 + $0x974] sm:$0xf0]  ;;  %v6895_v17 = vor.u32 %v8773_v18, %v6894_v4  ;;  %v4239_v32 = vpop.f32.mrf.mxu3  ;;  %v7135_v18 = vor.u32 %v8833_v41, %v7134_v31  ;;  %v6846_v60 = vld [vmem:[#allocation5 + $0x808] sm:$0xf] }
 0x1ad   :  { %4470 = vmatpush.bf16.msrb.mxu0 %v6927_v37  ;;  %v7023_v20 = vor.u32 %v8805_v14, %v7022_v45  ;;  %v6878_v37 = vld [vmem:[#allocation5 + $0x848] sm:$0xf]  ;;  %v8765_v4 = vld [vmem:[#allocation5 + $0x834] sm:$0xf0] }
 0x1ae   :  { %v8797_v45 = vld [vmem:[#allocation5 + $0x934] sm:$0xf0]  ;;  %v7118_v14 = vld [vmem:[#allocation5 + $0xa28] sm:$0xf]  ;;  %v6863_v49 = vor.u32 %v8765_v4, %v6862_v22 }
 0x1af   :  { %4484 = vmatpush.bf16.msrb.mxu1 %v7055_v24  ;;  %4498 = vmatpush.bf16.msrb.mxu2 %v7183_v10  ;;  %v8769_v24 = vld [vmem:[#allocation5 + $0x854] sm:$0xf0]  ;;  %v4225_v10 = vpop.f32.mrf.mxu2  ;;  %v7598_v41 = vld [vmem:[#allocation5 + $0xde8] sm:$0xf] }
 0x1b0   :  { %4512 = vmatpush.bf16.msrb.mxu3 %v7311_v25  ;;  %v7006_v25 = vld [vmem:[#allocation5 + $0x948] sm:$0xf]  ;;  %v4226_v30 = vadd.f32 %v4225_v10, %v4212_v61  ;;  %v8861_v23 = vld [vmem:[#allocation5 + $0xb34] sm:$0xf0] }
 0x1b1   :  { %4471 = vmatpush.bf16.msrb.mxu0 %v6911_v42  ;;  %v6879_v42 = vor.u32 %v8769_v24, %v6878_v37  ;;  %v7246_v61 = vld [vmem:[#allocation5 + $0xb28] sm:$0xf]  ;;  %v8793_v24 = vld [vmem:[#allocation5 + $0x914] sm:$0xf0] }
 0x1b2   :  { %v9807_v39 = vadd.f32 %v4239_v32, %v4226_v30  ;;  %v6974_v37 = vld [vmem:[#allocation5 + $0x908] sm:$0xf]  ;;  %v8857_v31 = vld [vmem:[#allocation5 + $0xb14] sm:$0xf0] }
 0x1b3   :  { %4485 = vmatpush.bf16.msrb.mxu1 %v7039_v50  ;;  %4499 = vmatpush.bf16.msrb.mxu2 %v7167_v27  ;;  %v7007_v50 = vor.u32 %v8801_v29, %v7006_v25  ;;  %v7263_v27 = vor.u32 %v8865_v35, %v7262_v34  ;;  %v7102_v10 = vld [vmem:[#allocation5 + $0xa08] sm:$0xf]  ;;  %v8825_v25 = vld [vmem:[#allocation5 + $0xa14] sm:$0xf0] }
 0x1b4   :  { %4513 = vmatpush.bf16.msrb.mxu3 %v7295_v3  ;;  %v6990_v3 = vld [vmem:[#allocation5 + $0x928] sm:$0xf]  ;;  %v8917_v32 = vld [vmem:[#allocation5 + $0xcf4] sm:$0xf0] }
 0x1b5   :  { %4472 = vmatpush.bf16.msrb.mxu0 %v6895_v17  ;;  %v6991_v17 = vor.u32 %v8797_v45, %v6990_v3  ;;  %v7230_v29 = vld [vmem:[#allocation5 + $0xb08] sm:$0xf]  ;;  %v8949_v34 = vld [vmem:[#allocation5 + $0xdf4] sm:$0xf0] }
 0x1b6   :  { %v7470_v30 = vld [vmem:[#allocation5 + $0xce8] sm:$0xf]  ;;  %v8981_v22 = vld [vmem:[#allocation5 + $0xef4] sm:$0xf0] }
 0x1b7   :  { %4486 = vmatpush.bf16.msrb.mxu1 %v7023_v20  ;;  %4500 = vmatpush.bf16.msrb.mxu2 %v7151_v36  ;;  %v8761_v20 = vld [vmem:[#allocation5 + $0x814] sm:$0xf0]  ;;  %v7119_v36 = vor.u32 %v8829_v19, %v7118_v14  ;;  %v7726_v35 = vld [vmem:[#allocation5 + $0xee8] sm:$0xf]  ;;  %v7471_v45 = vor.u32 %v8917_v32, %v7470_v30  ;;  %v7599_v14 = vor.u32 %v8949_v34, %v7598_v41 }
 0x1b8   :  { %4514 = vmatpush.bf16.msrb.mxu3 %v7279_v51  ;;  %v7247_v51 = vor.u32 %v8861_v23, %v7246_v61  ;;  %v7854_v4 = vld [vmem:[#allocation5 + $0xfe8] sm:$0xf]  ;;  %v9013_v3 = vld [vmem:[#allocation5 + $0xff4] sm:$0xf0]  ;;  %v7727_v23 = vor.u32 %v8981_v22, %v7726_v35 }
 0x1b9   :  { %4473 = vmatpush.bf16.msrb.mxu0 %v6879_v42  ;;  %v6847_v42 = vor.u32 %v8761_v20, %v6846_v60  ;;  %v7454_v19 = vld [vmem:[#allocation5 + $0xcc8] sm:$0xf]  ;;  %v8913_v61 = vld [vmem:[#allocation5 + $0xcd4] sm:$0xf0]  ;;  %v7855_v13 = vor.u32 %v9013_v3, %v7854_v4  ;;  %v9809_v20 = vpop.f32.mrf.mxu0 }
 0x1ba   :  { %v8977_v60 = vld [vmem:[#allocation5 + $0xed4] sm:$0xf0]  ;;  %v7566_v32 = vld [vmem:[#allocation5 + $0xda8] sm:$0xf] }
 0x1bb   :  { %4487 = vmatpush.bf16.msrb.mxu1 %v7007_v50  ;;  %4501 = vmatpush.bf16.msrb.mxu2 %v7135_v18  ;;  %v6975_v50 = vor.u32 %v8793_v24, %v6974_v37  ;;  %v7103_v18 = vor.u32 %v8825_v25, %v7102_v10  ;;  %v9811_v37 = vpop.f32.mrf.mxu1  ;;  %v7455_v24 = vor.u32 %v8913_v61, %v7454_v19  ;;  %v8909_v10 = vld [vmem:[#allocation5 + $0xcb4] sm:$0xf0]  ;;  %v10061_v25 = vperm.slane %v9772_v21, 1  ;;  %v7694_v34 = vld [vmem:[#allocation5 + $0xea8] sm:$0xf] }
 0x1bc   :  { %4515 = vmatpush.bf16.msrb.mxu3 %v7263_v27  ;;  %v7231_v27 = vor.u32 %v8857_v31, %v7230_v29  ;;  %v7711_v31 = vor.u32 %v8977_v60, %v7710_v26  ;;  %v8941_v41 = vld [vmem:[#allocation5 + $0xdb4] sm:$0xf0]  ;;  %v7422_v26 = vld [vmem:[#allocation5 + $0xc88] sm:$0xf] }
 0x1bd   :  { %4474 = vmatpush.bf16.msrb.mxu0 %v6863_v49  ;;  %v7838_v49 = vld [vmem:[#allocation5 + $0xfc8] sm:$0xf]  ;;  %v4116_v29 = vadd.f32 %v9785_v59, %v10061_v25  ;;  %v8973_v35 = vld [vmem:[#allocation5 + $0xeb4] sm:$0xf0] }
 0x1be   :  { %v8905_v21 = vld [vmem:[#allocation5 + $0xc94] sm:$0xf0]  ;;  %v7695_v22 = vor.u32 %v8973_v35, %v7694_v34  ;;  %v7550_v3 = vld [vmem:[#allocation5 + $0xd88] sm:$0xf] }
 0x1bf   :  { %4488 = vmatpush.bf16.msrb.mxu1 %v6991_v17  ;;  %4502 = vmatpush.bf16.msrb.mxu2 %v7119_v36  ;;  %v9009_v17 = vld [vmem:[#allocation5 + $0xfd4] sm:$0xf0]  ;;  %v7583_v36 = vor.u32 %v8945_v28, %v7582_v62  ;;  %v4130_v59 = vadd.f32 %v9789_v46, %v4116_v29  ;;  %v7806_v19 = vld [vmem:[#allocation5 + $0xf88] sm:$0xf]  ;;  %v7423_v46 = vor.u32 %v8905_v21, %v7422_v26 }
 0x1c0   :  { %4516 = vmatpush.bf16.msrb.mxu3 %v7247_v51  ;;  %v7438_v51 = vld [vmem:[#allocation5 + $0xca8] sm:$0xf]  ;;  %v7839_v30 = vor.u32 %v9009_v17, %v7838_v49  ;;  %v9005_v28 = vld [vmem:[#allocation5 + $0xfb4] sm:$0xf0] }
 0x1c1   :  { %4475 = vmatpush.bf16.msrb.mxu0 %v6847_v42  ;;  %v7822_v42 = vld [vmem:[#allocation5 + $0xfa8] sm:$0xf]  ;;  %v7439_v62 = vor.u32 %v8909_v10, %v7438_v51  ;;  %v9001_v61 = vld [vmem:[#allocation5 + $0xf94] sm:$0xf0]  ;;  %v4144_v51 = vadd.f32 %v9794_v16, %v4130_v59 }
 0x1c2   :  { %v7823_v4 = vor.u32 %v9005_v28, %v7822_v42  ;;  %v7807_v25 = vor.u32 %v9001_v61, %v7806_v19  ;;  %v7534_v29 = vld [vmem:[#allocation5 + $0xd68] sm:$0xf]  ;;  %v8997_v35 = vld [vmem:[#allocation5 + $0xf74] sm:$0xf0] }
 0x1c3   :  { %4489 = vmatpush.bf16.msrb.mxu1 %v6975_v50  ;;  %4503 = vmatpush.bf16.msrb.mxu2 %v7103_v18  ;;  %v9821_v50 = vpop.f32.mrf.mxu2  ;;  %v8937_v18 = vld [vmem:[#allocation5 + $0xd94] sm:$0xf0]  ;;  %v4267_v17 = vpop.f32.mrf.mxu1  ;;  %v7790_v34 = vld [vmem:[#allocation5 + $0xf68] sm:$0xf] }
 0x1c4   :  { %4517 = vmatpush.bf16.msrb.mxu3 %v7231_v27  ;;  %4476 = vmatmul.bf16.vlgmr.msrb.gmra.mxu0 %v9667_v1  ;;  %v7678_v27 = vld [vmem:[#allocation5 + $0xe88] sm:$0xf]  ;;  %v7551_v49 = vor.u32 %v8937_v18, %v7550_v3  ;;  %v7791_v26 = vor.u32 %v8997_v35, %v7790_v34  ;;  %v8993_v19 = vld [vmem:[#allocation5 + $0xf54] sm:$0xf0] }
 0x1c5   :  { %4524 = vmatpush.bf16.msra.mxu0 %v7471_v45  ;;  %v9823_v45 = vpop.f32.mrf.mxu3  ;;  %v7390_v28 = vld [vmem:[#allocation5 + $0xc48] sm:$0xf]  ;;  %v8889_v34 = vld [vmem:[#allocation5 + $0xc14] sm:$0xf0] }
 0x1c6   :  { %4504 = vmatmul.bf16.vlgmr.msrb.gmra.mxu2 %v9670_v2  ;;  %4490 = vmatmul.bf16.vlgmr.msrb.gmra.mxu1 %v9673_v9  ;;  %v7518_v59 = vld [vmem:[#allocation5 + $0xd48] sm:$0xf] }
 0x1c7   :  { %4538 = vmatpush.bf16.msra.mxu1 %v7599_v14  ;;  %4552 = vmatpush.bf16.msra.mxu2 %v7727_v23  ;;  %v8969_v14 = vld [vmem:[#allocation5 + $0xe94] sm:$0xf0]  ;;  %v4253_v23 = vpop.f32.mrf.mxu0  ;;  %v7486_v35 = vld [vmem:[#allocation5 + $0xd08] sm:$0xf] }
 0x1c8   :  { %4566 = vmatpush.bf16.msra.mxu3 %v7855_v13  ;;  %v7567_v13 = vor.u32 %v8941_v41, %v7566_v32  ;;  %v4254_v60 = vadd.f32 %v4253_v23, %v9807_v39  ;;  %v7679_v10 = vor.u32 %v8969_v14, %v7678_v27  ;;  %v8965_v41 = vld [vmem:[#allocation5 + $0xe74] sm:$0xf0]  ;;  %v7774_v14 = vld [vmem:[#allocation5 + $0xf48] sm:$0xf] }
 0x1c9   :  { %4518 = vmatmul.bf16.vlgmr.msrb.gmra.mxu3 %v9676_v48  ;;  %4525 = vmatpush.bf16.msra.mxu0 %v7455_v24  ;;  %v7406_v24 = vld [vmem:[#allocation5 + $0xc68] sm:$0xf]  ;;  %v8961_v27 = vld [vmem:[#allocation5 + $0xe54] sm:$0xf0] }
 0x1ca   :  { %v4268_v32 = vadd.f32 %v4267_v17, %v4254_v60 }
 0x1cb   :  { %4539 = vmatpush.bf16.msra.mxu1 %v7583_v36  ;;  %4553 = vmatpush.bf16.msra.mxu2 %v7711_v31  ;;  %v8901_v36 = vld [vmem:[#allocation5 + $0xc74] sm:$0xf0]  ;;  %v4281_v21 = vpop.f32.mrf.mxu2 }
 0x1cc   :  { %4567 = vmatpush.bf16.msra.mxu3 %v7839_v30  ;;  %v8933_v31 = vld [vmem:[#allocation5 + $0xd74] sm:$0xf0]  ;;  %v7662_v30 = vld [vmem:[#allocation5 + $0xe68] sm:$0xf]  ;;  %v7407_v39 = vor.u32 %v8901_v36, %v7406_v24  ;;  %v4282_v3 = vadd.f32 %v4281_v21, %v4268_v32  ;;  %v7775_v24 = vor.u32 %v8993_v19, %v7774_v14  ;;  %v5936_v14 = vld [vmem:[#allocation5 + $0xf8] sm:$0xf0] }
 0x1cd   :  { %4526 = vmatpush.bf16.msra.mxu0 %v7439_v62  ;;  %v7535_v42 = vor.u32 %v8933_v31, %v7534_v29  ;;  %v8897_v62 = vld [vmem:[#allocation5 + $0xc54] sm:$0xf0]  ;;  %v7663_v16 = vor.u32 %v8965_v41, %v7662_v30  ;;  %v4295_v18 = vpop.f32.mrf.mxu3  ;;  %v7502_v36 = vld [vmem:[#allocation5 + $0xd28] sm:$0xf]  ;;  %v8563_v19 = vld [vmem:[#allocation5 + $0x1ec] sm:$0xf] }
 0x1ce   :  { %v9829_v23 = vadd.f32 %v4295_v18, %v4282_v3  ;;  %v7758_v29 = vld [vmem:[#allocation5 + $0xf28] sm:$0xf]  ;;  %v8989_v31 = vld [vmem:[#allocation5 + $0xf34] sm:$0xf0]  ;;  %v8531_v3 = vld [vmem:[#allocation5 + $0xec] sm:$0xf] }
 0x1cf   :  { %4540 = vmatpush.bf16.msra.mxu1 %v7567_v13  ;;  %4554 = vmatpush.bf16.msra.mxu2 %v7695_v22  ;;  %v4158_v13 = vadd.f32 %v9796_v15, %v4144_v51  ;;  %v8929_v22 = vld [vmem:[#allocation5 + $0xd54] sm:$0xf0]  ;;  %v7391_v15 = vor.u32 %v8897_v62, %v7390_v28  ;;  %v7358_v30 = vld [vmem:[#allocation5 + $0xc08] sm:$0xf]  ;;  %v7759_v28 = vor.u32 %v8989_v31, %v7758_v29  ;;  %v8527_v29 = vld [vmem:[#allocation5 + $0xcc] sm:$0xf] }
 0x1d0   :  { %4568 = vmatpush.bf16.msra.mxu3 %v7823_v4  ;;  %v7646_v4 = vld [vmem:[#allocation5 + $0xe48] sm:$0xf]  ;;  %v7519_v60 = vor.u32 %v8929_v22, %v7518_v59  ;;  %v8925_v51 = vld [vmem:[#allocation5 + $0xd34] sm:$0xf0]  ;;  %v7359_v18 = vor.u32 %v8889_v34, %v7358_v30  ;;  %v5920_v30 = vld [vmem:[#allocation5 + $0xd8] sm:$0xf0] }
 0x1d1   :  { %4527 = vmatpush.bf16.msra.mxu0 %v7423_v46  ;;  %v4172_v61 = vadd.f32 %v9802_v43, %v4158_v13  ;;  %v7374_v46 = vld [vmem:[#allocation5 + $0xc28] sm:$0xf]  ;;  %v7647_v17 = vor.u32 %v8961_v27, %v7646_v4  ;;  %v7503_v41 = vor.u32 %v8925_v51, %v7502_v36  ;;  %v8953_v13 = vld [vmem:[#allocation5 + $0xe14] sm:$0xf0]  ;;  %v5939_v36 = vor.u32 %v8531_v3, %v5936_v14 }
 0x1d2   :  { %v7614_v62 = vld [vmem:[#allocation5 + $0xe08] sm:$0xf]  ;;  %v8985_v21 = vld [vmem:[#allocation5 + $0xf14] sm:$0xf0] }
 0x1d3   :  { %4541 = vmatpush.bf16.msra.mxu1 %v7551_v49  ;;  %4555 = vmatpush.bf16.msra.mxu2 %v7679_v10  ;;  %v8893_v49 = vld [vmem:[#allocation5 + $0xc34] sm:$0xf0]  ;;  %v7630_v10 = vld [vmem:[#allocation5 + $0xe28] sm:$0xf]  ;;  %v4186_v43 = vadd.f32 %v9804_v33, %v4172_v61  ;;  %v6064_v61 = vld [vmem:[#allocation5 + $0x1f8] sm:$0xf0]  ;;  %v4283_v14 = vpop.f32.mrf.mxu2 }
 0x1d4   :  { %4569 = vmatpush.bf16.msra.mxu3 %v7807_v25  ;;  %v8957_v25 = vld [vmem:[#allocation5 + $0xe34] sm:$0xf0]  ;;  %v7375_v32 = vor.u32 %v8893_v49, %v7374_v46  ;;  %v7982_v59 = vld [vmem:[#allocation5 + $0x10e8] sm:$0xf]  ;;  %v6067_v51 = vor.u32 %v8563_v19, %v6064_v61 }
 0x1d5   :  { %4528 = vmatpush.bf16.msra.mxu0 %v7407_v39  ;;  %v8921_v39 = vld [vmem:[#allocation5 + $0xd14] sm:$0xf0]  ;;  %v8110_v33 = vld [vmem:[#allocation5 + $0x11e8] sm:$0xf] }
 0x1d6   :  { %v9045_v22 = vld [vmem:[#allocation5 + $0x10f4] sm:$0xf0]  ;;  %v7487_v27 = vor.u32 %v8921_v39, %v7486_v35  ;;  %v7950_v39 = vld [vmem:[#allocation5 + $0x10a8] sm:$0xf] }
 0x1d7   :  { %4542 = vmatpush.bf16.msra.mxu1 %v7535_v42  ;;  %4556 = vmatpush.bf16.msra.mxu2 %v7663_v16  ;;  %v7631_v42 = vor.u32 %v8957_v25, %v7630_v10  ;;  %v7742_v16 = vld [vmem:[#allocation5 + $0xf08] sm:$0xf]  ;;  %v9077_v4 = vld [vmem:[#allocation5 + $0x11f4] sm:$0xf0] }
 0x1d8   :  { %4570 = vmatpush.bf16.msra.mxu3 %v7791_v26  ;;  %v4200_v26 = vadd.f32 %v9809_v20, %v4186_v43  ;;  %v7983_v20 = vor.u32 %v9045_v22, %v7982_v59  ;;  %v8111_v49 = vor.u32 %v9077_v4, %v8110_v33  ;;  %v8094_v10 = vld [vmem:[#allocation5 + $0x11c8] sm:$0xf]  ;;  %v9073_v25 = vld [vmem:[#allocation5 + $0x11d4] sm:$0xf0]  ;;  %v8559_v43 = vld [vmem:[#allocation5 + $0x1cc] sm:$0xf] }
 0x1d9   :  { %4529 = vmatpush.bf16.msra.mxu0 %v7391_v15  ;;  %v7615_v15 = vor.u32 %v8953_v13, %v7614_v62  ;;  %v8095_v35 = vor.u32 %v9073_v25, %v8094_v10  ;;  %v9069_v13 = vld [vmem:[#allocation5 + $0x11b4] sm:$0xf0]  ;;  %v8555_v59 = vld [vmem:[#allocation5 + $0x1ac] sm:$0xf]  ;;  %v6032_v22 = vld [vmem:[#allocation5 + $0x1b8] sm:$0xf0] }
 0x1da   :  { %v4214_v46 = vadd.f32 %v9811_v37, %v4200_v26  ;;  %v4269_v37 = vpop.f32.mrf.mxu1  ;;  %v6035_v19 = vor.u32 %v8555_v59, %v6032_v22  ;;  %v8062_v61 = vld [vmem:[#allocation5 + $0x1188] sm:$0xf] }
 0x1db   :  { %4543 = vmatpush.bf16.msra.mxu1 %v7519_v60  ;;  %4557 = vmatpush.bf16.msra.mxu2 %v7647_v17  ;;  %v7743_v60 = vor.u32 %v8985_v21, %v7742_v16  ;;  %v7966_v17 = vld [vmem:[#allocation5 + $0x10c8] sm:$0xf]  ;;  %v8523_v16 = vld [vmem:[#allocation5 + $0xac] sm:$0xf]  ;;  %v5904_v21 = vld [vmem:[#allocation5 + $0xb8] sm:$0xf0] }
 0x1dc   :  { %4571 = vmatpush.bf16.msra.mxu3 %v7775_v24  ;;  %v9041_v24 = vld [vmem:[#allocation5 + $0x10d4] sm:$0xf0]  ;;  %v4228_v31 = vadd.f32 %v9821_v50, %v4214_v46  ;;  %v8078_v50 = vld [vmem:[#allocation5 + $0x11a8] sm:$0xf]  ;;  %v4297_v46 = vpop.f32.mrf.mxu3 }
 0x1dd   :  { %4530 = vmatpush.bf16.msra.mxu0 %v7375_v32  ;;  %v6048_v32 = vld [vmem:[#allocation5 + $0x1d8] sm:$0xf0]  ;;  %v7967_v34 = vor.u32 %v9041_v24, %v7966_v17  ;;  %v8079_v3 = vor.u32 %v9069_v13, %v8078_v50  ;;  %v7902_v13 = vld [vmem:[#allocation5 + $0x1048] sm:$0xf] }
 0x1de   :  { %v6051_v62 = vor.u32 %v8559_v43, %v6048_v32  ;;  %v4242_v26 = vadd.f32 %v9823_v45, %v4228_v31  ;;  %v5907_v45 = vor.u32 %v8523_v16, %v5904_v21  ;;  %v6016_v17 = vld [vmem:[#allocation5 + $0x198] sm:$0xf0]  ;;  %v7918_v31 = vld [vmem:[#allocation5 + $0x1068] sm:$0xf]  ;;  %v9025_v16 = vld [vmem:[#allocation5 + $0x1054] sm:$0xf0] }
 0x1df   :  { %4544 = vmatpush.bf16.msra.mxu1 %v7503_v41  ;;  %4558 = vmatpush.bf16.msra.mxu2 %v7631_v42  ;;  %v4255_v41 = vpop.f32.mrf.mxu0  ;;  %v9037_v42 = vld [vmem:[#allocation5 + $0x10b4] sm:$0xf0]  ;;  %v8030_v22 = vld [vmem:[#allocation5 + $0x1148] sm:$0xf] }
 0x1e0   :  { %4572 = vmatpush.bf16.msra.mxu3 %v7759_v28  ;;  %v5923_v28 = vor.u32 %v8527_v29, %v5920_v30  ;;  %v4256_v33 = vadd.f32 %v4255_v41, %v4242_v26  ;;  %v7951_v4 = vor.u32 %v9037_v42, %v7950_v39  ;;  %v9029_v30 = vld [vmem:[#allocation5 + $0x1074] sm:$0xf0]  ;;  %v8046_v41 = vld [vmem:[#allocation5 + $0x1168] sm:$0xf] }
 0x1e1   :  { %4531 = vmatpush.bf16.msra.mxu0 %v7359_v18  ;;  %v7934_v18 = vld [vmem:[#allocation5 + $0x1088] sm:$0xf]  ;;  %v7919_v50 = vor.u32 %v9029_v30, %v7918_v31  ;;  %v5840_v31 = vld [vmem:[#allocation5 + $0x38] sm:$0xf0]  ;;  %v8539_v30 = vld [vmem:[#allocation5 + $0x12c] sm:$0xf] }
 0x1e3   :  { %4545 = vmatpush.bf16.msra.mxu1 %v7487_v27  ;;  %4559 = vmatpush.bf16.msra.mxu2 %v7615_v15  ;;  %v9033_v27 = vld [vmem:[#allocation5 + $0x1094] sm:$0xf0]  ;;  %v4323_v29 = vpop.f32.mrf.mxu1 }
 0x1e4   :  { %4573 = vmatpush.bf16.msra.mxu3 %v7743_v60  ;;  %4532 = vmatmul.bf16.vlgmr.msra.gmra.mxu0 %v9683_v52  ;;  %v9065_v15 = vld [vmem:[#allocation5 + $0x1194] sm:$0xf0]  ;;  %v8519_v60 = vld [vmem:[#allocation5 + $0x8c] sm:$0xf] }
 0x1e5   :  { %4580 = vmatpush.bf16.msrb.mxu0 %v7983_v20  ;;  %v5888_v20 = vld [vmem:[#allocation5 + $0x98] sm:$0xf0]  ;;  %v8063_v25 = vor.u32 %v9065_v15, %v8062_v61  ;;  %v7903_v15 = vor.u32 %v9025_v16, %v7902_v13  ;;  %v8535_v16 = vld [vmem:[#allocation5 + $0x10c] sm:$0xf] }
 0x1e6   :  { %4560 = vmatmul.bf16.vlgmr.msra.gmra.mxu2 %v9686_v53  ;;  %4546 = vmatmul.bf16.vlgmr.msra.gmra.mxu1 %v9689_v63  ;;  %v5891_v43 = vor.u32 %v8519_v60, %v5888_v20  ;;  %v5824_v13 = vld [vmem:[#allocation5 + $0x18] sm:$0xf0] }
 0x1e7   :  { %4594 = vmatpush.bf16.msrb.mxu1 %v8111_v49  ;;  %4608 = vmatpush.bf16.msrb.mxu2 %v5939_v36  ;;  %v8551_v49 = vld [vmem:[#allocation5 + $0x18c] sm:$0xf]  ;;  %v4309_v24 = vpop.f32.mrf.mxu0  ;;  %v7935_v36 = vor.u32 %v9033_v27, %v7934_v18 }
 0x1e8   :  { %4622 = vmatpush.bf16.msrb.mxu3 %v6067_v51  ;;  %v4270_v51 = vadd.f32 %v4269_v37, %v4256_v33  ;;  %v4310_v10 = vadd.f32 %v4309_v24, %v9829_v23  ;;  %v6019_v32 = vor.u32 %v8551_v49, %v6016_v17  ;;  %v6000_v37 = vld [vmem:[#allocation5 + $0x178] sm:$0xf0]  ;;  %v9057_v33 = vld [vmem:[#allocation5 + $0x1154] sm:$0xf0]  ;;  %v7886_v17 = vld [vmem:[#allocation5 + $0x1028] sm:$0xf] }
 0x1e9   :  { %4574 = vmatmul.bf16.vlgmr.msra.gmra.mxu3 %v9692_v0  ;;  %4581 = vmatpush.bf16.msrb.mxu0 %v7967_v34  ;;  %v9061_v34 = vld [vmem:[#allocation5 + $0x1174] sm:$0xf0]  ;;  %v4337_v59 = vpop.f32.mrf.mxu2  ;;  %v8031_v49 = vor.u32 %v9057_v33, %v8030_v22  ;;  %v8595_v22 = vld [vmem:[#allocation5 + $0x2ec] sm:$0xf]  ;;  %v6192_v33 = vld [vmem:[#allocation5 + $0x2f8] sm:$0xf0] }
 0x1ea   :  { %v4284_v39 = vadd.f32 %v4283_v14, %v4270_v51  ;;  %v4324_v42 = vadd.f32 %v4323_v29, %v4310_v10  ;;  %v8047_v23 = vor.u32 %v9061_v34, %v8046_v41  ;;  %v5856_v14 = vld [vmem:[#allocation5 + $0x58] sm:$0xf0]  ;;  %v9021_v24 = vld [vmem:[#allocation5 + $0x1034] sm:$0xf0]  ;;  %v8507_v29 = vld [vmem:[#allocation5 + $0x2c] sm:$0xf] }
 0x1eb   :  { %4595 = vmatpush.bf16.msrb.mxu1 %v8095_v35  ;;  %4609 = vmatpush.bf16.msrb.mxu2 %v5923_v28  ;;  %v8515_v35 = vld [vmem:[#allocation5 + $0x6c] sm:$0xf]  ;;  %v5872_v28 = vld [vmem:[#allocation5 + $0x78] sm:$0xf0]  ;;  %v4325_v10 = vpop.f32.mrf.mxu1  ;;  %v7887_v34 = vor.u32 %v9021_v24, %v7886_v17  ;;  %v6195_v24 = vor.u32 %v8595_v22, %v6192_v33 }
 0x1ec   :  { %4623 = vmatpush.bf16.msrb.mxu3 %v6051_v62  ;;  %v8547_v62 = vld [vmem:[#allocation5 + $0x16c] sm:$0xf]  ;;  %v5875_v26 = vor.u32 %v8515_v35, %v5872_v28  ;;  %v4338_v18 = vadd.f32 %v4337_v59, %v4324_v42  ;;  %v4351_v27 = vpop.f32.mrf.mxu3  ;;  %v7998_v42 = vld [vmem:[#allocation5 + $0x1108] sm:$0xf]  ;;  %v9049_v28 = vld [vmem:[#allocation5 + $0x1114] sm:$0xf0] }
 0x1ed   :  { %4582 = vmatpush.bf16.msrb.mxu0 %v7951_v4  ;;  %v6003_v21 = vor.u32 %v8547_v62, %v6000_v37  ;;  %v8511_v4 = vld [vmem:[#allocation5 + $0x4c] sm:$0xf]  ;;  %v5843_v62 = vor.u32 %v8507_v29, %v5840_v31  ;;  %v5952_v59 = vld [vmem:[#allocation5 + $0x118] sm:$0xf0] }
 0x1ee   :  { %v4352_v20 = vadd.f32 %v4351_v27, %v4338_v18  ;;  %v8659_v18 = vld [vmem:[#allocation5 + $0x4ec] sm:$0xf]  ;;  %v6304_v31 = vld [vmem:[#allocation5 + $0x3d8] sm:$0xf0] }
 0x1ef   :  { %4596 = vmatpush.bf16.msrb.mxu1 %v8079_v3  ;;  %4610 = vmatpush.bf16.msrb.mxu2 %v5907_v45  ;;  %v4298_v3 = vadd.f32 %v4297_v46, %v4284_v39  ;;  %v8543_v45 = vld [vmem:[#allocation5 + $0x14c] sm:$0xf]  ;;  %v4311_v61 = vpop.f32.mrf.mxu0  ;;  %v8014_v46 = vld [vmem:[#allocation5 + $0x1128] sm:$0xf]  ;;  %v9017_v39 = vld [vmem:[#allocation5 + $0x1014] sm:$0xf0] }
 0x1f0   :  { %4624 = vmatpush.bf16.msrb.mxu3 %v6035_v19  ;;  %v5984_v19 = vld [vmem:[#allocation5 + $0x158] sm:$0xf0]  ;;  %v8591_v17 = vld [vmem:[#allocation5 + $0x2cc] sm:$0xf]  ;;  %vm4861_vm0 = vcmp.gt.f32.partialorder %v4352_v20, 1.0 }
 0x1f1   :  { %4583 = vmatpush.bf16.msrb.mxu0 %v7935_v36  ;;  %v4312_v60 = vadd.f32 %v4311_v61, %v4298_v3  ;;  %v5859_v36 = vor.u32 %v8511_v4, %v5856_v14  ;;  %v5987_v51 = vor.u32 %v8543_v45, %v5984_v19  ;;  %v8627_v4 = vld [vmem:[#allocation5 + $0x3ec] sm:$0xf]  ;;  %v6320_v3 = vld [vmem:[#allocation5 + $0x3f8] sm:$0xf0]  ;;  %v7999_v45 = vor.u32 %v9049_v28, %v7998_v42 }
 0x1f2   :  { %v6448_v19 = vld [vmem:[#allocation5 + $0x4f8] sm:$0xf0]  ;;  %v8691_v61 = vld [vmem:[#allocation5 + $0x5ec] sm:$0xf] }
 0x1f3   :  { %4597 = vmatpush.bf16.msrb.mxu1 %v8063_v25  ;;  %4611 = vmatpush.bf16.msrb.mxu2 %v5891_v43  ;;  %v9053_v25 = vld [vmem:[#allocation5 + $0x1134] sm:$0xf0]  ;;  %v5968_v43 = vld [vmem:[#allocation5 + $0x138] sm:$0xf0]  ;;  %v4326_v41 = vadd.f32 %v4325_v10, %v4312_v60  ;;  %v8623_v10 = vld [vmem:[#allocation5 + $0x3cc] sm:$0xf] }
 0x1f4   :  { %4625 = vmatpush.bf16.msrb.mxu3 %v6019_v32  ;;  %v7870_v32 = vld [vmem:[#allocation5 + $0x1008] sm:$0xf]  ;;  %v8015_v35 = vor.u32 %v9053_v25, %v8014_v46  ;;  %v5971_v37 = vor.u32 %v8539_v30, %v5968_v43  ;;  %v6451_v25 = vor.u32 %v8659_v18, %v6448_v19  ;;  %v8655_v30 = vld [vmem:[#allocation5 + $0x4cc] sm:$0xf]  ;;  %v6432_v43 = vld [vmem:[#allocation5 + $0x4d8] sm:$0xf0] }
 0x1f5   :  { %4584 = vmatpush.bf16.msrb.mxu0 %v7919_v50  ;;  %v4339_v50 = vpop.f32.mrf.mxu2  ;;  %v7871_v14 = vor.u32 %v9017_v39, %v7870_v32  ;;  %v8687_v32 = vld [vmem:[#allocation5 + $0x5cc] sm:$0xf]  ;;  %v6160_v39 = vld [vmem:[#allocation5 + $0x2b8] sm:$0xf0]  ;;  %v6435_v42 = vor.u32 %v8655_v30, %v6432_v43  ;;  %v8358_v46 = vld [vmem:[#allocation8 + $0x1d0] sm:$0xf] }
 0x1f6   :  { %v6144_v22 = vld [vmem:[#allocation5 + $0x298] sm:$0xf0]  ;;  %v8575_v30 = vld [vmem:[#allocation5 + $0x24c] sm:$0xf] }
 0x1f7   :  { %4598 = vmatpush.bf16.msrb.mxu1 %v8047_v23  ;;  %4612 = vmatpush.bf16.msrb.mxu2 %v5875_v26  ;;  %v8503_v23 = vld [vmem:[#allocation5 + $0xc] sm:$0xf]  ;;  %v4340_v26 = vadd.f32 %v4339_v50, %v4326_v41  ;;  %v6560_v41 = vld [vmem:[#allocation5 + $0x5d8] sm:$0xf0] }
 0x1f8   :  { %4626 = vmatpush.bf16.msrb.mxu3 %v6003_v21  ;;  %v4353_v21 = vpop.f32.mrf.mxu3  ;;  %v5827_v60 = vor.u32 %v8503_v23, %v5824_v13  ;;  %v6563_v28 = vor.u32 %v8687_v32, %v6560_v41  ;;  %v8651_v50 = vld [vmem:[#allocation5 + $0x4ac] sm:$0xf]  ;;  %v6416_v23 = vld [vmem:[#allocation5 + $0x4b8] sm:$0xf0] }
 0x1f9   :  { %4585 = vmatpush.bf16.msrb.mxu0 %v7903_v15  ;;  %v4354_v27 = vadd.f32 %v4353_v21, %v4340_v26  ;;  %v6576_v15 = vld [vmem:[#allocation5 + $0x5f8] sm:$0xf0]  ;;  %v8683_v13 = vld [vmem:[#allocation5 + $0x5ac] sm:$0xf]  ;;  %v6419_v33 = vor.u32 %v8651_v50, %v6416_v23 }
 0x1fa   :  { %v6579_v29 = vor.u32 %v8691_v61, %v6576_v15  ;;  %v6272_v18 = vld [vmem:[#allocation5 + $0x398] sm:$0xf0]  ;;  %v8579_v61 = vld [vmem:[#allocation5 + $0x26c] sm:$0xf] }
 0x1fb   :  { %4599 = vmatpush.bf16.msrb.mxu1 %v8031_v49  ;;  %4613 = vmatpush.bf16.msrb.mxu2 %v5859_v36  ;;  %v5955_v49 = vor.u32 %v8535_v16, %v5952_v59  ;;  %vm4865_vm1 = vcmp.gt.f32.partialorder %v4354_v27, 1.0  ;;  %v6323_v36 = vor.u32 %v8627_v4, %v6320_v3  ;;  %v6544_v16 = vld [vmem:[#allocation5 + $0x5b8] sm:$0xf0]  ;;  %v8583_v59 = vld [vmem:[#allocation5 + $0x28c] sm:$0xf] }
 0x1fc   :  { %4627 = vmatpush.bf16.msrb.mxu3 %v5987_v51  ;;  %v6176_v51 = vld [vmem:[#allocation5 + $0x2d8] sm:$0xf0]  ;;  %vm9841_vm2 = vmpackc.low %vm4865_vm1, %vm4861_vm0  ;;  %v6547_v4 = vor.u32 %v8683_v13, %v6544_v16  ;;  %v8615_v3 = vld [vmem:[#allocation5 + $0x38c] sm:$0xf] }
 0x1fd   :  { %4586 = vmatpush.bf16.msrb.mxu0 %v7887_v34  ;;  %v6179_v20 = vor.u32 %v8591_v17, %v6176_v51  ;;  %v6307_v34 = vor.u32 %v8623_v10, %v6304_v31  ;;  %v8647_v27 = vld [vmem:[#allocation5 + $0x48c] sm:$0xf]  ;;  %v6528_v19 = vld [vmem:[#allocation5 + $0x598] sm:$0xf0] }
 0x1fe   :  { %v6128_v15 = vld [vmem:[#allocation5 + $0x278] sm:$0xf0]  ;;  %v8611_v17 = vld [vmem:[#allocation5 + $0x36c] sm:$0xf] }
 0x1ff   :  { %4600 = vmatpush.bf16.msrb.mxu1 %v8015_v35  ;;  %4614 = vmatpush.bf16.msrb.mxu2 %v5843_v62  ;;  %v8587_v35 = vld [vmem:[#allocation5 + $0x2ac] sm:$0xf]  ;;  %v6384_v51 = vld [vmem:[#allocation5 + $0x478] sm:$0xf0] }
 0x200   :  { %4628 = vmatpush.bf16.msrb.mxu3 %v5971_v37  ;;  %v8619_v62 = vld [vmem:[#allocation5 + $0x3ac] sm:$0xf]  ;;  %v6288_v37 = vld [vmem:[#allocation5 + $0x3b8] sm:$0xf0]  ;;  %v6163_v26 = vor.u32 %v8587_v35, %v6160_v39 }
 0x201   :  { %4587 = vmatpush.bf16.msrb.mxu0 %v7871_v14  ;;  %v6291_v21 = vor.u32 %v8619_v62, %v6288_v37  ;;  %v6400_v14 = vld [vmem:[#allocation5 + $0x498] sm:$0xf0]  ;;  %v8675_v10 = vld [vmem:[#allocation5 + $0x56c] sm:$0xf] }
 0x202   :  { %v6112_v43 = vld [vmem:[#allocation5 + $0x258] sm:$0xf0]  ;;  %v8639_v35 = vld [vmem:[#allocation5 + $0x44c] sm:$0xf] }
 0x203   :  { %4601 = vmatpush.bf16.msrb.mxu1 %v7999_v45  ;;  %4615 = vmatpush.bf16.msrb.mxu2 %v5827_v60  ;;  %v8679_v45 = vld [vmem:[#allocation5 + $0x58c] sm:$0xf]  ;;  %v6403_v60 = vor.u32 %v8647_v27, %v6400_v14  ;;  %v6368_v39 = vld [vmem:[#allocation5 + $0x458] sm:$0xf0]  ;;  %v6115_v62 = vor.u32 %v8575_v30, %v6112_v43 }
 0x204   :  { %4629 = vmatpush.bf16.msrb.mxu3 %v5955_v49  ;;  %4588 = vmatmul.bf16.vlgmr.msrb.gmra.mxu0 %v9699_v8  ;;  %v6531_v49 = vor.u32 %v8679_v45, %v6528_v19  ;;  %v8571_v50 = vld [vmem:[#allocation5 + $0x22c] sm:$0xf]  ;;  %v6096_v23 = vld [vmem:[#allocation5 + $0x238] sm:$0xf0]  ;;  %v6371_v13 = vor.u32 %v8639_v35, %v6368_v39 }
 0x205   :  { %4636 = vmatpush.bf16.msra.mxu0 %v6195_v24  ;;  %v6256_v24 = vld [vmem:[#allocation5 + $0x378] sm:$0xf0]  ;;  %v8599_v45 = vld [vmem:[#allocation5 + $0x30c] sm:$0xf] }
 0x206   :  { %4602 = vmatmul.bf16.vlgmr.msrb.gmra.mxu1 %v9702_v12  ;;  %4616 = vmatmul.bf16.vlgmr.msrb.gmra.mxu2 %v9626_v44  ;;  %v6147_v44 = vor.u32 %v8583_v59, %v6144_v22  ;;  %v6259_v31 = vor.u32 %v8611_v17, %v6256_v24  ;;  %v8635_v59 = vld [vmem:[#allocation5 + $0x42c] sm:$0xf]  ;;  %v6352_v22 = vld [vmem:[#allocation5 + $0x438] sm:$0xf0] }
 0x207   :  { %4650 = vmatpush.bf16.msra.mxu1 %v6323_v36  ;;  %4664 = vmatpush.bf16.msra.mxu2 %v6451_v25  ;;  %v8643_v36 = vld [vmem:[#allocation5 + $0x46c] sm:$0xf]  ;;  %v6512_v25 = vld [vmem:[#allocation5 + $0x578] sm:$0xf0] }
 0x208   :  { %4678 = vmatpush.bf16.msra.mxu3 %v6579_v29  ;;  %v6131_v29 = vor.u32 %v8579_v61, %v6128_v15  ;;  %v6387_v32 = vor.u32 %v8643_v36, %v6384_v51  ;;  %v6515_v41 = vor.u32 %v8675_v10, %v6512_v25  ;;  %v6080_v14 = vld [vmem:[#allocation5 + $0x218] sm:$0xf0]  ;;  %v8631_v61 = vld [vmem:[#allocation5 + $0x40c] sm:$0xf] }
 0x209   :  { %4630 = vmatmul.bf16.vlgmr.msrb.gmra.mxu3 %v9630_v55  ;;  %4637 = vmatpush.bf16.msra.mxu0 %v6179_v20  ;;  %v6275_v55 = vor.u32 %v8615_v3, %v6272_v18  ;;  %v8607_v20 = vld [vmem:[#allocation5 + $0x34c] sm:$0xf]  ;;  %v6099_v18 = vor.u32 %v8571_v50, %v6096_v23  ;;  %v6208_v19 = vld [vmem:[#allocation5 + $0x318] sm:$0xf0] }
 0x20a   :  { %v8567_v3 = vld [vmem:[#allocation5 + $0x20c] sm:$0xf]  ;;  %v6336_v15 = vld [vmem:[#allocation5 + $0x418] sm:$0xf0] }
 0x20b   :  { %4651 = vmatpush.bf16.msra.mxu1 %v6307_v34  ;;  %4665 = vmatpush.bf16.msra.mxu2 %v6435_v42  ;;  %v6240_v34 = vld [vmem:[#allocation5 + $0x358] sm:$0xf0]  ;;  %v8671_v42 = vld [vmem:[#allocation5 + $0x54c] sm:$0xf]  ;;  %v6083_v25 = vor.u32 %v8567_v3, %v6080_v14 }
 0x20c   :  { %4679 = vmatpush.bf16.msra.mxu3 %v6563_v28  ;;  %v6496_v28 = vld [vmem:[#allocation5 + $0x558] sm:$0xf0]  ;;  %v6243_v37 = vor.u32 %v8607_v20, %v6240_v34  ;;  %v8723_v17 = vld [vmem:[#allocation5 + $0x6ec] sm:$0xf] }
 0x20d   :  { %4638 = vmatpush.bf16.msra.mxu0 %v6163_v26  ;;  %v6499_v16 = vor.u32 %v8671_v42, %v6496_v28  ;;  %v8603_v26 = vld [vmem:[#allocation5 + $0x32c] sm:$0xf]  ;;  %v6704_v24 = vld [vmem:[#allocation5 + $0x6f8] sm:$0xf0] }
 0x20e   :  { %v8755_v36 = vld [vmem:[#allocation5 + $0x7ec] sm:$0xf]  ;;  %v6832_v51 = vld [vmem:[#allocation5 + $0x7f8] sm:$0xf0]  ;;  %v6707_v20 = vor.u32 %v8723_v17, %v6704_v24 }
 0x20f   :  { %4652 = vmatpush.bf16.msra.mxu1 %v6291_v21  ;;  %4666 = vmatpush.bf16.msra.mxu2 %v6419_v33  ;;  %v6224_v21 = vld [vmem:[#allocation5 + $0x338] sm:$0xf0]  ;;  %v8667_v33 = vld [vmem:[#allocation5 + $0x52c] sm:$0xf]  ;;  %v6835_v34 = vor.u32 %v8755_v36, %v6832_v51 }
 0x210   :  { %4680 = vmatpush.bf16.msra.mxu3 %v6547_v4  ;;  %v6480_v4 = vld [vmem:[#allocation5 + $0x538] sm:$0xf0]  ;;  %v6227_v27 = vor.u32 %v8603_v26, %v6224_v21  ;;  %v8787_v10 = vld [vmem:[#allocation5 + $0x8ec] sm:$0xf] }
 0x211   :  { %4639 = vmatpush.bf16.msra.mxu0 %v6147_v44  ;;  %v6355_v44 = vor.u32 %v8635_v59, %v6352_v22  ;;  %v8819_v30 = vld [vmem:[#allocation5 + $0x9ec] sm:$0xf]  ;;  %v7088_v43 = vld [vmem:[#allocation5 + $0x9f8] sm:$0xf0] }
 0x212   :  { %v8719_v35 = vld [vmem:[#allocation5 + $0x6cc] sm:$0xf]  ;;  %v6688_v39 = vld [vmem:[#allocation5 + $0x6d8] sm:$0xf0]  ;;  %v7091_v28 = vor.u32 %v8819_v30, %v7088_v43 }
 0x213   :  { %4653 = vmatpush.bf16.msra.mxu1 %v6275_v55  ;;  %4667 = vmatpush.bf16.msra.mxu2 %v6403_v60  ;;  %v6483_v55 = vor.u32 %v8667_v33, %v6480_v4  ;;  %v8663_v60 = vld [vmem:[#allocation5 + $0x50c] sm:$0xf]  ;;  %v6944_v23 = vld [vmem:[#allocation5 + $0x8d8] sm:$0xf0]  ;;  %v6691_v26 = vor.u32 %v8719_v35, %v6688_v39 }
 0x214   :  { %4681 = vmatpush.bf16.msra.mxu3 %v6531_v49  ;;  %v6464_v49 = vld [vmem:[#allocation5 + $0x518] sm:$0xf0]  ;;  %v8783_v50 = vld [vmem:[#allocation5 + $0x8cc] sm:$0xf] }
 0x215   :  { %4640 = vmatpush.bf16.msra.mxu0 %v6131_v29  ;;  %v6211_v29 = vor.u32 %v8599_v45, %v6208_v19  ;;  %v8715_v59 = vld [vmem:[#allocation5 + $0x6ac] sm:$0xf]  ;;  %v6672_v22 = vld [vmem:[#allocation5 + $0x6b8] sm:$0xf0]  ;;  %v6947_v33 = vor.u32 %v8783_v50, %v6944_v23 }
 0x216   :  { %v8747_v3 = vld [vmem:[#allocation5 + $0x7ac] sm:$0xf]  ;;  %v6928_v14 = vld [vmem:[#allocation5 + $0x8b8] sm:$0xf0] }
 0x217   :  { %4654 = vmatpush.bf16.msra.mxu1 %v6259_v31  ;;  %4668 = vmatpush.bf16.msra.mxu2 %v6387_v32  ;;  %v6960_v31 = vld [vmem:[#allocation5 + $0x8f8] sm:$0xf0]  ;;  %v6339_v32 = vor.u32 %v8631_v61, %v6336_v15  ;;  %v8811_v45 = vld [vmem:[#allocation5 + $0x9ac] sm:$0xf] }
 0x218   :  { %4682 = vmatpush.bf16.msra.mxu3 %v6515_v41  ;;  %v6467_v41 = vor.u32 %v8663_v60, %v6464_v49  ;;  %v6963_v42 = vor.u32 %v8787_v10, %v6960_v31  ;;  %v7056_v19 = vld [vmem:[#allocation5 + $0x9b8] sm:$0xf0]  ;;  %v8711_v61 = vld [vmem:[#allocation5 + $0x68c] sm:$0xf] }
 0x219   :  { %4641 = vmatpush.bf16.msra.mxu0 %v6115_v62  ;;  %v8751_v62 = vld [vmem:[#allocation5 + $0x7cc] sm:$0xf]  ;;  %v6656_v15 = vld [vmem:[#allocation5 + $0x698] sm:$0xf0]  ;;  %v7059_v49 = vor.u32 %v8811_v45, %v7056_v19 }
 0x21a   :  { %v6784_v17 = vld [vmem:[#allocation5 + $0x798] sm:$0xf0]  ;;  %v8807_v36 = vld [vmem:[#allocation5 + $0x98c] sm:$0xf] }
 0x21b   :  { %4655 = vmatpush.bf16.msra.mxu1 %v6243_v37  ;;  %4669 = vmatpush.bf16.msra.mxu2 %v6371_v13  ;;  %v6816_v37 = vld [vmem:[#allocation5 + $0x7d8] sm:$0xf0]  ;;  %v8815_v13 = vld [vmem:[#allocation5 + $0x9cc] sm:$0xf] }
 0x21c   :  { %4683 = vmatpush.bf16.msra.mxu3 %v6499_v16  ;;  %v7072_v16 = vld [vmem:[#allocation5 + $0x9d8] sm:$0xf0]  ;;  %v6819_v21 = vor.u32 %v8751_v62, %v6816_v37  ;;  %v8707_v10 = vld [vmem:[#allocation5 + $0x66c] sm:$0xf] }
 0x21d   :  { %4642 = vmatpush.bf16.msra.mxu0 %v6099_v18  ;;  %v7075_v4 = vor.u32 %v8815_v13, %v7072_v16  ;;  %v6800_v18 = vld [vmem:[#allocation5 + $0x7b8] sm:$0xf0]  ;;  %v8739_v30 = vld [vmem:[#allocation5 + $0x76c] sm:$0xf] }
 0x21e   :  { %v6912_v24 = vld [vmem:[#allocation5 + $0x898] sm:$0xf0]  ;;  %v8735_v50 = vld [vmem:[#allocation5 + $0x74c] sm:$0xf] }
 0x21f   :  { %4656 = vmatpush.bf16.msra.mxu1 %v6227_v27  ;;  %4670 = vmatpush.bf16.msra.mxu2 %v6355_v44  ;;  %v8779_v27 = vld [vmem:[#allocation5 + $0x8ac] sm:$0xf]  ;;  %v6675_v44 = vor.u32 %v8715_v59, %v6672_v22  ;;  %v7040_v51 = vld [vmem:[#allocation5 + $0x998] sm:$0xf0] }
 0x220   :  { %4684 = vmatpush.bf16.msra.mxu3 %v6483_v55  ;;  %v6803_v55 = vor.u32 %v8747_v3, %v6800_v18  ;;  %v6931_v60 = vor.u32 %v8779_v27, %v6928_v14  ;;  %v7043_v31 = vor.u32 %v8807_v36, %v7040_v51  ;;  %v6768_v43 = vld [vmem:[#allocation5 + $0x778] sm:$0xf0]  ;;  %v8767_v13 = vld [vmem:[#allocation5 + $0x84c] sm:$0xf] }
 0x221   :  { %4643 = vmatpush.bf16.msra.mxu0 %v6083_v25  ;;  %v6640_v25 = vld [vmem:[#allocation5 + $0x678] sm:$0xf0]  ;;  %v6771_v39 = vor.u32 %v8739_v30, %v6768_v43  ;;  %v8731_v27 = vld [vmem:[#allocation5 + $0x72c] sm:$0xf] }
 0x222   :  { %v6643_v35 = vor.u32 %v8707_v10, %v6640_v25  ;;  %v6752_v23 = vld [vmem:[#allocation5 + $0x758] sm:$0xf0]  ;;  %v8763_v45 = vld [vmem:[#allocation5 + $0x82c] sm:$0xf] }
 0x223   :  { %4657 = vmatpush.bf16.msra.mxu1 %v6211_v29  ;;  %4671 = vmatpush.bf16.msra.mxu2 %v6339_v32  ;;  %v8771_v32 = vld [vmem:[#allocation5 + $0x86c] sm:$0xf]  ;;  %v6880_v16 = vld [vmem:[#allocation5 + $0x858] sm:$0xf0]  ;;  %v6755_v22 = vor.u32 %v8735_v50, %v6752_v23  ;;  %v9855_v23 = vpop.f32.mrf.mxu1 }
 0x224   :  { %4685 = vmatpush.bf16.msra.mxu3 %v6467_v41  ;;  %4644 = vmatmul.bf16.vlgmr.msra.gmra.mxu0 %v9628_v47  ;;  %v8743_v47 = vld [vmem:[#allocation5 + $0x78c] sm:$0xf]  ;;  %v6896_v41 = vld [vmem:[#allocation5 + $0x878] sm:$0xf0]  ;;  %v6883_v3 = vor.u32 %v8767_v13, %v6880_v16 }
 0x225   :  { %4692 = vmatpush.bf16.msrb.mxu0 %v6707_v20  ;;  %v8803_v20 = vld [vmem:[#allocation5 + $0x96c] sm:$0xf]  ;;  %v6899_v62 = vor.u32 %v8771_v32, %v6896_v41  ;;  %v6736_v14 = vld [vmem:[#allocation5 + $0x738] sm:$0xf0] }
 0x226   :  { %4672 = vmatmul.bf16.vlgmr.msra.gmra.mxu2 %v9651_v57  ;;  %4658 = vmatmul.bf16.vlgmr.msra.gmra.mxu1 %v9632_v56  ;;  %v8775_v57 = vld [vmem:[#allocation5 + $0x88c] sm:$0xf]  ;;  %v6659_v56 = vor.u32 %v8711_v61, %v6656_v15  ;;  %v6864_v19 = vld [vmem:[#allocation5 + $0x838] sm:$0xf0] }
 0x227   :  { %4706 = vmatpush.bf16.msrb.mxu1 %v6835_v34  ;;  %4720 = vmatpush.bf16.msrb.mxu2 %v6963_v42  ;;  %v6915_v29 = vor.u32 %v8775_v57, %v6912_v24  ;;  %v7024_v34 = vld [vmem:[#allocation5 + $0x978] sm:$0xf0]  ;;  %v8703_v42 = vld [vmem:[#allocation5 + $0x64c] sm:$0xf]  ;;  %v6867_v57 = vor.u32 %v8763_v45, %v6864_v19 }
 0x228   :  { %4734 = vmatpush.bf16.msrb.mxu3 %v7091_v28  ;;  %v6624_v28 = vld [vmem:[#allocation5 + $0x658] sm:$0xf0]  ;;  %v7027_v37 = vor.u32 %v8803_v20, %v7024_v34  ;;  %v8695_v61 = vld [vmem:[#allocation5 + $0x60c] sm:$0xf] }
 0x229   :  { %4686 = vmatmul.bf16.vlgmr.msra.gmra.mxu3 %v9657_v6  ;;  %4693 = vmatpush.bf16.msrb.mxu0 %v6691_v26  ;;  %v6787_v6 = vor.u32 %v8743_v47, %v6784_v17  ;;  %v8799_v26 = vld [vmem:[#allocation5 + $0x94c] sm:$0xf]  ;;  %v6627_v59 = vor.u32 %v8703_v42, %v6624_v28  ;;  %v6720_v17 = vld [vmem:[#allocation5 + $0x718] sm:$0xf0] }
 0x22a   :  { %v8727_v47 = vld [vmem:[#allocation5 + $0x70c] sm:$0xf]  ;;  %v6848_v51 = vld [vmem:[#allocation5 + $0x818] sm:$0xf0] }
 0x22b   :  { %4707 = vmatpush.bf16.msrb.mxu1 %v6819_v21  ;;  %4721 = vmatpush.bf16.msrb.mxu2 %v6947_v33  ;;  %v7008_v21 = vld [vmem:[#allocation5 + $0x958] sm:$0xf0]  ;;  %v8699_v33 = vld [vmem:[#allocation5 + $0x62c] sm:$0xf]  ;;  %v6723_v41 = vor.u32 %v8727_v47, %v6720_v17 }
 0x22c   :  { %4735 = vmatpush.bf16.msrb.mxu3 %v7075_v4  ;;  %v6608_v4 = vld [vmem:[#allocation5 + $0x638] sm:$0xf0]  ;;  %v7011_v18 = vor.u32 %v8799_v26, %v7008_v21  ;;  %v8759_v36 = vld [vmem:[#allocation5 + $0x80c] sm:$0xf] }
 0x22d   :  { %4694 = vmatpush.bf16.msrb.mxu0 %v6675_v44  ;;  %v8795_v44 = vld [vmem:[#allocation5 + $0x92c] sm:$0xf]  ;;  %v6611_v15 = vor.u32 %v8699_v33, %v6608_v4  ;;  %v7216_v25 = vld [vmem:[#allocation5 + $0xaf8] sm:$0xf0] }
 0x22e   :  { %v8851_v10 = vld [vmem:[#allocation5 + $0xaec] sm:$0xf]  ;;  %v7344_v30 = vld [vmem:[#allocation5 + $0xbf8] sm:$0xf0] }
 0x22f   :  { %4708 = vmatpush.bf16.msrb.mxu1 %v6803_v55  ;;  %4722 = vmatpush.bf16.msrb.mxu2 %v6931_v60  ;;  %v6992_v55 = vld [vmem:[#allocation5 + $0x938] sm:$0xf0]  ;;  %v6739_v60 = vor.u32 %v8731_v27, %v6736_v14  ;;  %v8915_v43 = vld [vmem:[#allocation5 + $0xcec] sm:$0xf]  ;;  %v7219_v28 = vor.u32 %v8851_v10, %v7216_v25 }
 0x230   :  { %4736 = vmatpush.bf16.msrb.mxu3 %v7059_v49  ;;  %v6592_v49 = vld [vmem:[#allocation5 + $0x618] sm:$0xf0]  ;;  %v6995_v24 = vor.u32 %v8795_v44, %v6992_v55  ;;  %v8947_v34 = vld [vmem:[#allocation5 + $0xdec] sm:$0xf] }
 0x231   :  { %4695 = vmatpush.bf16.msrb.mxu0 %v6659_v56  ;;  %v8791_v56 = vld [vmem:[#allocation5 + $0x90c] sm:$0xf]  ;;  %v6595_v32 = vor.u32 %v8695_v61, %v6592_v49  ;;  %v7472_v20 = vld [vmem:[#allocation5 + $0xcf8] sm:$0xf0] }
 0x232   :  { %v7200_v50 = vld [vmem:[#allocation5 + $0xad8] sm:$0xf0]  ;;  %v7475_v13 = vor.u32 %v8915_v43, %v7472_v20  ;;  %v8879_v26 = vld [vmem:[#allocation5 + $0xbcc] sm:$0xf]  ;;  %v9867_v20 = vpop.f32.mrf.mxu3 }
 0x233   :  { %4709 = vmatpush.bf16.msrb.mxu1 %v6787_v6  ;;  %4723 = vmatpush.bf16.msrb.mxu2 %v6915_v29  ;;  %v6976_v6 = vld [vmem:[#allocation5 + $0x918] sm:$0xf0]  ;;  %v9853_v29 = vpop.f32.mrf.mxu0  ;;  %v8943_v33 = vld [vmem:[#allocation5 + $0xdcc] sm:$0xf] }
 0x234   :  { %4737 = vmatpush.bf16.msrb.mxu3 %v7043_v31  ;;  %v8883_v31 = vld [vmem:[#allocation5 + $0xbec] sm:$0xf]  ;;  %v6979_v42 = vor.u32 %v8791_v56, %v6976_v6  ;;  %v7328_v21 = vld [vmem:[#allocation5 + $0xbd8] sm:$0xf0] }
 0x235   :  { %4696 = vmatpush.bf16.msrb.mxu0 %v6643_v35  ;;  %v7600_v35 = vld [vmem:[#allocation5 + $0xdf8] sm:$0xf0]  ;;  %v8843_v27 = vld [vmem:[#allocation5 + $0xaac] sm:$0xf] }
 0x236   :  { %v7603_v16 = vor.u32 %v8947_v34, %v7600_v35  ;;  %v7584_v4 = vld [vmem:[#allocation5 + $0xdd8] sm:$0xf0]  ;;  %v8875_v44 = vld [vmem:[#allocation5 + $0xbac] sm:$0xf] }
 0x237   :  { %4710 = vmatpush.bf16.msrb.mxu1 %v6771_v39  ;;  %4724 = vmatpush.bf16.msrb.mxu2 %v6899_v62  ;;  %v6851_v39 = vor.u32 %v8759_v36, %v6848_v51  ;;  %v7347_v62 = vor.u32 %v8883_v31, %v7344_v30  ;;  %v7184_v14 = vld [vmem:[#allocation5 + $0xab8] sm:$0xf0]  ;;  %v7587_v19 = vor.u32 %v8943_v33, %v7584_v4  ;;  %v8907_v61 = vld [vmem:[#allocation5 + $0xcac] sm:$0xf]  ;;  %v9863_v51 = vpop.f32.mrf.mxu2  ;;  %v9865_v30 = vpop.f32.mrf.mxu1 }
 0x238   :  { %4738 = vmatpush.bf16.msrb.mxu3 %v7027_v37  ;;  %v8847_v37 = vld [vmem:[#allocation5 + $0xacc] sm:$0xf]  ;;  %v7312_v55 = vld [vmem:[#allocation5 + $0xbb8] sm:$0xf0]  ;;  %v7187_v17 = vor.u32 %v8843_v27, %v7184_v14 }
 0x239   :  { %4697 = vmatpush.bf16.msrb.mxu0 %v6627_v59  ;;  %v8911_v59 = vld [vmem:[#allocation5 + $0xccc] sm:$0xf]  ;;  %v7568_v49 = vld [vmem:[#allocation5 + $0xdb8] sm:$0xf0] }
 0x23a   :  { %v7168_v36 = vld [vmem:[#allocation5 + $0xa98] sm:$0xf0]  ;;  %v8871_v56 = vld [vmem:[#allocation5 + $0xb8c] sm:$0xf] }
 0x23b   :  { %4711 = vmatpush.bf16.msrb.mxu1 %v6755_v22  ;;  %4725 = vmatpush.bf16.msrb.mxu2 %v6883_v3  ;;  %v7456_v22 = vld [vmem:[#allocation5 + $0xcd8] sm:$0xf0]  ;;  %v7203_v3 = vor.u32 %v8847_v37, %v7200_v50  ;;  %v9859_v47 = vpop.f32.mrf.mxu0  ;;  %v8903_v10 = vld [vmem:[#allocation5 + $0xc8c] sm:$0xf] }
 0x23c   :  { %4739 = vmatpush.bf16.msrb.mxu3 %v7011_v18  ;;  %v7331_v18 = vor.u32 %v8879_v26, %v7328_v21  ;;  %v7459_v45 = vor.u32 %v8911_v59, %v7456_v22  ;;  %v7296_v6 = vld [vmem:[#allocation5 + $0xb98] sm:$0xf0]  ;;  %v8935_v31 = vld [vmem:[#allocation5 + $0xd8c] sm:$0xf] }
 0x23d   :  { %4698 = vmatpush.bf16.msrb.mxu0 %v6611_v15  ;;  %v7440_v15 = vld [vmem:[#allocation5 + $0xcb8] sm:$0xf0]  ;;  %v7299_v43 = vor.u32 %v8871_v56, %v7296_v6  ;;  %v8931_v37 = vld [vmem:[#allocation5 + $0xd6c] sm:$0xf]  ;;  %v9875_v6 = vld [vmem:[#allocation7] sm:$0xf] }
 0x23e   :  { %v7424_v25 = vld [vmem:[#allocation5 + $0xc98] sm:$0xf0]  ;;  %v8831_v26 = vld [vmem:[#allocation5 + $0xa4c] sm:$0xf] }
 0x23f   :  { %4712 = vmatpush.bf16.msrb.mxu1 %v6739_v60  ;;  %4726 = vmatpush.bf16.msrb.mxu2 %v6867_v57  ;;  %v8939_v60 = vld [vmem:[#allocation5 + $0xdac] sm:$0xf]  ;;  %v7315_v57 = vor.u32 %v8875_v44, %v7312_v55  ;;  %v7427_v34 = vor.u32 %v8903_v10, %v7424_v25  ;;  %v7536_v50 = vld [vmem:[#allocation5 + $0xd78] sm:$0xf0]  ;;  %v966_v10 = vperm.slane %v9875_v6, 2  ;;  %v9878_v25 = vpop.f32.mrf.mxu3 }
 0x240   :  { %4740 = vmatpush.bf16.msrb.mxu3 %v6995_v24  ;;  %v8839_v24 = vld [vmem:[#allocation5 + $0xa8c] sm:$0xf]  ;;  %v7136_v21 = vld [vmem:[#allocation5 + $0xa58] sm:$0xf0]  ;;  %v7539_v33 = vor.u32 %v8931_v37, %v7536_v50 }
 0x241   :  { %4699 = vmatpush.bf16.msrb.mxu0 %v6595_v32  ;;  %v8835_v32 = vld [vmem:[#allocation5 + $0xa6c] sm:$0xf]  ;;  %v7392_v27 = vld [vmem:[#allocation5 + $0xc58] sm:$0xf0]  ;;  %v7139_v44 = vor.u32 %v8831_v26, %v7136_v21 }
 0x242   :  { %v8863_v4 = vld [vmem:[#allocation5 + $0xb4c] sm:$0xf]  ;;  %v7504_v56 = vld [vmem:[#allocation5 + $0xd38] sm:$0xf0] }
 0x243   :  { %4713 = vmatpush.bf16.msrb.mxu1 %v6723_v41  ;;  %4727 = vmatpush.bf16.msrb.mxu2 %v6851_v39  ;;  %v7152_v41 = vld [vmem:[#allocation5 + $0xa78] sm:$0xf0]  ;;  %v8867_v39 = vld [vmem:[#allocation5 + $0xb6c] sm:$0xf]  ;;  %v9869_v59 = vpop.f32.mrf.mxu0 }
 0x244   :  { %4741 = vmatpush.bf16.msrb.mxu3 %v6979_v42  ;;  %4700 = vmatmul.bf16.vlgmr.msrb.gmra.mxu0 %v9654_v58  ;;  %v7443_v58 = vor.u32 %v8907_v61, %v7440_v15  ;;  %v7280_v42 = vld [vmem:[#allocation5 + $0xb78] sm:$0xf0]  ;;  %v8927_v14 = vld [vmem:[#allocation5 + $0xd4c] sm:$0xf] }
 0x245   :  { %4748 = vmatpush.bf16.msra.mxu0 %v7219_v28  ;;  %v8899_v28 = vld [vmem:[#allocation5 + $0xc6c] sm:$0xf]  ;;  %v7120_v15 = vld [vmem:[#allocation5 + $0xa38] sm:$0xf0] }
 0x246   :  { %4728 = vmatmul.bf16.vlgmr.msrb.gmra.mxu2 %v9667_v1  ;;  %4714 = vmatmul.bf16.vlgmr.msrb.gmra.mxu1 %v9660_v7  ;;  %v7571_v1 = vor.u32 %v8939_v60, %v7568_v49  ;;  %v7552_v7 = vld [vmem:[#allocation5 + $0xd98] sm:$0xf0]  ;;  %v8827_v61 = vld [vmem:[#allocation5 + $0xa2c] sm:$0xf]  ;;  %v9873_v60 = vpop.f32.mrf.mxu1 }
 0x247   :  { %4762 = vmatpush.bf16.msra.mxu1 %v7347_v62  ;;  %4776 = vmatpush.bf16.msra.mxu2 %v7475_v13  ;;  %v7555_v35 = vor.u32 %v8935_v31, %v7552_v7  ;;  %v7408_v62 = vld [vmem:[#allocation5 + $0xc78] sm:$0xf0]  ;;  %v7155_v13 = vor.u32 %v8835_v32, %v7152_v41  ;;  %v8823_v31 = vld [vmem:[#allocation5 + $0xa0c] sm:$0xf]  ;;  %v7123_v7 = vor.u32 %v8827_v61, %v7120_v15 }
 0x248   :  { %4790 = vmatpush.bf16.msra.mxu3 %v7603_v16  ;;  %v7283_v16 = vor.u32 %v8867_v39, %v7280_v42  ;;  %v7411_v22 = vor.u32 %v8899_v28, %v7408_v62  ;;  %v8855_v32 = vld [vmem:[#allocation5 + $0xb0c] sm:$0xf]  ;;  %v7232_v41 = vld [vmem:[#allocation5 + $0xb18] sm:$0xf0]  ;;  %v10064_v62 = vperm.slane %v9708_v54, 0 }
 0x249   :  { %4742 = vmatmul.bf16.vlgmr.msrb.gmra.mxu3 %v9673_v9  ;;  %4749 = vmatpush.bf16.msra.mxu0 %v7203_v3  ;;  %v7171_v9 = vor.u32 %v8839_v24, %v7168_v36  ;;  %v7264_v3 = vld [vmem:[#allocation5 + $0xb58] sm:$0xf0]  ;;  %v8891_v36 = vld [vmem:[#allocation5 + $0xc2c] sm:$0xf] }
 0x24a   :  { %v7267_v55 = vor.u32 %v8863_v4, %v7264_v3  ;;  %v7248_v24 = vld [vmem:[#allocation5 + $0xb38] sm:$0xf0]  ;;  %v8887_v39 = vld [vmem:[#allocation5 + $0xc0c] sm:$0xf]  ;;  %v3864_v37 = vadd.f32 %v9719_v38, %v10064_v62  ;;  %v7235_v3 = vor.u32 %v8855_v32, %v7232_v41 }
 0x24b   :  { %4763 = vmatpush.bf16.msra.mxu1 %v7331_v18  ;;  %4777 = vmatpush.bf16.msra.mxu2 %v7459_v45  ;;  %v8895_v18 = vld [vmem:[#allocation5 + $0xc4c] sm:$0xf]  ;;  %v7520_v45 = vld [vmem:[#allocation5 + $0xd58] sm:$0xf0]  ;;  %v9883_v26 = vpop.f32.mrf.mxu0 }
 0x24c   :  { %4791 = vmatpush.bf16.msra.mxu3 %v7587_v19  ;;  %v9871_v19 = vpop.f32.mrf.mxu2  ;;  %v7395_v49 = vor.u32 %v8895_v18, %v7392_v27  ;;  %v7360_v42 = vld [vmem:[#allocation5 + $0xc18] sm:$0xf0]  ;;  %v8919_v28 = vld [vmem:[#allocation5 + $0xd0c] sm:$0xf] }
 0x24d   :  { %4750 = vmatpush.bf16.msra.mxu0 %v7187_v17  ;;  %v7523_v17 = vor.u32 %v8927_v14, %v7520_v45  ;;  %v7488_v50 = vld [vmem:[#allocation5 + $0xd18] sm:$0xf0]  ;;  %v9011_v21 = vld [vmem:[#allocation5 + $0xfec] sm:$0xf]  ;;  %v7363_v54 = vor.u32 %v8887_v39, %v7360_v42 }
 0x24e   :  { %v7984_v18 = vld [vmem:[#allocation5 + $0x10f8] sm:$0xf0]  ;;  %v9075_v27 = vld [vmem:[#allocation5 + $0x11ec] sm:$0xf]  ;;  %v7491_v38 = vor.u32 %v8919_v28, %v7488_v50 }
 0x24f   :  { %4764 = vmatpush.bf16.msra.mxu1 %v7315_v57  ;;  %4778 = vmatpush.bf16.msra.mxu2 %v7443_v58  ;;  %v8859_v57 = vld [vmem:[#allocation5 + $0xb2c] sm:$0xf]  ;;  %v7376_v58 = vld [vmem:[#allocation5 + $0xc38] sm:$0xf0] }
 0x250   :  { %4792 = vmatpush.bf16.msra.mxu3 %v7571_v1  ;;  %v8923_v1 = vld [vmem:[#allocation5 + $0xd2c] sm:$0xf]  ;;  %v8112_v14 = vld [vmem:[#allocation5 + $0x11f8] sm:$0xf0] }
 0x251   :  { %4751 = vmatpush.bf16.msra.mxu0 %v7171_v9  ;;  %v7251_v9 = vor.u32 %v8859_v57, %v7248_v24  ;;  %v8975_v15 = vld [vmem:[#allocation5 + $0xecc] sm:$0xf]  ;;  %v9889_v57 = vpop.f32.mrf.mxu1  ;;  %v7824_v62 = vld [vmem:[#allocation5 + $0xfb8] sm:$0xf0] }
 0x252   :  { %v9003_v28 = vld [vmem:[#allocation5 + $0xfac] sm:$0xf] }
 0x253   :  { %4765 = vmatpush.bf16.msra.mxu1 %v7299_v43  ;;  %4779 = vmatpush.bf16.msra.mxu2 %v7427_v34  ;;  %v7104_v43 = vld [vmem:[#allocation5 + $0xa18] sm:$0xf0]  ;;  %v7379_v34 = vor.u32 %v8891_v36, %v7376_v58  ;;  %v8115_v36 = vor.u32 %v9075_v27, %v8112_v14  ;;  %v9007_v58 = vld [vmem:[#allocation5 + $0xfcc] sm:$0xf] }
 0x254   :  { %4793 = vmatpush.bf16.msra.mxu3 %v7555_v35  ;;  %v7507_v35 = vor.u32 %v8923_v1, %v7504_v56  ;;  %v7107_v4 = vor.u32 %v8823_v31, %v7104_v43  ;;  %v9885_v45 = vpop.f32.mrf.mxu2  ;;  %v7840_v1 = vld [vmem:[#allocation5 + $0xfd8] sm:$0xf0]  ;;  %v9039_v56 = vld [vmem:[#allocation5 + $0x10cc] sm:$0xf]  ;;  %v4368_v31 = vadd.f32 %v9859_v47, %v966_v10  ;;  %v9892_v43 = vpop.f32.mrf.mxu3 }
 0x255   :  { %4752 = vmatpush.bf16.msra.mxu0 %v7155_v13  ;;  %v8979_v13 = vld [vmem:[#allocation5 + $0xeec] sm:$0xf]  ;;  %v7843_v41 = vor.u32 %v9007_v58, %v7840_v1  ;;  %v9896_v47 = vpop.f32.mrf.mxu0  ;;  %v7936_v14 = vld [vmem:[#allocation5 + $0x1098] sm:$0xf0] }
 0x256   :  { %v4382_v50 = vadd.f32 %v9865_v30, %v4368_v31  ;;  %v9031_v27 = vld [vmem:[#allocation5 + $0x108c] sm:$0xf]  ;;  %v7792_v1 = vld [vmem:[#allocation5 + $0xf78] sm:$0xf0] }
 0x257   :  { %4766 = vmatpush.bf16.msra.mxu1 %v7283_v16  ;;  %4780 = vmatpush.bf16.msra.mxu2 %v7411_v22  ;;  %v7728_v16 = vld [vmem:[#allocation5 + $0xef8] sm:$0xf0] }
 0x258   :  { %4794 = vmatpush.bf16.msra.mxu3 %v7539_v33  ;;  %v7856_v22 = vld [vmem:[#allocation5 + $0xff8] sm:$0xf0]  ;;  %v9043_v33 = vld [vmem:[#allocation5 + $0x10ec] sm:$0xf] }
 0x259   :  { %4753 = vmatpush.bf16.msra.mxu0 %v7139_v44  ;;  %v3878_v44 = vadd.f32 %v9721_v40, %v3864_v37  ;;  %v7859_v61 = vor.u32 %v9011_v21, %v7856_v22  ;;  %v7987_v24 = vor.u32 %v9043_v33, %v7984_v18  ;;  %v8096_v40 = vld [vmem:[#allocation5 + $0x11d8] sm:$0xf0]  ;;  %v9035_v37 = vld [vmem:[#allocation5 + $0x10ac] sm:$0xf]  ;;  %v7827_v22 = vor.u32 %v9003_v28, %v7824_v62 }
 0x25a   :  { %v8967_v33 = vld [vmem:[#allocation5 + $0xe8c] sm:$0xf] }
 0x25b   :  { %4767 = vmatpush.bf16.msra.mxu1 %v7267_v55  ;;  %4781 = vmatpush.bf16.msra.mxu2 %v7395_v49  ;;  %v7731_v55 = vor.u32 %v8979_v13, %v7728_v16  ;;  %v7712_v49 = vld [vmem:[#allocation5 + $0xed8] sm:$0xf0]  ;;  %v9067_v13 = vld [vmem:[#allocation5 + $0x11ac] sm:$0xf] }
 0x25c   :  { %4795 = vmatpush.bf16.msra.mxu3 %v7523_v17  ;;  %v4366_v17 = vadd.f32 %v9853_v29, %v966_v10  ;;  %v3892_v29 = vadd.f32 %v9723_v5, %v3878_v44  ;;  %v7715_v32 = vor.u32 %v8975_v15, %v7712_v49  ;;  %v7952_v5 = vld [vmem:[#allocation5 + $0x10b8] sm:$0xf0]  ;;  %v8999_v18 = vld [vmem:[#allocation5 + $0xf8c] sm:$0xf] }
 0x25d   :  { %4754 = vmatpush.bf16.msra.mxu0 %v7123_v7  ;;  %v7968_v7 = vld [vmem:[#allocation5 + $0x10d8] sm:$0xf0]  ;;  %v10065_v44 = vld [vmem:[#allocation28_spill] sm:$0xff] }
 0x25e   :  { %v4380_v39 = vadd.f32 %v9855_v23, %v4366_v17  ;;  %v7971_v10 = vor.u32 %v9039_v56, %v7968_v7  ;;  %v8080_v16 = vld [vmem:[#allocation5 + $0x11b8] sm:$0xf0]  ;;  %v3906_v23 = vadd.f32 %v9725_v11, %v3892_v29  ;;  %v4396_v11 = vadd.f32 %v9871_v19, %v4382_v50  ;;  %v8963_v15 = vld [vmem:[#allocation5 + $0xe6c] sm:$0xf]  ;;  %v9915_v29 = vpop.f32.mrf.mxu0 }
 0x25f   :  { %4768 = vmatpush.bf16.msra.mxu1 %v7251_v9  ;;  %4782 = vmatpush.bf16.msra.mxu2 %v7379_v34  ;;  %v9071_v9 = vld [vmem:[#allocation5 + $0x11cc] sm:$0xf]  ;;  %v7664_v49 = vld [vmem:[#allocation5 + $0xe78] sm:$0xf0] }
 0x260   :  { %4796 = vmatpush.bf16.msra.mxu3 %v7507_v35  ;;  %v8971_v34 = vld [vmem:[#allocation5 + $0xeac] sm:$0xf]  ;;  %v7696_v35 = vld [vmem:[#allocation5 + $0xeb8] sm:$0xf0]  ;;  %v8099_v42 = vor.u32 %v9071_v9, %v8096_v40  ;;  %v4394_v30 = vadd.f32 %v9863_v51, %v4380_v39  ;;  %v4410_v31 = vadd.f32 %v9878_v25, %v4396_v11 }
 0x261   :  { %4755 = vmatpush.bf16.msra.mxu0 %v7107_v4  ;;  %v7699_v21 = vor.u32 %v8971_v34, %v7696_v35  ;;  %v7680_v4 = vld [vmem:[#allocation5 + $0xe98] sm:$0xf0]  ;;  %v8995_v19 = vld [vmem:[#allocation5 + $0xf6c] sm:$0xf] }
 0x262   :  { %v7683_v51 = vor.u32 %v8967_v33, %v7680_v4  ;;  %v4408_v17 = vadd.f32 %v9867_v20, %v4394_v30  ;;  %v9027_v56 = vld [vmem:[#allocation5 + $0x106c] sm:$0xf]  ;;  %v7920_v7 = vld [vmem:[#allocation5 + $0x1078] sm:$0xf0]  ;;  %v7667_v20 = vor.u32 %v8963_v15, %v7664_v49  ;;  %v7795_v34 = vor.u32 %v8995_v19, %v7792_v1 }
 0x263   :  { %4769 = vmatpush.bf16.msra.mxu1 %v7235_v3  ;;  %4783 = vmatpush.bf16.msra.mxu2 %v7363_v54  ;;  %v7955_v3 = vor.u32 %v9035_v37, %v7952_v5  ;;  %v9063_v54 = vld [vmem:[#allocation5 + $0x118c] sm:$0xf]  ;;  %v8048_v40 = vld [vmem:[#allocation5 + $0x1178] sm:$0xf0]  ;;  %v7923_v25 = vor.u32 %v9027_v56, %v7920_v7  ;;  %v4424_v5 = vadd.f32 %v9883_v26, %v4410_v31 }
 0x264   :  { %4797 = vmatpush.bf16.msra.mxu3 %v7491_v38  ;;  %4756 = vmatmul.bf16.vlgmr.msra.gmra.mxu0 %v9670_v2  ;;  %v9905_v2 = vpop.f32.mrf.mxu2  ;;  %v8064_v38 = vld [vmem:[#allocation5 + $0x1198] sm:$0xf0]  ;;  %v9059_v9 = vld [vmem:[#allocation5 + $0x116c] sm:$0xf] }
 0x265   :  { %4804 = vmatpush.bf16.msrb.mxu0 %v7731_v55  ;;  %v3920_v55 = vadd.f32 %v10065_v44, %v3906_v23  ;;  %v8067_v58 = vor.u32 %v9063_v54, %v8064_v38  ;;  %v8959_v35 = vld [vmem:[#allocation5 + $0xe4c] sm:$0xf]  ;;  %v7648_v39 = vld [vmem:[#allocation5 + $0xe58] sm:$0xf0]  ;;  %v8051_v28 = vor.u32 %v9059_v9, %v8048_v40  ;;  %v4438_v54 = vadd.f32 %v9889_v57, %v4424_v5 }
 0x266   :  { %4784 = vmatmul.bf16.vlgmr.msra.gmra.mxu2 %v9683_v52  ;;  %4770 = vmatmul.bf16.vlgmr.msra.gmra.mxu1 %v9676_v48  ;;  %v9907_v52 = vpop.f32.mrf.mxu1  ;;  %v8083_v48 = vor.u32 %v9067_v13, %v8080_v16  ;;  %v8991_v62 = vld [vmem:[#allocation5 + $0xf4c] sm:$0xf]  ;;  %v7776_v37 = vld [vmem:[#allocation5 + $0xf58] sm:$0xf0]  ;;  %v9930_v15 = vpop.f32.mrf.mxu0 }
 0x267   :  { %4818 = vmatpush.bf16.msrb.mxu1 %v7859_v61  ;;  %4832 = vmatpush.bf16.msrb.mxu2 %v7987_v24  ;;  %v9912_v24 = vpop.f32.mrf.mxu3  ;;  %v9023_v50 = vld [vmem:[#allocation5 + $0x104c] sm:$0xf]  ;;  %v7904_v13 = vld [vmem:[#allocation5 + $0x1058] sm:$0xf0]  ;;  %v7779_v4 = vor.u32 %v8991_v62, %v7776_v37  ;;  %v8310_v37 = vld [vmem:[#allocation8 + $0x170] sm:$0xf] }
 0x268   :  { %4846 = vmatpush.bf16.msrb.mxu3 %v8115_v36  ;;  %v7939_v36 = vor.u32 %v9031_v27, %v7936_v14  ;;  %v9055_v16 = vld [vmem:[#allocation5 + $0x114c] sm:$0xf]  ;;  %v8032_v23 = vld [vmem:[#allocation5 + $0x1158] sm:$0xf0]  ;;  %v7907_v26 = vor.u32 %v9023_v50, %v7904_v13 }
 0x269   :  { %4798 = vmatmul.bf16.vlgmr.msra.gmra.mxu3 %v9689_v63  ;;  %4805 = vmatpush.bf16.msrb.mxu0 %v7715_v32  ;;  %v7808_v63 = vld [vmem:[#allocation5 + $0xf98] sm:$0xf0]  ;;  %v10066_v32 = vld [vmem:[#allocation29_spill] sm:$0xff]  ;;  %v8955_v30 = vld [vmem:[#allocation5 + $0xe2c] sm:$0xf] }
 0x26a   :  { %v7811_v61 = vor.u32 %v8999_v18, %v7808_v63  ;;  %v8035_v63 = vor.u32 %v9055_v16, %v8032_v23  ;;  %v8987_v27 = vld [vmem:[#allocation5 + $0xf2c] sm:$0xf]  ;;  %v7760_v11 = vld [vmem:[#allocation5 + $0xf38] sm:$0xf0] }
 0x26b   :  { %4819 = vmatpush.bf16.msrb.mxu1 %v7843_v41  ;;  %4833 = vmatpush.bf16.msrb.mxu2 %v7971_v10  ;;  %v3934_v41 = vadd.f32 %v10066_v32, %v3920_v55  ;;  %v4422_v10 = vadd.f32 %v9869_v59, %v4408_v17  ;;  %v7651_v59 = vor.u32 %v8959_v35, %v7648_v39  ;;  %v9019_v14 = vld [vmem:[#allocation5 + $0x102c] sm:$0xf]  ;;  %v7888_v38 = vld [vmem:[#allocation5 + $0x1038] sm:$0xf0] }
 0x26c   :  { %4847 = vmatpush.bf16.msrb.mxu3 %v8099_v42  ;;  %v9919_v42 = vpop.f32.mrf.mxu2  ;;  %v9051_v44 = vld [vmem:[#allocation5 + $0x112c] sm:$0xf]  ;;  %v8016_v55 = vld [vmem:[#allocation5 + $0x1138] sm:$0xf0]  ;;  %v7763_v17 = vor.u32 %v8987_v27, %v7760_v11  ;;  %v7891_v57 = vor.u32 %v9019_v14, %v7888_v38 }
 0x26d   :  { %4806 = vmatpush.bf16.msrb.mxu0 %v7699_v21  ;;  %v10067_v21 = vld [vmem:[#allocation30_spill] sm:$0xff]  ;;  %v8983_v19 = vld [vmem:[#allocation5 + $0xf0c] sm:$0xf]  ;;  %v8019_v56 = vor.u32 %v9051_v44, %v8016_v55  ;;  %v8166_v55 = vld [vmem:[#allocation8 + $0x50] sm:$0xf] }
 0x26e   :  { %v9923_v33 = vpop.f32.mrf.mxu1  ;;  %v7744_v31 = vld [vmem:[#allocation5 + $0xf18] sm:$0xf0]  ;;  %v9015_v7 = vld [vmem:[#allocation5 + $0x100c] sm:$0xf]  ;;  %v4535_v38 = vpop.f32.mrf.mxu0 }
 0x26f   :  { %4820 = vmatpush.bf16.msrb.mxu1 %v7827_v22  ;;  %4834 = vmatpush.bf16.msrb.mxu2 %v7955_v3  ;;  %v3948_v22 = vadd.f32 %v10067_v21, %v3934_v41  ;;  %v7632_v3 = vld [vmem:[#allocation5 + $0xe38] sm:$0xf0]  ;;  %v9926_v18 = vpop.f32.mrf.mxu3  ;;  %v9047_v40 = vld [vmem:[#allocation5 + $0x110c] sm:$0xf]  ;;  %v8182_v41 = vld [vmem:[#allocation8 + $0x70] sm:$0xf]  ;;  %v7747_v62 = vor.u32 %v8983_v19, %v7744_v31 }
 0x270   :  { %4848 = vmatpush.bf16.msrb.mxu3 %v8083_v48  ;;  %v4436_v48 = vadd.f32 %v9873_v60, %v4422_v10  ;;  %v4452_v60 = vadd.f32 %v9905_v2, %v4438_v54  ;;  %v7635_v49 = vor.u32 %v8955_v30, %v7632_v3  ;;  %v7872_v9 = vld [vmem:[#allocation5 + $0x1018] sm:$0xf0]  ;;  %v10069_v2 = vld [vmem:[#allocation32_spill] sm:$0xff]  ;;  %v8246_v10 = vld [vmem:[#allocation8 + $0xf0] sm:$0xf] }
 0x271   :  { %4807 = vmatpush.bf16.msrb.mxu0 %v7683_v51  ;;  %v10068_v51 = vld [vmem:[#allocation31_spill] sm:$0xff]  ;;  %v8000_v32 = vld [vmem:[#allocation5 + $0x1118] sm:$0xf0]  ;;  %v7875_v13 = vor.u32 %v9015_v7, %v7872_v9  ;;  %v9107_v27 = vld [vmem:[#allocation8 + $0xe4] sm:$0xf0] }
 0x272   :  { %v4450_v1 = vadd.f32 %v9885_v45, %v4436_v48  ;;  %v9093_v39 = vld [vmem:[#allocation8 + $0x74] sm:$0xf0]  ;;  %v4466_v45 = vadd.f32 %v9912_v24, %v4452_v60  ;;  %v8003_v16 = vor.u32 %v9047_v40, %v8000_v32  ;;  %v9123_v11 = vld [vmem:[#allocation8 + $0x164] sm:$0xf0]  ;;  %v8158_v7 = vld [vmem:[#allocation8 + $0x40] sm:$0xf] }
 0x273   :  { %4821 = vmatpush.bf16.msrb.mxu1 %v7811_v61  ;;  %4835 = vmatpush.bf16.msrb.mxu2 %v7939_v36  ;;  %v3962_v61 = vadd.f32 %v10068_v51, %v3948_v22  ;;  %v8951_v36 = vld [vmem:[#allocation5 + $0xe0c] sm:$0xf]  ;;  %v9125_v50 = vld [vmem:[#allocation8 + $0x174] sm:$0xf0]  ;;  %v8183_v21 = vor.u32 %v9093_v39, %v8182_v41  ;;  %v8222_v41 = vld [vmem:[#allocation8 + $0xc0] sm:$0xf] }
 0x274   :  { %4849 = vmatpush.bf16.msrb.mxu3 %v8067_v58  ;;  %v7616_v58 = vld [vmem:[#allocation5 + $0xe18] sm:$0xf0]  ;;  %v4464_v5 = vadd.f32 %v9892_v43, %v4450_v1  ;;  %v4480_v23 = vadd.f32 %v9915_v29, %v4466_v45  ;;  %v8311_v48 = vor.u32 %v9125_v50, %v8310_v37  ;;  %v8302_v43 = vld [vmem:[#allocation8 + $0x160] sm:$0xf]  ;;  %v10073_v9 = vld [vmem:[#allocation36_spill] sm:$0xff] }
 0x275   :  { %4808 = vmatpush.bf16.msrb.mxu0 %v7667_v20  ;;  %v3976_v20 = vadd.f32 %v10069_v2, %v3962_v61  ;;  %v10071_v14 = vld [vmem:[#allocation34_spill] sm:$0xff]  ;;  %v8303_v60 = vor.u32 %v9123_v11, %v8302_v43  ;;  %v10072_v1 = vld [vmem:[#allocation35_spill] sm:$0xff]  ;;  %v9103_v2 = vld [vmem:[#allocation8 + $0xc4] sm:$0xf0] }
 0x276   :  { %v9935_v35 = vpop.f32.mrf.mxu1  ;;  %v4478_v24 = vadd.f32 %v9896_v47, %v4464_v5  ;;  %v4494_v29 = vadd.f32 %v9923_v33, %v4480_v23  ;;  %v8294_v33 = vld [vmem:[#allocation8 + $0x150] sm:$0xf]  ;;  %v9121_v19 = vld [vmem:[#allocation8 + $0x154] sm:$0xf0]  ;;  %v9119_v39 = vld [vmem:[#allocation8 + $0x144] sm:$0xf0]  ;;  %v8223_v45 = vor.u32 %v9103_v2, %v8222_v41 }
 0x277   :  { %4822 = vmatpush.bf16.msrb.mxu1 %v7795_v34  ;;  %4836 = vmatpush.bf16.msrb.mxu2 %v7923_v25  ;;  %v4507_v34 = vpop.f32.mrf.mxu2  ;;  %v9109_v25 = vld [vmem:[#allocation8 + $0xf4] sm:$0xf0]  ;;  %v4521_v3 = vpop.f32.mrf.mxu3  ;;  %v8206_v43 = vld [vmem:[#allocation8 + $0xa0] sm:$0xf]  ;;  %v9099_v11 = vld [vmem:[#allocation8 + $0xa4] sm:$0xf0] }
 0x278   :  { %4850 = vmatpush.bf16.msrb.mxu3 %v8051_v28  ;;  %v7619_v28 = vor.u32 %v8951_v36, %v7616_v58  ;;  %v8247_v22 = vor.u32 %v9109_v25, %v8246_v10  ;;  %v4492_v51 = vadd.f32 %v9907_v52, %v4478_v24  ;;  %v9105_v36 = vld [vmem:[#allocation8 + $0xd4] sm:$0xf0]  ;;  %v4508_v58 = vadd.f32 %v4507_v34, %v4494_v29  ;;  %v8286_v34 = vld [vmem:[#allocation8 + $0x140] sm:$0xf] }
 0x279   :  { %4809 = vmatpush.bf16.msrb.mxu0 %v7651_v59  ;;  %v8174_v59 = vld [vmem:[#allocation8 + $0x60] sm:$0xf]  ;;  %v8287_v5 = vor.u32 %v9119_v39, %v8286_v34  ;;  %v9101_v23 = vld [vmem:[#allocation8 + $0xb4] sm:$0xf0]  ;;  %v9095_v34 = vld [vmem:[#allocation8 + $0x84] sm:$0xf0] }
 0x27a   :  { %v4506_v52 = vadd.f32 %v9919_v42, %v4492_v51  ;;  %v10076_v29 = vld [vmem:[#allocation39_spill] sm:$0xff] }
 0x27b   :  { %4823 = vmatpush.bf16.msrb.mxu1 %v7779_v4  ;;  %4837 = vmatpush.bf16.msrb.mxu2 %v7907_v26  ;;  %v10070_v4 = vld [vmem:[#allocation33_spill] sm:$0xff]  ;;  %v9091_v26 = vld [vmem:[#allocation8 + $0x64] sm:$0xf0]  ;;  %v8254_v39 = vld [vmem:[#allocation8 + $0x100] sm:$0xf] }
 0x27c   :  { %4851 = vmatpush.bf16.msrb.mxu3 %v8035_v63  ;;  %v3990_v30 = vadd.f32 %v10070_v4, %v3976_v20  ;;  %v8238_v63 = vld [vmem:[#allocation8 + $0xe0] sm:$0xf]  ;;  %v8175_v44 = vor.u32 %v9091_v26, %v8174_v59  ;;  %v4522_v20 = vadd.f32 %v4521_v3, %v4508_v58  ;;  %v4520_v42 = vadd.f32 %v9926_v18, %v4506_v52  ;;  %v10075_v18 = vld [vmem:[#allocation38_spill] sm:$0xff]  ;;  %v8262_v52 = vld [vmem:[#allocation8 + $0x110] sm:$0xf] }
 0x27d   :  { %4810 = vmatpush.bf16.msrb.mxu0 %v7635_v49  ;;  %v8239_v47 = vor.u32 %v9107_v27, %v8238_v63  ;;  %v9089_v49 = vld [vmem:[#allocation8 + $0x54] sm:$0xf0]  ;;  %v8142_v26 = vld [vmem:[#allocation8 + $0x20] sm:$0xf]  ;;  %v9083_v27 = vld [vmem:[#allocation8 + $0x24] sm:$0xf0] }
 0x27e   :  { %v4004_v54 = vadd.f32 %v10071_v14, %v3990_v30  ;;  %v4534_v50 = vadd.f32 %v9930_v15, %v4520_v42  ;;  %v8143_v51 = vor.u32 %v9083_v27, %v8142_v26  ;;  %v9111_v42 = vld [vmem:[#allocation8 + $0x104] sm:$0xf0]  ;;  %v8168_v27 = vld [vmem:[#allocation8 + $0x58] sm:$0xf0] }
 0x27f   :  { %4824 = vmatpush.bf16.msrb.mxu1 %v7763_v17  ;;  %4838 = vmatpush.bf16.msrb.mxu2 %v7891_v57  ;;  %v9945_v61 = vpop.f32.mrf.mxu2  ;;  %v8230_v17 = vld [vmem:[#allocation8 + $0xd0] sm:$0xf]  ;;  %v4575_v32 = vpop.f32.mrf.mxu3  ;;  %v10079_v26 = vld [vmem:[#allocation40_spill] sm:$0xff] }
 0x280   :  { %4852 = vmatpush.bf16.msrb.mxu3 %v8019_v56  ;;  %v4018_v57 = vadd.f32 %v10072_v1, %v4004_v54  ;;  %v4549_v56 = vpop.f32.mrf.mxu1  ;;  %v8231_v31 = vor.u32 %v9105_v36, %v8230_v17  ;;  %v4548_v15 = vadd.f32 %v9935_v35, %v4534_v50  ;;  %v8270_v54 = vld [vmem:[#allocation8 + $0x120] sm:$0xf]  ;;  %v10077_v17 = vld [vmem:[#allocation41_spill] sm:$0xff]  ;;  %v9097_v1 = vld [vmem:[#allocation8 + $0x94] sm:$0xf0]  ;;  %vm4860_vm5 = vcmp.gt.f32.partialorder %v10079_v26, 1.0 }
 0x281   :  { %4811 = vmatpush.bf16.msrb.mxu0 %v7619_v28  ;;  %v9955_v10 = vpop.f32.mrf.mxu0  ;;  %v8150_v28 = vld [vmem:[#allocation8 + $0x30] sm:$0xf] }
 0x282   :  { %v4032_v40 = vadd.f32 %v10073_v9, %v4018_v57  ;;  %v8126_v9 = vld [vmem:[#allocation8] sm:$0xf] }
 0x283   :  { %4825 = vmatpush.bf16.msrb.mxu1 %v7747_v62  ;;  %4839 = vmatpush.bf16.msrb.mxu2 %v7875_v13  ;;  %v10074_v62 = vld [vmem:[#allocation37_spill] sm:$0xff]  ;;  %v9085_v13 = vld [vmem:[#allocation8 + $0x34] sm:$0xf0] }
 0x284   :  { %4853 = vmatpush.bf16.msrb.mxu3 %v8003_v16  ;;  %4812 = vmatmul.bf16.vlgmr.msrb.gmra.mxu0 %v9686_v53  ;;  %v8167_v53 = vor.u32 %v9089_v49, %v8166_v55  ;;  %v4046_v37 = vadd.f32 %v10074_v62, %v4032_v40  ;;  %v8214_v16 = vld [vmem:[#allocation8 + $0xb0] sm:$0xf]  ;;  %v8151_v3 = vor.u32 %v9085_v13, %v8150_v28  ;;  %v9079_v40 = vld [vmem:[#allocation8 + $0x4] sm:$0xf0]  ;;  %v8248_v28 = vld [vmem:[#allocation8 + $0xf8] sm:$0xf0] }
 0x285   :  { %5278 = vmatpush.bf16.msra.mxu0 %v8183_v21  ;;  %v8278_v21 = vld [vmem:[#allocation8 + $0x130] sm:$0xf]  ;;  %v9124_v62 = vld [vmem:[#allocation8 + $0x174] sm:$0xf] }
 0x286   :  { %4826 = vmatmul.bf16.vlgmr.msrb.gmra.mxu1 %v9692_v0  ;;  %4840 = vmatmul.bf16.vlgmr.msrb.gmra.mxu2 %v9699_v8  ;;  %v8295_v0 = vor.u32 %v9121_v19, %v8294_v33  ;;  %v9087_v8 = vld [vmem:[#allocation8 + $0x44] sm:$0xf0]  ;;  %v4060_v59 = vadd.f32 %v10075_v18, %v4046_v37  ;;  %v8134_v49 = vld [vmem:[#allocation8 + $0x10] sm:$0xf]  ;;  %v9081_v33 = vld [vmem:[#allocation8 + $0x14] sm:$0xf0] }
 0x287   :  { %5292 = vmatpush.bf16.msra.mxu1 %v8247_v22  ;;  %5306 = vmatpush.bf16.msra.mxu2 %v8311_v48  ;;  %v8159_v25 = vor.u32 %v9087_v8, %v8158_v7  ;;  %v9117_v22 = vld [vmem:[#allocation8 + $0x134] sm:$0xf0]  ;;  %v4563_v4 = vpop.f32.mrf.mxu2  ;;  %v8215_v48 = vor.u32 %v9101_v23, %v8214_v16  ;;  %v4577_v55 = vpop.f32.mrf.mxu3  ;;  %v8198_v19 = vld [vmem:[#allocation8 + $0x90] sm:$0xf]  ;;  %v8312_v37 = vld [vmem:[#allocation8 + $0x178] sm:$0xf0]  ;;  %v8255_v16 = vor.u32 %v9111_v42, %v8254_v39 }
 0x288   :  { %4854 = vmatmul.bf16.vlgmr.msrb.gmra.mxu3 %v9702_v12  ;;  %v4536_v12 = vadd.f32 %v4535_v38, %v4522_v20  ;;  %v9960_v30 = vpop.f32.mrf.mxu1  ;;  %v8279_v63 = vor.u32 %v9117_v22, %v8278_v21  ;;  %v9115_v38 = vld [vmem:[#allocation8 + $0x124] sm:$0xf0]  ;;  %v8199_v7 = vor.u32 %v9097_v1, %v8198_v19  ;;  %v10078_v8 = vld [vmem:[#allocation42_spill] sm:$0xff]  ;;  %v8315_v18 = vor.u32 %v9124_v62, %v8312_v37  ;;  %v8272_v39 = vld [vmem:[#allocation8 + $0x128] sm:$0xf0] }
 0x289   :  { %5279 = vmatpush.bf16.msra.mxu0 %v8175_v44  ;;  %v4074_v44 = vadd.f32 %v10076_v29, %v4060_v59  ;;  %v4591_v36 = vpop.f32.mrf.mxu0  ;;  %v8271_v58 = vor.u32 %v9115_v38, %v8270_v54  ;;  %v8176_v59 = vld [vmem:[#allocation8 + $0x68] sm:$0xf0]  ;;  %v8232_v54 = vld [vmem:[#allocation8 + $0xd8] sm:$0xf0]  ;;  %v9514_v29 = vmov 1.0|1.0  }
 0x28a   :  { %v4550_v24 = vadd.f32 %v4549_v56, %v4536_v12  ;;  %v9113_v56 = vld [vmem:[#allocation8 + $0x114] sm:$0xf0]  ;;  %v8200_v62 = vld [vmem:[#allocation8 + $0x98] sm:$0xf0]  ;;  %v9112_v37 = vld [vmem:[#allocation8 + $0x114] sm:$0xf] }
 0x28b   :  { %5293 = vmatpush.bf16.msra.mxu1 %v8239_v47  ;;  %5307 = vmatpush.bf16.msra.mxu2 %v8303_v60  ;;  %v4562_v47 = vadd.f32 %v9945_v61, %v4548_v15  ;;  %v8207_v60 = vor.u32 %v9099_v11, %v8206_v43  ;;  %v4088_v35 = vadd.f32 %v10077_v17, %v4074_v44  ;;  %v9120_v44 = vld [vmem:[#allocation8 + $0x154] sm:$0xf]  ;;  %v8160_v17 = vld [vmem:[#allocation8 + $0x48] sm:$0xf0]  ;;  %v967_v38 = vperm.slane %v9875_v6, 3 }
 0x28c   :  { %v4564_v14 = vadd.f32 %v4563_v4, %v4550_v24  ;;  %v8135_v61 = vor.u32 %v9081_v33, %v8134_v49  ;;  %v8263_v20 = vor.u32 %v9113_v56, %v8262_v52  ;;  %v9106_v4 = vld [vmem:[#allocation8 + $0xe4] sm:$0xf]  ;;  %v8240_v24 = vld [vmem:[#allocation8 + $0xe8] sm:$0xf0]  ;;  %v9084_v52 = vld [vmem:[#allocation8 + $0x34] sm:$0xf] }
 0x28d   :  { %5280 = vmatpush.bf16.msra.mxu0 %v8167_v53  ;;  %v4576_v53 = vadd.f32 %v4575_v32, %v4562_v47  ;;  %v4102_v41 = vadd.f32 %v10078_v8, %v4088_v35  ;;  %v8184_v32 = vld [vmem:[#allocation8 + $0x78] sm:$0xf0]  ;;  %v8243_v43 = vor.u32 %v9106_v4, %v8240_v24  ;;  %v9086_v49 = vld [vmem:[#allocation8 + $0x44] sm:$0xf]  ;;  %v8288_v33 = vld [vmem:[#allocation8 + $0x148] sm:$0xf0] }
 0x28e   :  { %v4578_v57 = vadd.f32 %v4577_v55, %v4564_v14  ;;  %v9104_v14 = vld [vmem:[#allocation8 + $0xd4] sm:$0xf]  ;;  %v8296_v47 = vld [vmem:[#allocation8 + $0x158] sm:$0xf0]  ;;  %v9102_v35 = vld [vmem:[#allocation8 + $0xc4] sm:$0xf]  ;;  %v8163_v19 = vor.u32 %v9086_v49, %v8160_v17 }
 0x28f   :  { %5294 = vmatpush.bf16.msra.mxu1 %v8231_v31  ;;  %5308 = vmatpush.bf16.msra.mxu2 %v8295_v0  ;;  %v8190_v0 = vld [vmem:[#allocation8 + $0x80] sm:$0xf]  ;;  %v4590_v12 = vadd.f32 %v9955_v10, %v4576_v53  ;;  %vm4864_vm3 = vcmp.gt.f32.partialorder %v4102_v41, 1.0  ;;  %v9090_v10 = vld [vmem:[#allocation8 + $0x64] sm:$0xf]  ;;  %v4631_v26 = vpop.f32.mrf.mxu3 }
 0x290   :  { %v4592_v31 = vadd.f32 %v4591_v36, %v4578_v57  ;;  %v4605_v2 = vpop.f32.mrf.mxu1  ;;  %v8191_v13 = vor.u32 %v9095_v34, %v8190_v0  ;;  %v8179_v15 = vor.u32 %v9090_v10, %v8176_v59  ;;  %vm9971_vm6 = vmpackc.low %vm4864_vm3, %vm4860_vm5  ;;  %v8224_v36 = vld [vmem:[#allocation8 + $0xc8] sm:$0xf0]  ;;  %v8152_v56 = vld [vmem:[#allocation8 + $0x38] sm:$0xf0]  ;;  %vm5666_vm3 = vcmask 1040384  }
 0x291   :  { %5281 = vmatpush.bf16.msra.mxu0 %v8159_v25  ;;  %v9092_v25 = vld [vmem:[#allocation8 + $0x74] sm:$0xf]  ;;  %v4604_v21 = vadd.f32 %v9960_v30, %v4590_v12  ;;  %v8227_v1 = vor.u32 %v9102_v35, %v8224_v36  ;;  %v9082_v8 = vld [vmem:[#allocation8 + $0x24] sm:$0xf]  ;;  %v8144_v41 = vld [vmem:[#allocation8 + $0x28] sm:$0xf0] }
 0x292   :  { %v4606_v50 = vadd.f32 %v4605_v2, %v4592_v31  ;;  %v8187_v23 = vor.u32 %v9092_v25, %v8184_v32  ;;  %v9100_v53 = vld [vmem:[#allocation8 + $0xb4] sm:$0xf]  ;;  %v8216_v31 = vld [vmem:[#allocation8 + $0xb8] sm:$0xf0]  ;;  %v9098_v2 = vld [vmem:[#allocation8 + $0xa4] sm:$0xf]  ;;  %v8147_v42 = vor.u32 %v9082_v8, %v8144_v41 }
 0x293   :  { %5295 = vmatpush.bf16.msra.mxu1 %v8223_v45  ;;  %5309 = vmatpush.bf16.msra.mxu2 %v8287_v5  ;;  %v9108_v45 = vld [vmem:[#allocation8 + $0xf4] sm:$0xf]  ;;  %v8127_v5 = vor.u32 %v9079_v40, %v8126_v9  ;;  %vm4862_vm7 = vcmp.gt.f32.partialorder %v4604_v21, 1.0  ;;  %v8155_v9 = vor.u32 %v9084_v52, %v8152_v56  ;;  %v8219_v40 = vor.u32 %v9100_v53, %v8216_v31  ;;  %v9114_v34 = vld [vmem:[#allocation8 + $0x124] sm:$0xf] }
 0x294   :  { %v8251_v22 = vor.u32 %v9108_v45, %v8248_v28  ;;  %vm4866_vm4 = vcmp.gt.f32.partialorder %v4606_v50, 1.0  ;;  %v8275_v25 = vor.u32 %v9114_v34, %v8272_v39  ;;  %v9080_v32 = vld [vmem:[#allocation8 + $0x14] sm:$0xf]  ;;  %v8136_v45 = vld [vmem:[#allocation8 + $0x18] sm:$0xf0]  ;;  %vm5674_vm5 = vcmask 1042434  }
 0x295   :  { %5282 = vmatpush.bf16.msra.mxu0 %v8151_v3  ;;  %v9122_v3 = vld [vmem:[#allocation8 + $0x164] sm:$0xf]  ;;  %vm9976_vm8 = vmpackc.low %vm4866_vm4, %vm4862_vm7  ;;  %v9096_v28 = vld [vmem:[#allocation8 + $0x94] sm:$0xf]  ;;  %vm5670_vm4 = vcmask 1041409  }
 0x296   :  { %v8264_v50 = vld [vmem:[#allocation8 + $0x118] sm:$0xf0]  ;;  %v8128_v21 = vld [vmem:[#allocation8 + $0x8] sm:$0xf0]  ;;  %v9110_v10 = vld [vmem:[#allocation8 + $0x104] sm:$0xf] }
 0x297   :  { %5296 = vmatpush.bf16.msra.mxu1 %v8215_v48  ;;  %5310 = vmatpush.bf16.msra.mxu2 %v8279_v63  ;;  %v8304_v48 = vld [vmem:[#allocation8 + $0x168] sm:$0xf0]  ;;  %v9088_v63 = vld [vmem:[#allocation8 + $0x54] sm:$0xf]  ;;  %v8350_v35 = vld [vmem:[#allocation8 + $0x1c0] sm:$0xf] }
 0x298   :  { %v8307_v11 = vor.u32 %v9122_v3, %v8304_v48  ;;  %v8171_v55 = vor.u32 %v9088_v63, %v8168_v27  ;;  %v8256_v59 = vld [vmem:[#allocation8 + $0x108] sm:$0xf0]  ;;  %v4617_v48 = vpop.f32.mrf.mxu2  ;;  %v4633_v63 = vpop.f32.mrf.mxu3  ;;  %v9135_v36 = vld [vmem:[#allocation8 + $0x1c4] sm:$0xf0]  ;;  %v8334_v56 = vld [vmem:[#allocation8 + $0x1a0] sm:$0xf] }
 0x299   :  { %5283 = vmatpush.bf16.msra.mxu0 %v8143_v51  ;;  %v8235_v51 = vor.u32 %v9104_v14, %v8232_v54  ;;  %v8259_v3 = vor.u32 %v9110_v10, %v8256_v59  ;;  %v9131_v53 = vld [vmem:[#allocation8 + $0x1a4] sm:$0xf0]  ;;  %v9129_v34 = vld [vmem:[#allocation8 + $0x194] sm:$0xf0]  ;;  %v8318_v39 = vld [vmem:[#allocation8 + $0x180] sm:$0xf] }
 0x29a   :  { %v8368_v10 = vld [vmem:[#allocation8 + $0x1e8] sm:$0xf0] }
 0x29b   :  { %5297 = vmatpush.bf16.msra.mxu1 %v8207_v60  ;;  %5311 = vmatpush.bf16.msra.mxu2 %v8271_v58  ;;  %v8299_v60 = vor.u32 %v9120_v44, %v8296_v47  ;;  %v9118_v58 = vld [vmem:[#allocation8 + $0x144] sm:$0xf]  ;;  %v8366_v44 = vld [vmem:[#allocation8 + $0x1e0] sm:$0xf]  ;;  %v9139_v47 = vld [vmem:[#allocation8 + $0x1e4] sm:$0xf0] }
 0x29c   :  { %v8291_v57 = vor.u32 %v9118_v58, %v8288_v33  ;;  %v8367_v30 = vor.u32 %v9139_v47, %v8366_v44  ;;  %v8351_v58 = vor.u32 %v9135_v36, %v8350_v35  ;;  %v8342_v33 = vld [vmem:[#allocation8 + $0x1b0] sm:$0xf]  ;;  %v9134_v47 = vld [vmem:[#allocation8 + $0x1c4] sm:$0xf] }
 0x29d   :  { %5284 = vmatpush.bf16.msra.mxu0 %v8135_v61  ;;  %v9116_v61 = vld [vmem:[#allocation8 + $0x134] sm:$0xf] }
 0x29f   :  { %5298 = vmatpush.bf16.msra.mxu1 %v8199_v7  ;;  %5312 = vmatpush.bf16.msra.mxu2 %v8263_v20  ;;  %v8280_v7 = vld [vmem:[#allocation8 + $0x138] sm:$0xf0]  ;;  %v8208_v20 = vld [vmem:[#allocation8 + $0xa8] sm:$0xf0] }
 0x2a0   :  { %v8283_v0 = vor.u32 %v9116_v61, %v8280_v7  ;;  %v8211_v12 = vor.u32 %v9098_v2, %v8208_v20  ;;  %v8326_v20 = vld [vmem:[#allocation8 + $0x190] sm:$0xf] }
 0x2a1   :  { %5285 = vmatpush.bf16.msra.mxu0 %v8127_v5  ;;  %v8139_v5 = vor.u32 %v9080_v32, %v8136_v45  ;;  %v4645_v27 = vpop.f32.mrf.mxu0  ;;  %v9127_v32 = vld [vmem:[#allocation8 + $0x184] sm:$0xf0] }
 0x2a3   :  { %5299 = vmatpush.bf16.msra.mxu1 %v8191_v13  ;;  %5313 = vmatpush.bf16.msra.mxu2 %v8255_v16  ;;  %v8203_v13 = vor.u32 %v9096_v28, %v8200_v62  ;;  %v8267_v16 = vor.u32 %v9112_v37, %v8264_v50  ;;  %v4659_v54 = vpop.f32.mrf.mxu1  ;;  %v8319_v62 = vor.u32 %v9127_v32, %v8318_v39 }
 0x2a4   :  { %8381 = vmatmul.msk.bf16.vlgmr.msra.gmra.mxu0 %vm9971_vm6, %v9514_v29 }
 0x2a5   :  { %5334 = vmatpush.bf16.msrb.mxu0 %v8187_v23  ;;  %v9078_v23 = vld [vmem:[#allocation8 + $0x4] sm:$0xf] }
 0x2a6   :  { %8383 = vmatmul.msk.bf16.vlgmr.msra.gmra.mxu1 %vm9841_vm2, %v9514_v29  ;;  %8385 = vmatmul.msk.bf16.vlgmr.msra.gmra.mxu2 %vm9976_vm8, %v9514_v29  ;;  %v8131_v4 = vor.u32 %v9078_v23, %v8128_v21 }
 0x2a7   :  { %5348 = vmatpush.bf16.msrb.mxu1 %v8251_v22  ;;  %5362 = vmatpush.bf16.msrb.mxu2 %v8315_v18  ;;  %v9094_v22 = vld [vmem:[#allocation8 + $0x84] sm:$0xf]  ;;  %v8192_v18 = vld [vmem:[#allocation8 + $0x88] sm:$0xf0] }
 0x2a8   :  { %v8195_v24 = vor.u32 %v9094_v22, %v8192_v18  ;;  %v9138_v18 = vld [vmem:[#allocation8 + $0x1e4] sm:$0xf] }
 0x2a9   :  { %5335 = vmatpush.bf16.msrb.mxu0 %v8179_v15  ;;  %v4619_v15 = vpop.f32.mrf.mxu2  ;;  %v4647_v17 = vpop.f32.mrf.mxu0 }
 0x2aa   :  { %v4620_v6 = vadd.f32 %v4619_v15, %v967_v38 }
 0x2ab   :  { %5349 = vmatpush.bf16.msrb.mxu1 %v8243_v43  ;;  %5363 = vmatpush.bf16.msrb.mxu2 %v8307_v11  ;;  %v8374_v43 = vld [vmem:[#allocation8 + $0x1f0] sm:$0xf]  ;;  %v9141_v11 = vld [vmem:[#allocation8 + $0x1f4] sm:$0xf0] }
 0x2ac   :  { %v8375_v14 = vor.u32 %v9141_v11, %v8374_v43  ;;  %v4634_v41 = vadd.f32 %v4633_v63, %v4620_v6  ;;  %v9136_v43 = vld [vmem:[#allocation8 + $0x1d4] sm:$0xf]  ;;  %v8360_v11 = vld [vmem:[#allocation8 + $0x1d8] sm:$0xf0] }
 0x2ad   :  { %5336 = vmatpush.bf16.msrb.mxu0 %v8171_v55  ;;  %v8328_v6 = vld [vmem:[#allocation8 + $0x198] sm:$0xf0] }
 0x2ae   :  { %5320 = vmatpush.bf16.msra.mxu3 %v8375_v14  ;;  %v4648_v45 = vadd.f32 %v4647_v17, %v4634_v41  ;;  %v8363_v14 = vor.u32 %v9136_v43, %v8360_v11  ;;  %v9126_v41 = vld [vmem:[#allocation8 + $0x184] sm:$0xf] }
 0x2af   :  { %5350 = vmatpush.bf16.msrb.mxu1 %v8235_v51  ;;  %5364 = vmatpush.bf16.msrb.mxu2 %v8299_v60  ;;  %v4687_v51 = vpop.f32.mrf.mxu3  ;;  %v9137_v60 = vld [vmem:[#allocation8 + $0x1d4] sm:$0xf0]  ;;  %v9142_v43 = vld [vmem:[#allocation11] sm:$0xff] }
 0x2b0   :  { %v8359_v49 = vor.u32 %v9137_v60, %v8358_v46  ;;  %v9132_v60 = vld [vmem:[#allocation8 + $0x1b4] sm:$0xf]  ;;  %v9154_v11 = vld [vmem:[#allocation11 + $0x60] sm:$0xff] }
 0x2b1   :  { %5337 = vmatpush.bf16.msrb.mxu0 %v8163_v19  ;;  %v4673_v55 = vpop.f32.mrf.mxu2  ;;  %v9133_v19 = vld [vmem:[#allocation8 + $0x1b4] sm:$0xf0] }
 0x2b2   :  { %5321 = vmatpush.bf16.msra.mxu3 %v8367_v30  ;;  %v8343_v52 = vor.u32 %v9133_v19, %v8342_v33  ;;  %v8352_v30 = vld [vmem:[#allocation8 + $0x1c8] sm:$0xf0]  ;;  %v9130_v33 = vld [vmem:[#allocation8 + $0x1a4] sm:$0xf] }
 0x2b3   :  { %5351 = vmatpush.bf16.msrb.mxu1 %v8227_v1  ;;  %5365 = vmatpush.bf16.msrb.mxu2 %v8291_v57  ;;  %v4661_v1 = vpop.f32.mrf.mxu1  ;;  %v4618_v57 = vadd.f32 %v4617_v48, %v967_v38  ;;  %v8355_v46 = vor.u32 %v9134_v47, %v8352_v30  ;;  %v8336_v19 = vld [vmem:[#allocation8 + $0x1a8] sm:$0xf0]  ;;  %v4952_v30 = vld [vmem:[#allocation10] sm:$0x3] }
 0x2b4   :  { %v9151_v47 = vld [vmem:[#allocation11 + $0x48] sm:$0xff] }
 0x2b5   :  { %5338 = vmatpush.bf16.msrb.mxu0 %v8155_v9  ;;  %v4632_v61 = vadd.f32 %v4631_v26, %v4618_v57 }
 0x2b6   :  { %5322 = vmatpush.bf16.msra.mxu3 %v8359_v49  ;;  %v8344_v49 = vld [vmem:[#allocation8 + $0x1b8] sm:$0xf0] }
 0x2b7   :  { %5352 = vmatpush.bf16.msrb.mxu1 %v8219_v40  ;;  %5366 = vmatpush.bf16.msrb.mxu2 %v8283_v0  ;;  %v4689_v7 = vpop.f32.mrf.mxu3  ;;  %v8335_v40 = vor.u32 %v9131_v53, %v8334_v56  ;;  %v4646_v8 = vadd.f32 %v4645_v27, %v4632_v61  ;;  %v8347_v36 = vor.u32 %v9132_v60, %v8344_v49  ;;  %v9150_v49 = vld [vmem:[#allocation11 + $0x40] sm:$0xff] }
 0x2b9   :  { %5339 = vmatpush.bf16.msrb.mxu0 %v8147_v42  ;;  %v4675_v31 = vpop.f32.mrf.mxu2  ;;  %v4660_v42 = vadd.f32 %v4659_v54, %v4646_v8 }
 0x2ba   :  { %5323 = vmatpush.bf16.msra.mxu3 %v8351_v58 }
 0x2bb   :  { %5353 = vmatpush.bf16.msrb.mxu1 %v8211_v12  ;;  %5367 = vmatpush.bf16.msrb.mxu2 %v8275_v25  ;;  %v8327_v25 = vor.u32 %v9129_v34, %v8326_v20  ;;  %v4674_v37 = vadd.f32 %v4673_v55, %v4660_v42 }
 0x2bd   :  { %5340 = vmatpush.bf16.msrb.mxu0 %v8139_v5  ;;  %v4662_v5 = vadd.f32 %v4661_v1, %v4648_v45  ;;  %v4688_v21 = vadd.f32 %v4687_v51, %v4674_v37 }
 0x2be   :  { %5324 = vmatpush.bf16.msra.mxu3 %v8343_v52  ;;  %v8339_v52 = vor.u32 %v9130_v33, %v8336_v19 }
 0x2bf   :  { %5354 = vmatpush.bf16.msrb.mxu1 %v8203_v13  ;;  %5368 = vmatpush.bf16.msrb.mxu2 %v8267_v16  ;;  %v9140_v13 = vld [vmem:[#allocation8 + $0x1f4] sm:$0xf]  ;;  %v8376_v16 = vld [vmem:[#allocation8 + $0x1f8] sm:$0xf0]  ;;  %v4676_v22 = vadd.f32 %v4675_v31, %v4662_v5 }
 0x2c0   :  { %v8379_v23 = vor.u32 %v9140_v13, %v8376_v16 }
 0x2c1   :  { %5341 = vmatpush.bf16.msrb.mxu0 %v8131_v4  ;;  %v4701_v9 = vpop.f32.mrf.mxu0  ;;  %v8371_v4 = vor.u32 %v9138_v18, %v8368_v10  ;;  %v4690_v26 = vadd.f32 %v4689_v7, %v4676_v22  ;;  %v9149_v10 = vld [vmem:[#allocation11 + $0x38] sm:$0xff] }
 0x2c2   :  { %5325 = vmatpush.bf16.msra.mxu3 %v8335_v40  ;;  %v9128_v40 = vld [vmem:[#allocation8 + $0x194] sm:$0xf] }
 0x2c3   :  { %5355 = vmatpush.bf16.msrb.mxu1 %v8195_v24  ;;  %5369 = vmatpush.bf16.msrb.mxu2 %v8259_v3  ;;  %v4715_v0 = vpop.f32.mrf.mxu1  ;;  %v4702_v24 = vadd.f32 %v4701_v9, %v4688_v21  ;;  %v8331_v8 = vor.u32 %v9128_v40, %v8328_v6 }
 0x2c4   :  { %8389 = vmatmul.msk.bf16.vlgmr.msrb.gmra.mxu0 %vm9971_vm6, %v9514_v29  ;;  %vm5678_vm6 = vcmask 1043459  }
 0x2c5   :  { %v4716_v63 = vadd.f32 %v4715_v0, %v4702_v24  ;;  %5536 = vmatpush.bf16.msra.mxu0 %v9149_v10  ;;  %v9147_v24 = vld [vmem:[#allocation11 + $0x28] sm:$0xff] }
 0x2c6   :  { %8391 = vmatmul.msk.bf16.vlgmr.msrb.gmra.mxu1 %vm9841_vm2, %v9514_v29  ;;  %8393 = vmatmul.msk.bf16.vlgmr.msrb.gmra.mxu2 %vm9976_vm8, %v9514_v29 }
 0x2c7   :  { %5326 = vmatpush.bf16.msra.mxu3 %v8327_v25 }
 0x2c9   :  { %v4729_v2 = vpop.f32.mrf.mxu2  ;;  %v4703_v28 = vpop.f32.mrf.mxu0 }
 0x2ca   :  { %v4704_v27 = vadd.f32 %v4703_v28, %v4690_v26  ;;  %v4730_v54 = vadd.f32 %v4729_v2, %v4716_v63  ;;  %v8320_v2 = vld [vmem:[#allocation8 + $0x188] sm:$0xf0]  ;;  %v9144_v26 = vld [vmem:[#allocation11 + $0x10] sm:$0xff] }
 0x2cb   :  { %v4717_v50 = vpop.f32.mrf.mxu1  ;;  %5327 = vmatpush.bf16.msra.mxu3 %v8319_v62  ;;  %v8323_v42 = vor.u32 %v9126_v41, %v8320_v2  ;;  %v9143_v63 = vld [vmem:[#allocation11 + $0x8] sm:$0xff] }
 0x2cc   :  { %v4743_v12 = vpop.f32.mrf.mxu3  ;;  %v4718_v55 = vadd.f32 %v4717_v50, %v4704_v27  ;;  %v9155_v27 = vld [vmem:[#allocation11 + $0x68] sm:$0xff] }
 0x2cd   :  { %v4744_v38 = vadd.f32 %v4743_v12, %v4730_v54 }
 0x2cf   :  { %5376 = vmatpush.bf16.msrb.mxu3 %v8379_v23 }
 0x2d1   :  { %v4731_v59 = vpop.f32.mrf.mxu2 }
 0x2d2   :  { %v4732_v17 = vadd.f32 %v4731_v59, %v4718_v55  ;;  %v9157_v59 = vld [vmem:[#allocation11 + $0x78] sm:$0xff] }
 0x2d3   :  { %5377 = vmatpush.bf16.msrb.mxu3 %v8371_v4  ;;  %v9148_v4 = vld [vmem:[#allocation11 + $0x30] sm:$0xff]  ;;  %5550 = vmatpush.bf16.msra.mxu1 %v9157_v59  ;;  %v9515_v59 = vmov 0.0  }
 0x2d4   :  { %v4745_v3 = vpop.f32.mrf.mxu3  ;;  %5537 = vmatpush.bf16.msra.mxu0 %v9148_v4 }
 0x2d5   :  { %v4746_v57 = vadd.f32 %v4745_v3, %v4732_v17  ;;  %v9146_v3 = vld [vmem:[#allocation11 + $0x20] sm:$0xff] }
 0x2d7   :  { %5378 = vmatpush.bf16.msrb.mxu3 %v8363_v14  ;;  %v9153_v14 = vld [vmem:[#allocation11 + $0x58] sm:$0xff] }
 0x2d8   :  { %5538 = vmatpush.bf16.msra.mxu0 %v9147_v24 }
 0x2db   :  { %5379 = vmatpush.bf16.msrb.mxu3 %v8355_v46  ;;  %v4954_v46 = vperm.slane %v4952_v30, 0 }
 0x2dc   :  { %5539 = vmatpush.bf16.msra.mxu0 %v9146_v3 }
 0x2df   :  { %5380 = vmatpush.bf16.msrb.mxu3 %v8347_v36 }
 0x2e1   :  { %v4757_v48 = vpop.f32.mrf.mxu0 }
 0x2e2   :  { %v4758_v58 = vadd.f32 %v4757_v48, %v4744_v38  ;;  %v9145_v48 = vld [vmem:[#allocation11 + $0x18] sm:$0xff] }
 0x2e3   :  { %v4771_v15 = vpop.f32.mrf.mxu1  ;;  %5381 = vmatpush.bf16.msrb.mxu3 %v8339_v52  ;;  %5540 = vmatpush.bf16.msra.mxu0 %v9145_v48 }
 0x2e4   :  { %v4772_v56 = vadd.f32 %v4771_v15, %v4758_v58  ;;  %v9156_v15 = vld [vmem:[#allocation11 + $0x70] sm:$0xff] }
 0x2e5   :  { %5551 = vmatpush.bf16.msra.mxu1 %v9156_v15 }
 0x2e7   :  { %5382 = vmatpush.bf16.msrb.mxu3 %v8331_v8  ;;  %5541 = vmatpush.bf16.msra.mxu0 %v9144_v26 }
 0x2e9   :  { %v4785_v44 = vpop.f32.mrf.mxu2  ;;  %v4759_v35 = vpop.f32.mrf.mxu0  ;;  %5552 = vmatpush.bf16.msra.mxu1 %v9155_v27 }
 0x2ea   :  { %v4760_v53 = vadd.f32 %v4759_v35, %v4746_v57  ;;  %v4786_v61 = vadd.f32 %v4785_v44, %v4772_v56  ;;  %v9152_v44 = vld [vmem:[#allocation11 + $0x50] sm:$0xff] }
 0x2eb   :  { %v4773_v1 = vpop.f32.mrf.mxu1  ;;  %5383 = vmatpush.bf16.msrb.mxu3 %v8323_v42  ;;  %5542 = vmatpush.bf16.msra.mxu0 %v9143_v63 }
 0x2ec   :  { %v4799_v51 = vpop.f32.mrf.mxu3  ;;  %v4774_v0 = vadd.f32 %v4773_v1, %v4760_v53 }
 0x2ed   :  { %v4800_v34 = vadd.f32 %v4799_v51, %v4786_v61  ;;  %5553 = vmatpush.bf16.msra.mxu1 %v9154_v11 }
 0x2ef   :  { %5543 = vmatpush.bf16.msra.mxu0 %v9142_v43 }
 0x2f1   :  { %v4787_v31 = vpop.f32.mrf.mxu2  ;;  %5554 = vmatpush.bf16.msra.mxu1 %v9153_v14 }
 0x2f2   :  { %v4788_v39 = vadd.f32 %v4787_v31, %v4774_v0 }
 0x2f4   :  { %v4801_v7 = vpop.f32.mrf.mxu3 }
 0x2f5   :  { %v4802_v32 = vadd.f32 %v4801_v7, %v4788_v39  ;;  %5555 = vmatpush.bf16.msra.mxu1 %v9152_v44 }
 0x2f9   :  { %5556 = vmatpush.bf16.msra.mxu1 %v9151_v47 }
 0x2fd   :  { %5557 = vmatpush.bf16.msra.mxu1 %v9150_v49 }
 0x301   :  { %v4813_v9 = vpop.f32.mrf.mxu0 }
 0x302   :  { %v4814_v12 = vadd.f32 %v4813_v9, %v4800_v34  ;;  %v4955_v9 = vperm.slane %v4952_v30, 1 }
 0x303   :  { %v4827_v20 = vpop.f32.mrf.mxu1 }
 0x304   :  { %v4828_v62 = vadd.f32 %v4827_v20, %v4814_v12 }
 0x309   :  { %v4841_v25 = vpop.f32.mrf.mxu2  ;;  %v4815_v28 = vpop.f32.mrf.mxu0 }
 0x30a   :  { %v4816_v37 = vadd.f32 %v4815_v28, %v4802_v32  ;;  %v4842_v50 = vadd.f32 %v4841_v25, %v4828_v62  ;;  %v9164_v28 = vld [vmem:[#allocation14 + $0x30] sm:$0xff]  ;;  %v9163_v62 = vld [vmem:[#allocation14 + $0x28] sm:$0xff] }
 0x30b   :  { %v4855_v45 = vpop.f32.mrf.mxu3  ;;  %v4829_v5 = vpop.f32.mrf.mxu1 }
 0x30c   :  { %v4830_v13 = vadd.f32 %v4829_v5, %v4816_v37  ;;  %v4856_v23 = vadd.f32 %v4855_v45, %v4842_v50  ;;  %v9165_v45 = vld [vmem:[#allocation14 + $0x38] sm:$0xff]  ;;  %v9162_v37 = vld [vmem:[#allocation14 + $0x20] sm:$0xff]  ;;  %v9160_v5 = vld [vmem:[#allocation14 + $0x10] sm:$0xff] }
 0x30d   :  { %5646 = vmatpush.bf16.msra.mxu2 %v9165_v45  ;;  %v9161_v50 = vld [vmem:[#allocation14 + $0x18] sm:$0xff] }
 0x30e   :  { %vm4863_vm9 = vcmp.gt.f32.partialorder %v4856_v23, 1.0 }
 0x311   :  { %v4843_v16 = vpop.f32.mrf.mxu2  ;;  %5647 = vmatpush.bf16.msra.mxu2 %v9164_v28 }
 0x312   :  { %v4844_v21 = vadd.f32 %v4843_v16, %v4830_v13  ;;  %v9159_v13 = vld [vmem:[#allocation14 + $0x8] sm:$0xff]  ;;  %v9158_v16 = vld [vmem:[#allocation14] sm:$0xff] }
 0x313   :  { %v4857_v22 = vpop.f32.mrf.mxu3 }
 0x314   :  { %v4858_v18 = vadd.f32 %v4857_v22, %v4844_v21  ;;  %v9191_v21 = vld [vmem:[#allocation13] ss:$0 sm:$0xff] }
 0x315   :  { %5648 = vmatpush.bf16.msra.mxu2 %v9163_v62 }
 0x316   :  { %vm4867_vm10 = vcmp.gt.f32.partialorder %v4858_v18, 1.0 }
 0x317   :  { %vm8386_vm11 = vmpackc.low %vm4867_vm10, %vm4863_vm9 }
 0x318   :  { %8387 = vmatmul.msk.bf16.vlgmr.msra.gmra.mxu3 %vm8386_vm11, %v9514_v29 }
 0x319   :  { %5649 = vmatpush.bf16.msra.mxu2 %v9162_v37 }
 0x31d   :  { %5650 = vmatpush.bf16.msra.mxu2 %v9161_v50 }
 0x321   :  { %v5287_v54 = vpop.f32.mrf.mxu0  ;;  %5651 = vmatpush.bf16.msra.mxu2 %v9160_v5 }
 0x322   :  { %v5288_v38 = vadd.f32 %v5287_v54, %v4954_v46 }
 0x323   :  { %v5301_v55 = vpop.f32.mrf.mxu1 }
 0x324   :  { %v5302_v33 = vadd.f32 %v5301_v55, %v5288_v38 }
 0x325   :  { %5652 = vmatpush.bf16.msra.mxu2 %v9159_v13 }
 0x328   :  { %8395 = vmatmul.msk.bf16.vlgmr.msrb.gmra.mxu3 %vm8386_vm11, %v9514_v29 }
 0x329   :  { %v5315_v51 = vpop.f32.mrf.mxu2  ;;  %v5289_v60 = vpop.f32.mrf.mxu0  ;;  %5653 = vmatpush.bf16.msra.mxu2 %v9158_v16 }
 0x32a   :  { %v5290_v35 = vadd.f32 %v5289_v60, %v4954_v46  ;;  %v5316_v1 = vadd.f32 %v5315_v51, %v5302_v33 }
 0x32b   :  { %v5303_v36 = vpop.f32.mrf.mxu1 }
 0x32c   :  { %v5304_v57 = vadd.f32 %v5303_v36, %v5290_v35 }
 0x331   :  { %v5317_v58 = vpop.f32.mrf.mxu2 }
 0x332   :  { %v5318_v52 = vadd.f32 %v5317_v58, %v5304_v57 }
 0x341   :  { %v5343_v19 = vpop.f32.mrf.mxu0 }
 0x342   :  { %v5344_v6 = vadd.f32 %v5343_v19, %v4955_v9  ;;  %v9192_v19 = vld [vmem:[#allocation16] ss:$0 sm:$0xff] }
 0x343   :  { %v5357_v61 = vpop.f32.mrf.mxu1 }
 0x344   :  { %v5358_v41 = vadd.f32 %v5357_v61, %v5344_v6 }
 0x349   :  { %v5371_v7 = vpop.f32.mrf.mxu2  ;;  %v5345_v40 = vpop.f32.mrf.mxu0 }
 0x34a   :  { %v5346_v8 = vadd.f32 %v5345_v40, %v4955_v9  ;;  %v5372_v34 = vadd.f32 %v5371_v7, %v5358_v41 }
 0x34b   :  { %v5359_v2 = vpop.f32.mrf.mxu1 }
 0x34c   :  { %v5360_v39 = vadd.f32 %v5359_v2, %v5346_v8 }
 0x351   :  { %v5373_v20 = vpop.f32.mrf.mxu2 }
 0x352   :  { %v5374_v42 = vadd.f32 %v5373_v20, %v5360_v39 }
 0x39b   :  { %v5329_v17 = vpop.f32.mrf.mxu3 }
 0x39c   :  { %v5330_v56 = vadd.f32 %v5329_v17, %v5316_v1 }
 0x39e   :  { %vm5390_vm12 = vcmp.gt.f32.partialorder %v5330_v56, 1.0 }
 0x3a3   :  { %v5331_v53 = vpop.f32.mrf.mxu3 }
 0x3a4   :  { %v5332_v31 = vadd.f32 %v5331_v53, %v5318_v52 }
 0x3a6   :  { %vm5392_vm13 = vcmp.gt.f32.partialorder %v5332_v31, 1.0 }
 0x3a7   :  { %vm8464_vm14 = vmpackc.low %vm5392_vm13, %vm5390_vm12 }
 0x3a8   :  { %8465 = vmatmul.msk.bf16.vlgmr.msra.gmra.mxu0 %vm8464_vm14, %v9514_v29 }
 0x3ab   :  { %v5385_v0 = vpop.f32.mrf.mxu3 }
 0x3ac   :  { %v5386_v12 = vadd.f32 %v5385_v0, %v5372_v34 }
 0x3ae   :  { %vm5391_vm15 = vcmp.gt.f32.partialorder %v5386_v12, 1.0 }
 0x3b3   :  { %v5387_v25 = vpop.f32.mrf.mxu3 }
 0x3b4   :  { %v5388_v32 = vadd.f32 %v5387_v25, %v5374_v42 }
 0x3b6   :  { %vm5393_vm0 = vcmp.gt.f32.partialorder %v5388_v32, 1.0 }
 0x3b7   :  { %vm8466_vm1 = vmpackc.low %vm5393_vm0, %vm5391_vm15 }
 0x3b8   :  { %8467 = vmatmul.msk.bf16.vlgmr.msra.gmra.mxu1 %vm8466_vm1, %v9514_v29 }
 0x425   :  { %v5545_v23 = vpop.f32.mrf.mxu0 }
 0x426   :  { %v5546_v22 = vadd.f32 %v9191_v21, %v5545_v23 }
 0x42d   :  { %v5547_v10 = vpop.f32.mrf.mxu0 }
 0x42e   :  { %v5548_v3 = vadd.f32 %v9191_v21, %v5547_v10 }
 0x435   :  { %v5559_v29 = vpop.f32.mrf.mxu1 }
 0x436   :  { %v5560_v18 = vadd.f32 %v5559_v29, %v5546_v22 }
 0x438   :  { %vm5564_vm2 = vcmp.gt.f32.partialorder %v5560_v18, 1.0  ;;  %5752 = vst [vmem:[#allocation20] sm:$0xff] %v5560_v18 }
 0x439   :  { %v8468_v4 = vsel %vm5564_vm2, 1.0, %v9515_v59 }
 0x43a   :  { %v5570_v24 = vpack.c.bf16 %v8468_v4, %v8468_v4 }
 0x43c   :  { %v5710_v48 = vrot.slane %v5570_v24, 3  ;;  %v5594_v51 = vunpack.c.l.b16 %v5570_v24 }
 0x43d   :  { %v5561_v26 = vpop.f32.mrf.mxu1 }
 0x43e   :  { %v5562_v15 = vadd.f32 %v5561_v26, %v5548_v3  ;;  %v5714_v63 = vsel %vm5666_vm3, %v5570_v24, %v5710_v48  ;;  %v5715_v27 = vsel %vm5670_vm4, %v5570_v24, %v5710_v48  ;;  %v5718_v43 = vsel %vm5674_vm5, %v5570_v24, %v5710_v48 }
 0x43f   :  { %v5717_v11 = vrot.slane %v5715_v27, 1  ;;  %v5720_v14 = vrot.slane %v5718_v43, 2  ;;  %v5721_v54 = vsel %vm5678_vm6, %v5570_v24, %v5710_v48  ;;  %5744 = vst [vmem:[#allocation18] sm:$0x1] %v5714_v63 }
 0x440   :  { %vm5565_vm7 = vcmp.gt.f32.partialorder %v5562_v15, 1.0  ;;  %5753 = vst [vmem:[#allocation20 + $0x8] sm:$0xff] %v5562_v15  ;;  %v5723_v44 = vrot.slane %v5721_v54, 3 }
 0x441   :  { %v8469_v47 = vsel %vm5565_vm7, 1.0, %v9515_v59  ;;  %5745 = vst [vmem:[#allocation18 + $0x1] sm:$0x1] %v5717_v11 }
 0x442   :  { %v5571_v30 = vpack.c.bf16 %v8469_v47, %v8469_v47  ;;  %5746 = vst [vmem:[#allocation18 + $0x2] sm:$0x1] %v5720_v14 }
 0x443   :  { %5747 = vst [vmem:[#allocation18 + $0x3] sm:$0x1] %v5723_v44 }
 0x444   :  { %v5711_v55 = vrot.slane %v5571_v30, 3  ;;  %v5595_v46 = vunpack.c.l.b16 %v5571_v30 }
 0x446   :  { %v5596_v60 = vpack.c.b16 %v5595_v46, %v5594_v51  ;;  %v5726_v49 = vsel %vm5666_vm3, %v5571_v30, %v5711_v55  ;;  %v5727_v38 = vsel %vm5670_vm4, %v5571_v30, %v5711_v55  ;;  %v5730_v17 = vsel %vm5674_vm5, %v5571_v30, %v5711_v55 }
 0x447   :  { %v5729_v35 = vrot.slane %v5727_v38, 1  ;;  %v5732_v36 = vrot.slane %v5730_v17, 2  ;;  %v5733_v58 = vsel %vm5678_vm6, %v5571_v30, %v5711_v55  ;;  %5748 = vst [vmem:[#allocation18 + $0x4] sm:$0x1] %v5726_v49 }
 0x448   :  { %5654 = vmatmul.bf16.vlgmr.msra.gmra.mxu2 %v5596_v60  ;;  %v5735_v33 = vrot.slane %v5733_v58, 3 }
 0x449   :  { %5749 = vst [vmem:[#allocation18 + $0x5] sm:$0x1] %v5729_v35 }
 0x44a   :  { %5750 = vst [vmem:[#allocation18 + $0x6] sm:$0x1] %v5732_v36 }
 0x44b   :  { %5751 = vst [vmem:[#allocation18 + $0x7] sm:$0x1] %v5735_v33 }
 0x4cb   :  { %v5655_v1 = vpop.f32.mrf.mxu2 }
 0x4cc   :  { %v5656_v57 = vadd.f32 %v9192_v19, %v5655_v1 }
 0x4ce   :  { %v5660_v52 = vpack.c.bf16 %v5656_v57, %v5656_v57 }
 0x4d0   :  { %v5664_v56 = vrot.slane %v5660_v52, 3 }
 0x4d2   :  { %v5669_v53 = vsel %vm5666_vm3, %v5660_v52, %v5664_v56  ;;  %v5671_v31 = vsel %vm5670_vm4, %v5660_v52, %v5664_v56  ;;  %v5675_v61 = vsel %vm5674_vm5, %v5660_v52, %v5664_v56  ;;  %v5679_v7 = vsel %vm5678_vm6, %v5660_v52, %v5664_v56 }
 0x4d3   :  { %v5673_v9 = vrot.slane %v5671_v31, 1  ;;  %v5677_v40 = vrot.slane %v5675_v61, 2  ;;  %v5681_v6 = vrot.slane %v5679_v7, 3  ;;  %5702 = vst [vmem:[#allocation17] sm:$0x1] %v5669_v53  ;;  %v5657_v0 = vpop.f32.mrf.mxu2 }
 0x4d4   :  { %v5658_v8 = vadd.f32 %v9192_v19, %v5657_v0 }
 0x4d5   :  { %5703 = vst [vmem:[#allocation17 + $0x1] sm:$0x1] %v5673_v9 }
 0x4d6   :  { %5704 = vst [vmem:[#allocation17 + $0x2] sm:$0x1] %v5677_v40  ;;  %v5661_v41 = vpack.c.bf16 %v5658_v8, %v5658_v8 }
 0x4d7   :  { %5705 = vst [vmem:[#allocation17 + $0x3] sm:$0x1] %v5681_v6 }
 0x4d8   :  { %v5665_v2 = vrot.slane %v5661_v41, 3 }
 0x4da   :  { %v5684_v20 = vsel %vm5666_vm3, %v5661_v41, %v5665_v2  ;;  %v5685_v34 = vsel %vm5670_vm4, %v5661_v41, %v5665_v2  ;;  %v5688_v39 = vsel %vm5674_vm5, %v5661_v41, %v5665_v2  ;;  %v5691_v42 = vsel %vm5678_vm6, %v5661_v41, %v5665_v2 }
 0x4db   :  { %v5687_v12 = vrot.slane %v5685_v34, 1  ;;  %v5690_v25 = vrot.slane %v5688_v39, 2  ;;  %v5693_v32 = vrot.slane %v5691_v42, 3  ;;  %5706 = vst [vmem:[#allocation17 + $0x4] sm:$0x1] %v5684_v20 }
 0x4dd   :  { %5707 = vst [vmem:[#allocation17 + $0x5] sm:$0x1] %v5687_v12 }
 0x4de   :  { %5708 = vst [vmem:[#allocation17 + $0x6] sm:$0x1] %v5690_v25 }
 0x4df   :  { %5709 = vst [vmem:[#allocation17 + $0x7] sm:$0x1] %v5693_v32 }
 0x4e0   :  { %5757 = vsyncadd [#allocation4], 112  ;;  %s5760_s24 = sshll.u32 %s10041_s9, 4  ;;  %s9516_s5 = smov [#allocation17]   ;;  %s5761_s24 = int_to_ptr.hbm [resolvable:$true] %s5760_s24 }
 0x4e1   :  { %s5758_s25 = sshll.u32 %s9516_s5, 4  ;;  %s9517_s27 = smov 1   ;;  %s5759_s25 = int_to_ptr.vmem [resolvable:$true] %s5758_s25 }
 0x4e2   :  { %5766 = dma.vmem_to_hbm [thread:$0]  %s5759_s25, 16, %s5761_s24, [#allocation4], %s9499_s26, %s9499_s26, %s9517_s27  }
 0x4e3   :  { %5770 = vsyncadd [#allocation19], 112  ;;  %s5773_s29 = sshll.u32 %s10042_s10, 4  ;;  %s9518_s30 = smov [#allocation18]   ;;  %s5774_s29 = int_to_ptr.hbm [resolvable:$true] %s5773_s29 }
 0x4e4   :  { %s5771_s1 = sshll.u32 %s9518_s30, 4  ;;  %s5772_s1 = int_to_ptr.vmem [resolvable:$true] %s5771_s1 }
 0x4e5   :  { %5779 = dma.vmem_to_hbm [thread:$0]  %s5772_s1, 16, %s5774_s29, [#allocation19], %s9499_s26, %s9499_s26, %s9517_s27  }
 0x4e6   :  { %5783 = vsyncadd [#allocation19], 224  ;;  %s5786_s13 = sshll.u32 %s10043_s11, 4  ;;  %s9519_s14 = smov [#allocation20]   ;;  %s5787_s13 = int_to_ptr.hbm [resolvable:$true] %s5786_s13 }
 0x4e7   :  { %s5784_s0 = sshll.u32 %s9519_s14, 4  ;;  %s9520_s15 = smov 32   ;;  %s5785_s0 = int_to_ptr.vmem [resolvable:$true] %s5784_s0 }
 0x4e8   :  { %s9521_s3 = smov 2  }
 0x4e9   :  { %5792 = dma.vmem_to_hbm [thread:$0]  %s5785_s0, 32, %s5787_s13, [#allocation19], %s9520_s15, %s9520_s15, %s9521_s3  }
 0x4ea   :  { %9493 = dma.done.wait [#allocation4], 128  }
 0x4eb   :  { %9494 = vsyncadd [#allocation4], 4294967168 }
 0x4ec   :  { %9495 = dma.done.wait [#allocation19], 384  }
 0x4ed   :  { %9496 = vsyncadd [#allocation19], 4294966912 }
 0x4ee   :  { %5805 = vsyncpa [#allocation3], 1 }
 0x4ef   :  { %5806 = vsyncpa [#allocation6], 1 }
 0x4f0   :  { %5807 = vsyncpa [#allocation9], 1 }
 0x4f1   :  { %5808 = vsyncpa [#allocation12], 1 }
 0x4f2   :  { %5809 = vsyncpa [#allocation15], 1 }
 0x4f3   :  { %5810 = vsyncpa [#allocation4], 1 }
 0x4f4   :  { %5811 = vsyncpa [#allocation19], 1 }

</bundles_post_ra>
